<compile_context>
chip_gen: v5e
topology: v5e:2x2
jax: 0.10.0
libtpu: 0.0.40
codegen_flags: <defaults>
</compile_context>

<pallas_src>
import functools

import jax
import jax.numpy as jnp
import numpy as np
from jax.experimental import pallas as pl
from jax.experimental.pallas import tpu as pltpu

LANE = 128  # TPU lane width; used to make the HBM logits output lane-dense.


# ----------------------------------------------------------------------------
# Fused kernel: one image per grid step.
# ----------------------------------------------------------------------------
def _cabrnet_fused_kernel(x_ref, w1_ref, b1_ref, w2_ref, b2_ref,
                          pt_ref, p2_ref, wl_ref, bl_ref, o_ref, *, H, W, eps):
    C = x_ref.shape[-1]
    D = w1_ref.shape[-1]
    HW = H * W

    # ---- Stage 1: 3x3 conv (pad=1) + bias + ReLU via 9 shifted bf16 matmuls. ----
    xv = x_ref[0]                                             # (H+2, W+2, C) f32, in VMEM
    acc = jnp.zeros((HW, D), jnp.float32)
    for t in range(9):                                        # static unroll over taps
        dy, dx = divmod(t, 3)
        patch = xv[dy:dy + H, dx:dx + W, :].reshape(HW, C)    # (HW, C)
        acc = acc + jnp.dot(patch.astype(jnp.bfloat16), w1_ref[t],
                            preferred_element_type=jnp.float32)
    feat = jnp.maximum(acc + b1_ref[...], 0.0)                # (HW, D) f32

    # ---- Stage 2: add-on 1x1 conv + bias + sigmoid (features stay in VMEM). ----
    feat = jnp.dot(feat.astype(jnp.bfloat16), w2_ref[...],
                   preferred_element_type=jnp.float32)
    feat = jax.nn.sigmoid(feat + b2_ref[...])                 # (HW, D) f32

    # ---- Stage 3: prototype head. ----
    # d2 = |f|^2 - 2 f.p + |p|^2 ; norms and combine in f32, cross term on MXU in bf16.
    f2 = jnp.sum(feat * feat, axis=-1, keepdims=True)         # (HW, 1) f32
    cross = jnp.dot(feat.astype(jnp.bfloat16), pt_ref[...],
                    preferred_element_type=jnp.float32)       # (HW, P)
    d2 = jnp.maximum(f2 - 2.0 * cross + p2_ref[...], 0.0)     # (HW, P)

    # Exact rewrite (requires eps < 1): max_{hw} log((d2+1)/(d2+eps)) ==
    # log((d2_min+1)/(d2_min+eps)).  Min first (cheap), transcendentals on (1, P) only.
    d2_min = jnp.min(d2, axis=0, keepdims=True)               # (1, P)
    sim = jnp.log(d2_min + 1.0) - jnp.log(d2_min + eps)       # (1, P), EUP only

    logits = jnp.dot(sim, wl_ref[...], preferred_element_type=jnp.float32)
    logits = logits + bl_ref[...]                             # (1, LANE-padded classes)
    o_ref[0, :, :] = logits.astype(o_ref.dtype)


def cabrnet_fused(x_pad, prep, *, eps=1e-4):
    """x_pad: (N, H+2, W+2, C) f32 halo-padded NHWC image batch."""
    n, hp, wp, c = x_pad.shape
    h, w = hp - 2, wp - 2
    d = prep["w1"].shape[-1]
    p = prep["protos_t"].shape[-1]
    cls_pad = prep["b_last"].shape[-1]
    kernel = functools.partial(_cabrnet_fused_kernel, H=h, W=w, eps=eps)
    return pl.pallas_call(
        kernel,
        out_shape=jax.ShapeDtypeStruct((n, 1, cls_pad), jnp.float32),
        grid=(n,),
        in_specs=[
            # per-image halo-padded input block
            pl.BlockSpec((1, hp, wp, c), lambda i: (i, 0, 0, 0)),
            # weights / prototypes: grid-invariant blocks (fetched once, kept resident)
            pl.BlockSpec((9, c, d), lambda i: (0, 0, 0)),      # w1 (taps, C, D) bf16
            pl.BlockSpec((1, d), lambda i: (0, 0)),            # b1
            pl.BlockSpec((d, d), lambda i: (0, 0)),            # w2 (D_in, D_out) bf16
            pl.BlockSpec((1, d), lambda i: (0, 0)),            # b2
            pl.BlockSpec((d, p), lambda i: (0, 0)),            # prototypes^T bf16
            pl.BlockSpec((1, p), lambda i: (0, 0)),            # |p|^2 f32
            pl.BlockSpec((p, cls_pad), lambda i: (0, 0)),      # w_last^T, lane-padded
            pl.BlockSpec((1, cls_pad), lambda i: (0, 0)),      # b_last, lane-padded
        ],
        out_specs=pl.BlockSpec((1, 1, cls_pad), lambda i: (i, 0, 0)),
        compiler_params=pltpu.CompilerParams(
            dimension_semantics=("parallel",),        # batch axis -> 2nd TC on v7x
            vmem_limit_bytes=32 * 1024 * 1024,        # explicit; re-derive for big HW / P
        ),
    )(x_pad, prep["w1"], prep["b1"], prep["w2"], prep["b2"],
      prep["protos_t"], prep["p2"], prep["w_last_t"], prep["b_last"])


# ----------------------------------------------------------------------------
# One-time, host-side weight preprocessing (hoisted out of the forward path).
# ----------------------------------------------------------------------------
def prepare_params(params):
    d, c = params["w_conv"].shape[:2]
    p = params["prototypes"].shape[0]
    num_classes = params["w_last"].shape[0]
    cls_pad = ((num_classes + LANE - 1) // LANE) * LANE       # lane-dense logits slab

    # w1[t=ky*3+kx, c, d] = w_conv[d, c, ky, kx]  (per-tap (C, D) slices)
    w1 = jnp.transpose(params["w_conv"].astype(jnp.float32), (2, 3, 1, 0)).reshape(9, c, d)
    protos = params["prototypes"].astype(jnp.float32)
    w_last_t = jnp.zeros((p, cls_pad), jnp.float32).at[:, :num_classes].set(
        params["w_last"].T.astype(jnp.float32))
    b_last = jnp.zeros((1, cls_pad), jnp.float32).at[0, :num_classes].set(
        params["b_last"].astype(jnp.float32))

    prep = {
        "w1": w1.astype(jnp.bfloat16),                          # (9, C, D) bf16 MXU operand
        "b1": params["b_conv"].reshape(1, d).astype(jnp.float32),
        "w2": params["w_addon"].T.astype(jnp.bfloat16),         # (D_in, D_out) bf16
        "b2": params["b_addon"].reshape(1, d).astype(jnp.float32),
        "protos_t": protos.T.astype(jnp.bfloat16),              # (D, P) bf16 for cross term
        "p2": jnp.sum(protos * protos, axis=-1).reshape(1, p),  # f32 squared norms
        "w_last_t": w_last_t,                                   # (P, 128) lane-dense
        "b_last": b_last,                                       # (1, 128)
    }
    return prep, num_classes


# ----------------------------------------------------------------------------
# CaBRNet.forward:  x -> extractor -> classifier   (single fused pallas_call)
# ----------------------------------------------------------------------------
@functools.partial(jax.jit, static_argnames=("num_classes",))
def cabrnet_forward(x_nchw, prep, *, num_classes):
    # Host-side glue is layout only: NCHW -> NHWC + 1-px zero halo for the 3x3 conv.
    x = jnp.transpose(x_nchw.astype(jnp.float32), (0, 2, 3, 1))
    x = jnp.pad(x, ((0, 0), (1, 1), (1, 1), (0, 0)))
    logits_pad = cabrnet_fused(x, prep)                        # (N, 1, cls_pad)
    return logits_pad[:, 0, :num_classes]


# ----------------------------------------------------------------------------
# Pure-JAX f32 reference (for correctness check).
# ----------------------------------------------------------------------------
def reference_forward(x, params, eps=1e-4):
    n, c, h, w = x.shape
    d_feat = params["w_conv"].shape[0]
    feat = jax.lax.conv_general_dilated(
        x, params["w_conv"], (1, 1), "SAME",
        dimension_numbers=("NCHW", "OIHW", "NCHW"))
    feat = jnp.maximum(feat + params["b_conv"][None, :, None, None], 0.0)
    feat = jnp.einsum("nchw,dc->ndhw", feat, params["w_addon"])
    feat = jax.nn.sigmoid(feat + params["b_addon"][None, :, None, None])
    f = feat.reshape(n, d_feat, h * w).transpose(0, 2, 1)      # (N, HW, D)
    p = params["prototypes"]
    d2 = jnp.maximum(
        jnp.sum(f * f, -1, keepdims=True)
        - 2.0 * jnp.einsum("nhd,pd->nhp", f, p)
        + jnp.sum(p * p, -1)[None, None, :],
        0.0,
    )
    sim = jnp.log((d2 + 1.0) / (d2 + eps))
    sim_max = jnp.max(sim, axis=1)
    return sim_max @ params["w_last"].T + params["b_last"]


if __name__ == "__main__":
    # Small shapes consistent with the module's forward pass.
    N, C, H, W = 2, 4, 16, 16        # input images (NCHW)
    D = 32                           # extractor output channels (num_features)
    NUM_CLASSES = 4
    P = 16                           # prototypes (4 per class)

    key = jax.random.PRNGKey(0)
    ks = jax.random.split(key, 8)
    params = {
        "w_conv":     0.1 * jax.random.normal(ks[0], (D, C, 3, 3), jnp.float32),
        "b_conv":     0.1 * jax.random.normal(ks[1], (D,), jnp.float32),
        "w_addon":    0.1 * jax.random.normal(ks[2], (D, D), jnp.float32),
        "b_addon":    0.1 * jax.random.normal(ks[3], (D,), jnp.float32),
        "prototypes": jax.random.uniform(ks[4], (P, D), jnp.float32),
        "w_last":     0.1 * jax.random.normal(ks[5], (NUM_CLASSES, P), jnp.float32),
        "b_last":     0.1 * jax.random.normal(ks[6], (NUM_CLASSES,), jnp.float32),
    }
    x = jax.random.normal(ks[7], (N, C, H, W), jnp.float32)

    prep, num_classes = prepare_params(params)                 # one-time weight prep
    logits = cabrnet_forward(x, prep, num_classes=num_classes)
    logits = jax.block_until_ready(logits)

    # Tolerance reflects bf16 MXU operands vs the all-f32 reference.
    ref = reference_forward(x, params)
    np.testing.assert_allclose(np.asarray(logits), np.asarray(ref), rtol=2e-2, atol=2e-2)

    print("KERNEL_OK")
</pallas_src>

<mosaic_0001>
module attributes {stable_mosaic.version = 11 : i64} {
  func.func @_cabrnet_fused_kernel(%arg0: i32, %arg1: memref<1x18x18x4xf32, #tpu.memory_space<vmem>>, %arg2: memref<9x4x32xbf16, #tpu.memory_space<vmem>>, %arg3: memref<1x32xf32, #tpu.memory_space<vmem>>, %arg4: memref<32x32xbf16, #tpu.memory_space<vmem>>, %arg5: memref<1x32xf32, #tpu.memory_space<vmem>>, %arg6: memref<32x16xbf16, #tpu.memory_space<vmem>>, %arg7: memref<1x16xf32, #tpu.memory_space<vmem>>, %arg8: memref<16x128xf32, #tpu.memory_space<vmem>>, %arg9: memref<1x128xf32, #tpu.memory_space<vmem>>, %arg10: memref<1x1x128xf32, #tpu.memory_space<vmem>>) attributes {dimension_semantics = [#tpu.dimension_semantics<parallel>], iteration_bounds = array<i64: 2>, scalar_prefetch = 0 : i64, scratch_operands = 0 : i64, tpu.core_type = #tpu.core_type<tc>, window_params = [{transform_indices = @transform_0, window_bounds = array<i64: 1, 18, 18, 4>}, {pipeline_mode = #tpu.pipeline_mode<synchronous>, transform_indices = @transform_1, window_bounds = array<i64: 9, 4, 32>}, {pipeline_mode = #tpu.pipeline_mode<synchronous>, transform_indices = @transform_2, window_bounds = array<i64: 1, 32>}, {pipeline_mode = #tpu.pipeline_mode<synchronous>, transform_indices = @transform_3, window_bounds = array<i64: 32, 32>}, {pipeline_mode = #tpu.pipeline_mode<synchronous>, transform_indices = @transform_4, window_bounds = array<i64: 1, 32>}, {pipeline_mode = #tpu.pipeline_mode<synchronous>, transform_indices = @transform_5, window_bounds = array<i64: 32, 16>}, {pipeline_mode = #tpu.pipeline_mode<synchronous>, transform_indices = @transform_6, window_bounds = array<i64: 1, 16>}, {pipeline_mode = #tpu.pipeline_mode<synchronous>, transform_indices = @transform_7, window_bounds = array<i64: 16, 128>}, {pipeline_mode = #tpu.pipeline_mode<synchronous>, transform_indices = @transform_8, window_bounds = array<i64: 1, 128>}, {transform_indices = @transform_9, window_bounds = array<i64: 1, 1, 128>}]} {
    %c0 = arith.constant 0 : index
    %c0_0 = arith.constant 0 : index
    %c0_1 = arith.constant 0 : index
    %c0_2 = arith.constant 0 : index
    %0 = vector.load %arg1[%c0, %c0_0, %c0_1, %c0_2] : memref<1x18x18x4xf32, #tpu.memory_space<vmem>>, vector<1x18x18x4xf32>
    %1 = vector.shape_cast %0 : vector<1x18x18x4xf32> to vector<18x18x4xf32>
    %cst = arith.constant 0.000000e+00 : f32
    %2 = vector.broadcast %cst : f32 to vector<256x32xf32>
    %3 = vector.extract_strided_slice %1 {offsets = [0, 0, 0], sizes = [16, 16, 4], strides = [1, 1, 1]} : vector<18x18x4xf32> to vector<16x16x4xf32>
    %4 = vector.shape_cast %3 : vector<16x16x4xf32> to vector<256x4xf32>
    %5 = arith.truncf %4 : vector<256x4xf32> to vector<256x4xbf16>
    %c0_3 = arith.constant 0 : index
    %c0_4 = arith.constant 0 : index
    %c0_5 = arith.constant 0 : index
    %6 = vector.load %arg2[%c0_3, %c0_4, %c0_5] : memref<9x4x32xbf16, #tpu.memory_space<vmem>>, vector<1x4x32xbf16>
    %7 = vector.shape_cast %6 : vector<1x4x32xbf16> to vector<4x32xbf16>
    %cst_6 = arith.constant dense<0.000000e+00> : vector<256x32xf32>
    %8 = tpu.matmul %5, %7, %cst_6 {dimension_numbers = #tpu.dot_dimension_numbers<[1], [0], [0], [1], [0, 0, 1, 1], [], []>} : vector<256x4xbf16>, vector<4x32xbf16>, vector<256x32xf32> -> vector<256x32xf32>
    %9 = arith.addf %2, %8 : vector<256x32xf32>
    %10 = vector.extract_strided_slice %1 {offsets = [0, 1, 0], sizes = [16, 16, 4], strides = [1, 1, 1]} : vector<18x18x4xf32> to vector<16x16x4xf32>
    %11 = vector.shape_cast %10 : vector<16x16x4xf32> to vector<256x4xf32>
    %12 = arith.truncf %11 : vector<256x4xf32> to vector<256x4xbf16>
    %c1 = arith.constant 1 : index
    %c0_7 = arith.constant 0 : index
    %c0_8 = arith.constant 0 : index
    %13 = vector.load %arg2[%c1, %c0_7, %c0_8] : memref<9x4x32xbf16, #tpu.memory_space<vmem>>, vector<1x4x32xbf16>
    %14 = vector.shape_cast %13 : vector<1x4x32xbf16> to vector<4x32xbf16>
    %cst_9 = arith.constant dense<0.000000e+00> : vector<256x32xf32>
    %15 = tpu.matmul %12, %14, %cst_9 {dimension_numbers = #tpu.dot_dimension_numbers<[1], [0], [0], [1], [0, 0, 1, 1], [], []>} : vector<256x4xbf16>, vector<4x32xbf16>, vector<256x32xf32> -> vector<256x32xf32>
    %16 = arith.addf %9, %15 : vector<256x32xf32>
    %17 = vector.extract_strided_slice %1 {offsets = [0, 2, 0], sizes = [16, 16, 4], strides = [1, 1, 1]} : vector<18x18x4xf32> to vector<16x16x4xf32>
    %18 = vector.shape_cast %17 : vector<16x16x4xf32> to vector<256x4xf32>
    %19 = arith.truncf %18 : vector<256x4xf32> to vector<256x4xbf16>
    %c2 = arith.constant 2 : index
    %c0_10 = arith.constant 0 : index
    %c0_11 = arith.constant 0 : index
    %20 = vector.load %arg2[%c2, %c0_10, %c0_11] : memref<9x4x32xbf16, #tpu.memory_space<vmem>>, vector<1x4x32xbf16>
    %21 = vector.shape_cast %20 : vector<1x4x32xbf16> to vector<4x32xbf16>
    %cst_12 = arith.constant dense<0.000000e+00> : vector<256x32xf32>
    %22 = tpu.matmul %19, %21, %cst_12 {dimension_numbers = #tpu.dot_dimension_numbers<[1], [0], [0], [1], [0, 0, 1, 1], [], []>} : vector<256x4xbf16>, vector<4x32xbf16>, vector<256x32xf32> -> vector<256x32xf32>
    %23 = arith.addf %16, %22 : vector<256x32xf32>
    %24 = vector.extract_strided_slice %1 {offsets = [1, 0, 0], sizes = [16, 16, 4], strides = [1, 1, 1]} : vector<18x18x4xf32> to vector<16x16x4xf32>
    %25 = vector.shape_cast %24 : vector<16x16x4xf32> to vector<256x4xf32>
    %26 = arith.truncf %25 : vector<256x4xf32> to vector<256x4xbf16>
    %c3 = arith.constant 3 : index
    %c0_13 = arith.constant 0 : index
    %c0_14 = arith.constant 0 : index
    %27 = vector.load %arg2[%c3, %c0_13, %c0_14] : memref<9x4x32xbf16, #tpu.memory_space<vmem>>, vector<1x4x32xbf16>
    %28 = vector.shape_cast %27 : vector<1x4x32xbf16> to vector<4x32xbf16>
    %cst_15 = arith.constant dense<0.000000e+00> : vector<256x32xf32>
    %29 = tpu.matmul %26, %28, %cst_15 {dimension_numbers = #tpu.dot_dimension_numbers<[1], [0], [0], [1], [0, 0, 1, 1], [], []>} : vector<256x4xbf16>, vector<4x32xbf16>, vector<256x32xf32> -> vector<256x32xf32>
    %30 = arith.addf %23, %29 : vector<256x32xf32>
    %31 = vector.extract_strided_slice %1 {offsets = [1, 1, 0], sizes = [16, 16, 4], strides = [1, 1, 1]} : vector<18x18x4xf32> to vector<16x16x4xf32>
    %32 = vector.shape_cast %31 : vector<16x16x4xf32> to vector<256x4xf32>
    %33 = arith.truncf %32 : vector<256x4xf32> to vector<256x4xbf16>
    %c4 = arith.constant 4 : index
    %c0_16 = arith.constant 0 : index
    %c0_17 = arith.constant 0 : index
    %34 = vector.load %arg2[%c4, %c0_16, %c0_17] : memref<9x4x32xbf16, #tpu.memory_space<vmem>>, vector<1x4x32xbf16>
    %35 = vector.shape_cast %34 : vector<1x4x32xbf16> to vector<4x32xbf16>
    %cst_18 = arith.constant dense<0.000000e+00> : vector<256x32xf32>
    %36 = tpu.matmul %33, %35, %cst_18 {dimension_numbers = #tpu.dot_dimension_numbers<[1], [0], [0], [1], [0, 0, 1, 1], [], []>} : vector<256x4xbf16>, vector<4x32xbf16>, vector<256x32xf32> -> vector<256x32xf32>
    %37 = arith.addf %30, %36 : vector<256x32xf32>
    %38 = vector.extract_strided_slice %1 {offsets = [1, 2, 0], sizes = [16, 16, 4], strides = [1, 1, 1]} : vector<18x18x4xf32> to vector<16x16x4xf32>
    %39 = vector.shape_cast %38 : vector<16x16x4xf32> to vector<256x4xf32>
    %40 = arith.truncf %39 : vector<256x4xf32> to vector<256x4xbf16>
    %c5 = arith.constant 5 : index
    %c0_19 = arith.constant 0 : index
    %c0_20 = arith.constant 0 : index
    %41 = vector.load %arg2[%c5, %c0_19, %c0_20] : memref<9x4x32xbf16, #tpu.memory_space<vmem>>, vector<1x4x32xbf16>
    %42 = vector.shape_cast %41 : vector<1x4x32xbf16> to vector<4x32xbf16>
    %cst_21 = arith.constant dense<0.000000e+00> : vector<256x32xf32>
    %43 = tpu.matmul %40, %42, %cst_21 {dimension_numbers = #tpu.dot_dimension_numbers<[1], [0], [0], [1], [0, 0, 1, 1], [], []>} : vector<256x4xbf16>, vector<4x32xbf16>, vector<256x32xf32> -> vector<256x32xf32>
    %44 = arith.addf %37, %43 : vector<256x32xf32>
    %45 = vector.extract_strided_slice %1 {offsets = [2, 0, 0], sizes = [16, 16, 4], strides = [1, 1, 1]} : vector<18x18x4xf32> to vector<16x16x4xf32>
    %46 = vector.shape_cast %45 : vector<16x16x4xf32> to vector<256x4xf32>
    %47 = arith.truncf %46 : vector<256x4xf32> to vector<256x4xbf16>
    %c6 = arith.constant 6 : index
    %c0_22 = arith.constant 0 : index
    %c0_23 = arith.constant 0 : index
    %48 = vector.load %arg2[%c6, %c0_22, %c0_23] : memref<9x4x32xbf16, #tpu.memory_space<vmem>>, vector<1x4x32xbf16>
    %49 = vector.shape_cast %48 : vector<1x4x32xbf16> to vector<4x32xbf16>
    %cst_24 = arith.constant dense<0.000000e+00> : vector<256x32xf32>
    %50 = tpu.matmul %47, %49, %cst_24 {dimension_numbers = #tpu.dot_dimension_numbers<[1], [0], [0], [1], [0, 0, 1, 1], [], []>} : vector<256x4xbf16>, vector<4x32xbf16>, vector<256x32xf32> -> vector<256x32xf32>
    %51 = arith.addf %44, %50 : vector<256x32xf32>
    %52 = vector.extract_strided_slice %1 {offsets = [2, 1, 0], sizes = [16, 16, 4], strides = [1, 1, 1]} : vector<18x18x4xf32> to vector<16x16x4xf32>
    %53 = vector.shape_cast %52 : vector<16x16x4xf32> to vector<256x4xf32>
    %54 = arith.truncf %53 : vector<256x4xf32> to vector<256x4xbf16>
    %c7 = arith.constant 7 : index
    %c0_25 = arith.constant 0 : index
    %c0_26 = arith.constant 0 : index
    %55 = vector.load %arg2[%c7, %c0_25, %c0_26] : memref<9x4x32xbf16, #tpu.memory_space<vmem>>, vector<1x4x32xbf16>
    %56 = vector.shape_cast %55 : vector<1x4x32xbf16> to vector<4x32xbf16>
    %cst_27 = arith.constant dense<0.000000e+00> : vector<256x32xf32>
    %57 = tpu.matmul %54, %56, %cst_27 {dimension_numbers = #tpu.dot_dimension_numbers<[1], [0], [0], [1], [0, 0, 1, 1], [], []>} : vector<256x4xbf16>, vector<4x32xbf16>, vector<256x32xf32> -> vector<256x32xf32>
    %58 = arith.addf %51, %57 : vector<256x32xf32>
    %59 = vector.extract_strided_slice %1 {offsets = [2, 2, 0], sizes = [16, 16, 4], strides = [1, 1, 1]} : vector<18x18x4xf32> to vector<16x16x4xf32>
    %60 = vector.shape_cast %59 : vector<16x16x4xf32> to vector<256x4xf32>
    %61 = arith.truncf %60 : vector<256x4xf32> to vector<256x4xbf16>
    %c8 = arith.constant 8 : index
    %c0_28 = arith.constant 0 : index
    %c0_29 = arith.constant 0 : index
    %62 = vector.load %arg2[%c8, %c0_28, %c0_29] : memref<9x4x32xbf16, #tpu.memory_space<vmem>>, vector<1x4x32xbf16>
    %63 = vector.shape_cast %62 : vector<1x4x32xbf16> to vector<4x32xbf16>
    %cst_30 = arith.constant dense<0.000000e+00> : vector<256x32xf32>
    %64 = tpu.matmul %61, %63, %cst_30 {dimension_numbers = #tpu.dot_dimension_numbers<[1], [0], [0], [1], [0, 0, 1, 1], [], []>} : vector<256x4xbf16>, vector<4x32xbf16>, vector<256x32xf32> -> vector<256x32xf32>
    %65 = arith.addf %58, %64 : vector<256x32xf32>
    %c0_31 = arith.constant 0 : index
    %c0_32 = arith.constant 0 : index
    %66 = vector.load %arg3[%c0_31, %c0_32] : memref<1x32xf32, #tpu.memory_space<vmem>>, vector<1x32xf32>
    %67 = vector.broadcast %66 : vector<1x32xf32> to vector<256x32xf32>
    %68 = arith.addf %65, %67 : vector<256x32xf32>
    %cst_33 = arith.constant 0.000000e+00 : f32
    %69 = vector.broadcast %cst_33 : f32 to vector<256x32xf32>
    %70 = arith.maximumf %68, %69 : vector<256x32xf32>
    %71 = arith.truncf %70 : vector<256x32xf32> to vector<256x32xbf16>
    %c0_34 = arith.constant 0 : index
    %c0_35 = arith.constant 0 : index
    %72 = vector.load %arg4[%c0_34, %c0_35] : memref<32x32xbf16, #tpu.memory_space<vmem>>, vector<32x32xbf16>
    %cst_36 = arith.constant dense<0.000000e+00> : vector<256x32xf32>
    %73 = tpu.matmul %71, %72, %cst_36 {dimension_numbers = #tpu.dot_dimension_numbers<[1], [0], [0], [1], [0, 0, 1, 1], [], []>} : vector<256x32xbf16>, vector<32x32xbf16>, vector<256x32xf32> -> vector<256x32xf32>
    %c0_37 = arith.constant 0 : index
    %c0_38 = arith.constant 0 : index
    %74 = vector.load %arg5[%c0_37, %c0_38] : memref<1x32xf32, #tpu.memory_space<vmem>>, vector<1x32xf32>
    %75 = vector.broadcast %74 : vector<1x32xf32> to vector<256x32xf32>
    %76 = arith.addf %73, %75 : vector<256x32xf32>
    %77 = arith.negf %76 : vector<256x32xf32>
    %78 = math.exp %77 : vector<256x32xf32>
    %cst_39 = arith.constant 1.000000e+00 : f32
    %79 = vector.broadcast %cst_39 : f32 to vector<256x32xf32>
    %80 = arith.addf %79, %78 : vector<256x32xf32>
    %81 = arith.divf %79, %80 : vector<256x32xf32>
    %82 = arith.mulf %81, %81 : vector<256x32xf32>
    %cst_40 = arith.constant dense<0.000000e+00> : vector<256xf32>
    %83 = vector.multi_reduction <add>, %82, %cst_40 [1] : vector<256x32xf32> to vector<256xf32>
    %84 = vector.shape_cast %83 : vector<256xf32> to vector<256x1xf32>
    %85 = arith.truncf %81 : vector<256x32xf32> to vector<256x32xbf16>
    %c0_41 = arith.constant 0 : index
    %c0_42 = arith.constant 0 : index
    %86 = vector.load %arg6[%c0_41, %c0_42] : memref<32x16xbf16, #tpu.memory_space<vmem>>, vector<32x16xbf16>
    %cst_43 = arith.constant dense<0.000000e+00> : vector<256x16xf32>
    %87 = tpu.matmul %85, %86, %cst_43 {dimension_numbers = #tpu.dot_dimension_numbers<[1], [0], [0], [1], [0, 0, 1, 1], [], []>} : vector<256x32xbf16>, vector<32x16xbf16>, vector<256x16xf32> -> vector<256x16xf32>
    %cst_44 = arith.constant 2.000000e+00 : f32
    %88 = vector.broadcast %cst_44 : f32 to vector<256x16xf32>
    %89 = arith.mulf %88, %87 : vector<256x16xf32>
    %90 = vector.broadcast %84 : vector<256x1xf32> to vector<256x16xf32>
    %91 = arith.subf %90, %89 : vector<256x16xf32>
    %c0_45 = arith.constant 0 : index
    %c0_46 = arith.constant 0 : index
    %92 = vector.load %arg7[%c0_45, %c0_46] : memref<1x16xf32, #tpu.memory_space<vmem>>, vector<1x16xf32>
    %93 = vector.broadcast %92 : vector<1x16xf32> to vector<256x16xf32>
    %94 = arith.addf %91, %93 : vector<256x16xf32>
    %cst_47 = arith.constant 0.000000e+00 : f32
    %95 = vector.broadcast %cst_47 : f32 to vector<256x16xf32>
    %96 = arith.maximumf %94, %95 : vector<256x16xf32>
    %cst_48 = arith.constant dense<0x7F800000> : vector<16xf32>
    %97 = vector.multi_reduction <minimumf>, %96, %cst_48 [0] : vector<256x16xf32> to vector<16xf32>
    %98 = vector.shape_cast %97 : vector<16xf32> to vector<1x16xf32>
    %cst_49 = arith.constant 1.000000e+00 : f32
    %99 = vector.broadcast %cst_49 : f32 to vector<1x16xf32>
    %100 = arith.addf %98, %99 : vector<1x16xf32>
    %101 = math.log %100 : vector<1x16xf32>
    %cst_50 = arith.constant 9.99999974E-5 : f32
    %102 = vector.broadcast %cst_50 : f32 to vector<1x16xf32>
    %103 = arith.addf %98, %102 : vector<1x16xf32>
    %104 = math.log %103 : vector<1x16xf32>
    %105 = arith.subf %101, %104 : vector<1x16xf32>
    %c0_51 = arith.constant 0 : index
    %c0_52 = arith.constant 0 : index
    %106 = vector.load %arg8[%c0_51, %c0_52] : memref<16x128xf32, #tpu.memory_space<vmem>>, vector<16x128xf32>
    %cst_53 = arith.constant dense<0.000000e+00> : vector<1x128xf32>
    %107 = tpu.matmul %105, %106, %cst_53 {dimension_numbers = #tpu.dot_dimension_numbers<[1], [0], [0], [1], [0, 0, 1, 1], [], []>} : vector<1x16xf32>, vector<16x128xf32>, vector<1x128xf32> -> vector<1x128xf32>
    %c0_54 = arith.constant 0 : index
    %c0_55 = arith.constant 0 : index
    %108 = vector.load %arg9[%c0_54, %c0_55] : memref<1x128xf32, #tpu.memory_space<vmem>>, vector<1x128xf32>
    %109 = arith.addf %107, %108 : vector<1x128xf32>
    %c0_56 = arith.constant 0 : index
    %c0_57 = arith.constant 0 : index
    %c0_58 = arith.constant 0 : index
    %110 = vector.load %arg10[%c0_56, %c0_57, %c0_58] : memref<1x1x128xf32, #tpu.memory_space<vmem>>, vector<1x1x128xf32>
    %111 = vector.shape_cast %110 : vector<1x1x128xf32> to vector<1x128xf32>
    %112 = vector.shape_cast %109 : vector<1x128xf32> to vector<1x1x128xf32>
    tpu.vector_store %arg10[%c0_56, %c0_57, %c0_58], %112 {strides = array<i32>} : memref<1x1x128xf32, #tpu.memory_space<vmem>>, vector<1x1x128xf32>,
    return
  }
  func.func @transform_0(%arg0: i32) -> (i32, i32, i32, i32) {
    %c0_i32 = arith.constant 0 : i32
    %c0_i32_0 = arith.constant 0 : i32
    %c0_i32_1 = arith.constant 0 : i32
    %c0_i32_2 = arith.constant 0 : i32
    return %arg0, %c0_i32, %c0_i32_0, %c0_i32_1 : i32, i32, i32, i32
  }
  func.func @transform_1(%arg0: i32) -> (i32, i32, i32) {
    %c0_i32 = arith.constant 0 : i32
    %c0_i32_0 = arith.constant 0 : i32
    %c0_i32_1 = arith.constant 0 : i32
    %c0_i32_2 = arith.constant 0 : i32
    return %c0_i32, %c0_i32_0, %c0_i32_1 : i32, i32, i32
  }
  func.func @transform_2(%arg0: i32) -> (i32, i32) {
    %c0_i32 = arith.constant 0 : i32
    %c0_i32_0 = arith.constant 0 : i32
    %c0_i32_1 = arith.constant 0 : i32
    return %c0_i32, %c0_i32_0 : i32, i32
  }
  func.func @transform_3(%arg0: i32) -> (i32, i32) {
    %c0_i32 = arith.constant 0 : i32
    %c0_i32_0 = arith.constant 0 : i32
    %c0_i32_1 = arith.constant 0 : i32
    return %c0_i32, %c0_i32_0 : i32, i32
  }
  func.func @transform_4(%arg0: i32) -> (i32, i32) {
    %c0_i32 = arith.constant 0 : i32
    %c0_i32_0 = arith.constant 0 : i32
    %c0_i32_1 = arith.constant 0 : i32
    return %c0_i32, %c0_i32_0 : i32, i32
  }
  func.func @transform_5(%arg0: i32) -> (i32, i32) {
    %c0_i32 = arith.constant 0 : i32
    %c0_i32_0 = arith.constant 0 : i32
    %c0_i32_1 = arith.constant 0 : i32
    return %c0_i32, %c0_i32_0 : i32, i32
  }
  func.func @transform_6(%arg0: i32) -> (i32, i32) {
    %c0_i32 = arith.constant 0 : i32
    %c0_i32_0 = arith.constant 0 : i32
    %c0_i32_1 = arith.constant 0 : i32
    return %c0_i32, %c0_i32_0 : i32, i32
  }
  func.func @transform_7(%arg0: i32) -> (i32, i32) {
    %c0_i32 = arith.constant 0 : i32
    %c0_i32_0 = arith.constant 0 : i32
    %c0_i32_1 = arith.constant 0 : i32
    return %c0_i32, %c0_i32_0 : i32, i32
  }
  func.func @transform_8(%arg0: i32) -> (i32, i32) {
    %c0_i32 = arith.constant 0 : i32
    %c0_i32_0 = arith.constant 0 : i32
    %c0_i32_1 = arith.constant 0 : i32
    return %c0_i32, %c0_i32_0 : i32, i32
  }
  func.func @transform_9(%arg0: i32) -> (i32, i32, i32) {
    %c0_i32 = arith.constant 0 : i32
    %c0_i32_0 = arith.constant 0 : i32
    %c0_i32_1 = arith.constant 0 : i32
    return %arg0, %c0_i32, %c0_i32_0 : i32, i32, i32
  }
}

</mosaic_0001>

<bundles_post_ra>
// kernel: cabrnet_forward.1
= control target key start
LH: loop header
LB: loop body
LE: loop exit
PB: predicated region body
PF: predicated region fallthrough
CT: control target
= control target key end

     0   :  { %14 = vsyncpa [#allocation3], 0  ;;  %s5429_s0 = inlined_call_operand.vmem [shape: f32[2,18,18,4], index: 0, kind: input, shape index: {}]   ;;  %s5430_s1 = inlined_call_operand.vmem [shape: bf16[9,4,32], index: 1, kind: input, shape index: {}]   ;;  %s5431_s2 = inlined_call_operand.vmem [shape: f32[1,32], index: 2, kind: input, shape index: {}]   ;;  %s5432_s3 = inlined_call_operand.vmem [shape: bf16[32,32], index: 3, kind: input, shape index: {}]   ;;  %s5433_s4 = inlined_call_operand.vmem [shape: f32[1,32], index: 4, kind: input, shape index: {}]   ;;  %s5434_s5 = inlined_call_operand.vmem [shape: bf16[32,16], index: 5, kind: input, shape index: {}]   ;;  %s5435_s6 = inlined_call_operand.vmem [shape: f32[1,16], index: 6, kind: input, shape index: {}]   ;;  %s5436_s7 = inlined_call_operand.vmem [shape: f32[16,128], index: 7, kind: input, shape index: {}]   ;;  %s5437_s8 = inlined_call_operand.vmem [shape: f32[1,128], index: 8, kind: input, shape index: {}]   ;;  %s5438_s9 = inlined_call_operand.hbm [shape: f32[2,1,128], index: 9, kind: output, shape index: {}]  }
   0x1   :  { %16 = vsyncpa [#allocation3 + $0x1], 0  ;;  %s3970_s30 = smov 0   ;;  %s3972_s10 = smov 0  }
   0x2   :  { %s3974_s11 = smov 0   ;;  %s3976_s12 = smov 0  }
   0x3 LB: > { %s3991_s13 = sadd.s32 4294967295, %s3918_s12   ;;  %s3431_s14 = sadd.s32 4294967294, %s3918_s12   ;;  %s3918_s12 = sphi %s3976_s12, %s5535_s12   ;;  %s3914_s11 = sphi %s3974_s11, %s5534_s11   ;;  %s3910_s10 = sphi %s3972_s10, %s5533_s10   ;;  %s3906_s30 = sphi %s3970_s30, %s5532_s30  }
   0x4   : > { %s3995_s15 = sadd.s32 1, %s3918_s12   ;;  %s223_s16 = sadd.s32 1, %s3914_s11 }
   0x5   : > { %s220_s17 = ssub.s32 %s3918_s12, %s3995_s15  ;;  %p233_p0 = scmp.ne.s32.totalorder %s3914_s11, %s3910_s10 }
   0x6   : > { %p221_p1 = scmp.eq.s32.totalorder %s220_s17, 0  ;;  %p234_p2 = scmp.eq.s32.totalorder %s3991_s13, 1 }
   0x7   : > { %p239_p3 = scmp.ne.s32.totalorder %s3910_s10, %s3906_s30  ;;  %p240_p4 = scmp.eq.s32.totalorder %s3431_s14, 1 }
   0x8   : > { %s4006_s18 = scalar_select %p221_p1, %s3914_s11, %s223_s16  }
   0x9   : > { %p4008_p5 = por %p234_p2, %p233_p0  ;;  %p4012_p6 = por %p240_p4, %p239_p3 }
   0xa   : > { %p3434_p7 = scmp.ge.s32.totalorder %s3918_s12, 1  ;;  %p290_p8 = scmp.lt.s32.totalorder %s3918_s12, 3 }
   0xc   : > { %p291_p9 = pnand %p3434_p7, %p290_p8 }
   0xe   : > { %294 = sbr.rel (%p291_p9) target bundleno = 1358 (0x54e), region = 56 }
  0x13   : > { %v3436_v0 = vld [vmem:[%s5430_s1 + $0x2] sm:$0x3]  ;;  %vm630_vm0 = vcmask 1041408   ;;  %v401_v1 = vld [vmem:[%s5430_s1] sm:$0x3]  ;;  %p325_p10 = scmp.lt.s32.totalorder %s3991_s13, 1  ;;  %s3372_s24 = scalar_lea.hbm %s5438_s9, %s3991_s13 }
  0x14   : > { %v632_v2 = vsel %vm630_vm0, %v3436_v0, 0  ;;  %v772_v3 = vsel %vm630_vm0, %v401_v1, 0  ;;  %v3469_v4 = vld [vmem:[%s5430_s1 + $0x4] sm:$0x3]  ;;  %v3503_v6 = vld [vmem:[%s5430_s1 + $0x8] sm:$0x3] }
  0x15   : > { %641 = vmatpush.bf16.msra.mxu0 %v632_v2  ;;  %3675 = vmatpush.bf16.msra.mxu3 %v632_v2  ;;  %v1043_v5 = vsel %vm630_vm0, %v3469_v4, 0  ;;  %s326_s27 = scalar_select %p325_p10, %s3991_s13, 1  ;;  %v1313_v7 = vsel %vm630_vm0, %v3503_v6, 0  ;;  %vm450_vm1 = vcmask 1046528   ;;  %vm581_vm2 = vcmask 31744  }
  0x16   : > { %781 = vmatpush.bf16.msra.mxu1 %v772_v3  ;;  %1052 = vmatpush.bf16.msra.mxu2 %v1043_v5  ;;  %vm863_vm3 = vcmask 1045504   ;;  %vm2084_vm4 = vcmask 261120   ;;  %s323_s17 = sand.u32 1, %s3910_s10   ;;  %s3876_s23 = scalar_lea.hbm %s5438_s9, 2 }
  0x17   : > { %s3678_s14 = smul.u32 432, %s326_s27  ;;  %s324_s27 = scalar_lea.vmem [#allocation2], %s323_s17 }
  0x18   : > { %s3374_s28 = sshll.u32 %s324_s27, 4  ;;  %s3364_s29 = scalar_lea.sflag [#allocation3], %s323_s17  ;;  %s3375_s28 = int_to_ptr.vmem [resolvable:$true] %s3374_s28 }
  0x19   : > { %1322 = vmatpush.bf16.msrb.mxu0 %v1313_v7  ;;  %3676 = vmatpush.bf16.msrb.mxu3 %v772_v3  ;;  %s4039_s21 = scalar_lea.vmem %s5429_s0, %s3678_s14 }
  0x1a   : > { %v331_v8 = vld [vmem:[%s4039_s21] sm:$0xff]  ;;  %v332_v9 = vld [vmem:[%s4039_s21 + $0x8] sm:$0xff]  ;;  %v333_v10 = vld [vmem:[%s4039_s21 + $0x10] sm:$0x3] }
  0x1b   : > { %v451_v11 = vrot.slane %v331_v8, 1  ;;  %v452_v12 = vrot.slane %v332_v9, 1  ;;  %v454_v13 = vrot.slane %v333_v10, 1  ;;  %v4045_v14 = vld [vmem:[%s4039_s21 + $0x138] sm:$0xff]  ;;  %v4048_v15 = vld [vmem:[%s4039_s21 + $0x140] sm:$0xff]  ;;  %v385_v16 = vpack.c.bf16 %v332_v9, %v331_v8  ;;  %v4072_v36 = vld [vmem:[%s4039_s21 + $0x150] sm:$0xff] }
  0x1c   : > { %v4051_v17 = vld [vmem:[%s4039_s21 + $0x148] sm:$0x3]  ;;  %v516_v18 = vrot.slane %v4045_v14, 1  ;;  %v517_v19 = vrot.slane %v4048_v15, 1  ;;  %v864_v25 = vrot.slane %v331_v8, 2  ;;  %v865_v26 = vrot.slane %v332_v9, 2 }
  0x1d   : > { %v453_v20 = vsel %vm450_vm1, %v451_v11, %v452_v12  ;;  %v455_v21 = vsel %vm450_vm1, %v452_v12, %v454_v13  ;;  %v519_v22 = vrot.slane %v4051_v17, 1  ;;  %3453 = vmatmul.msk.bf16.vlgmr.msra.gmra.mxu1 %vm581_vm2, %v385_v16  ;;  %v867_v28 = vrot.slane %v333_v10, 2  ;;  %v334_v32 = vld [vmem:[%s4039_s21 + $0x18] sm:$0xff]  ;;  %v335_v33 = vld [vmem:[%s4039_s21 + $0x20] sm:$0xff]  ;;  %v336_v34 = vld [vmem:[%s4039_s21 + $0x28] sm:$0x3] }
  0x1e   : > { %v563_v23 = vpack.c.bf16 %v455_v21, %v453_v20  ;;  %v518_v24 = vsel %vm450_vm1, %v516_v18, %v517_v19  ;;  %v866_v30 = vsel %vm863_vm3, %v864_v25, %v865_v26  ;;  %v456_v37 = vrot.slane %v334_v32, 1  ;;  %v4076_v40 = vld [vmem:[%s4039_s21 + $0x158] sm:$0xff]  ;;  %v4079_v41 = vld [vmem:[%s4039_s21 + $0x160] sm:$0x3]  ;;  %v337_v58 = vld [vmem:[%s4039_s21 + $0x30] sm:$0xff] }
  0x1f   : > { %v520_v27 = vsel %vm450_vm1, %v517_v19, %v519_v22  ;;  %v868_v31 = vsel %vm863_vm3, %v865_v26, %v867_v28  ;;  %v457_v38 = vrot.slane %v335_v33, 1  ;;  %v459_v39 = vrot.slane %v336_v34, 1  ;;  %v338_v59 = vld [vmem:[%s4039_s21 + $0x38] sm:$0xff]  ;;  %v339_v60 = vld [vmem:[%s4039_s21 + $0x40] sm:$0x3]  ;;  %v4110_v63 = vld [vmem:[%s4039_s21 + $0x168] sm:$0xff] }
  0x20   : > { %3437 = vmatmul.msk.bf16.vlgmr.msra.gmra.mxu0 %vm581_vm2, %v563_v23  ;;  %v4062_v29 = vpack.c.bf16 %v520_v27, %v518_v24  ;;  %v976_v35 = vpack.c.bf16 %v868_v31, %v866_v30  ;;  %v521_v42 = vrot.slane %v4072_v36, 1  ;;  %v522_v43 = vrot.slane %v4076_v40, 1  ;;  %v4113_v0 = vld [vmem:[%s4039_s21 + $0x170] sm:$0xff]  ;;  %v4116_v1 = vld [vmem:[%s4039_s21 + $0x178] sm:$0x3]  ;;  %v340_v22 = vld [vmem:[%s4039_s21 + $0x48] sm:$0xff] }
  0x21   : > { %v524_v44 = vrot.slane %v4079_v41, 1  ;;  %v458_v45 = vsel %vm450_vm1, %v456_v37, %v457_v38  ;;  %v460_v46 = vsel %vm450_vm1, %v457_v38, %v459_v39  ;;  %v4086_v47 = vpack.c.bf16 %v335_v33, %v334_v32  ;;  %v341_v23 = vld [vmem:[%s4039_s21 + $0x50] sm:$0xff]  ;;  %v342_v24 = vld [vmem:[%s4039_s21 + $0x58] sm:$0x3] }
  0x22   : > { %5472 = vst [vmem:[#allocation5_spill] sm:$0xff] %v4062_v29  ;;  %3450 = vmatmul.msk.bf16.vlgmr.msra.gmra.mxu3 %vm581_vm2, %v4062_v29  ;;  %3470 = vmatmul.msk.bf16.vlgmr.msra.gmra.mxu2 %vm581_vm2, %v976_v35  ;;  %v869_v48 = vrot.slane %v334_v32, 2  ;;  %v870_v49 = vrot.slane %v335_v33, 2  ;;  %v872_v50 = vrot.slane %v336_v34, 2  ;;  %v523_v51 = vsel %vm450_vm1, %v521_v42, %v522_v43 }
  0x23   : > { %3677 = vmatpush.bf16.msra.mxu3 %v1043_v5  ;;  %v525_v52 = vsel %vm450_vm1, %v522_v43, %v524_v44  ;;  %v4090_v53 = vpack.c.bf16 %v460_v46, %v458_v45  ;;  %v461_v61 = vrot.slane %v337_v58, 1  ;;  %v462_v62 = vrot.slane %v338_v59, 1  ;;  %v343_v43 = vld [vmem:[%s4039_s21 + $0x60] sm:$0xff]  ;;  %v344_v44 = vld [vmem:[%s4039_s21 + $0x68] sm:$0xff]  ;;  %v345_v45 = vld [vmem:[%s4039_s21 + $0x70] sm:$0x3] }
  0x24   : > { %v871_v54 = vsel %vm863_vm3, %v869_v48, %v870_v49  ;;  %v873_v55 = vsel %vm863_vm3, %v870_v49, %v872_v50  ;;  %v4096_v56 = vpack.c.bf16 %v525_v52, %v523_v51  ;;  %v464_v2 = vrot.slane %v339_v60, 1 }
  0x25   : > { %v4100_v57 = vpack.c.bf16 %v873_v55, %v871_v54  ;;  %v526_v3 = vrot.slane %v4110_v63, 1  ;;  %v527_v4 = vrot.slane %v4113_v0, 1  ;;  %v529_v5 = vrot.slane %v4116_v1, 1 }
  0x26   : > { %5473 = vst [vmem:[#allocation6_spill] sm:$0xff] %v4096_v56  ;;  %v463_v6 = vsel %vm450_vm1, %v461_v61, %v462_v62  ;;  %v4122_v7 = vpack.c.bf16 %v338_v59, %v337_v58  ;;  %v465_v8 = vsel %vm450_vm1, %v462_v62, %v464_v2  ;;  %v874_v9 = vrot.slane %v337_v58, 2 }
  0x27   : > { %v875_v10 = vrot.slane %v338_v59, 2  ;;  %v877_v11 = vrot.slane %v339_v60, 2  ;;  %v528_v12 = vsel %vm450_vm1, %v526_v3, %v527_v4  ;;  %v530_v13 = vsel %vm450_vm1, %v527_v4, %v529_v5  ;;  %v346_v5 = vld [vmem:[%s4039_s21 + $0x78] sm:$0xff] }
  0x28   : > { %v4127_v16 = vpack.c.bf16 %v465_v8, %v463_v6  ;;  %v4133_v20 = vpack.c.bf16 %v530_v13, %v528_v12  ;;  %v466_v25 = vrot.slane %v340_v22, 1  ;;  %v467_v26 = vrot.slane %v341_v23, 1  ;;  %v348_v6 = vld [vmem:[%s4039_s21 + $0x88] sm:$0x3] }
  0x29   : > { %v876_v18 = vsel %vm863_vm3, %v874_v9, %v875_v10  ;;  %v878_v19 = vsel %vm863_vm3, %v875_v10, %v877_v11  ;;  %v469_v27 = vrot.slane %v342_v24, 1  ;;  %v4148_v31 = vpack.c.bf16 %v341_v23, %v340_v22 }
  0x2a   : > { %5474 = vst [vmem:[#allocation7_spill] sm:$0xff] %v4133_v20  ;;  %v4137_v21 = vpack.c.bf16 %v878_v19, %v876_v18  ;;  %v468_v28 = vsel %vm450_vm1, %v466_v25, %v467_v26  ;;  %v879_v32 = vrot.slane %v340_v22, 2  ;;  %v880_v33 = vrot.slane %v341_v23, 2 }
  0x2b   : > { %v470_v30 = vsel %vm450_vm1, %v467_v26, %v469_v27  ;;  %v882_v34 = vrot.slane %v342_v24, 2  ;;  %v4158_v39 = vpack.c.bf16 %v4048_v15, %v4045_v14  ;;  %v471_v46 = vrot.slane %v343_v43, 1 }
  0x2c   : > { %v4150_v35 = vpack.c.bf16 %v470_v30, %v468_v28  ;;  %v881_v37 = vsel %vm863_vm3, %v879_v32, %v880_v33  ;;  %v472_v48 = vrot.slane %v344_v44, 1  ;;  %v474_v49 = vrot.slane %v345_v45, 1  ;;  %v349_v32 = vld [vmem:[%s4039_s21 + $0x90] sm:$0xff] }
  0x2d   : > { %3454 = vmatmul.msk.bf16.gmra.mxu1 %vm581_vm2, %v4086_v47  ;;  %v883_v38 = vsel %vm863_vm3, %v880_v33, %v882_v34  ;;  %5475 = vst [vmem:[#allocation8_spill] sm:$0xff] %v4158_v39  ;;  %v4173_v52 = vpack.c.bf16 %v344_v44, %v343_v43  ;;  %v884_v54 = vrot.slane %v343_v43, 2  ;;  %v885_v55 = vrot.slane %v344_v44, 2  ;;  %v350_v33 = vld [vmem:[%s4039_s21 + $0x98] sm:$0xff]  ;;  %v351_v34 = vld [vmem:[%s4039_s21 + $0xa0] sm:$0x3] }
  0x2e   : > { %v4162_v42 = vpack.c.bf16 %v883_v38, %v881_v37  ;;  %v473_v50 = vsel %vm450_vm1, %v471_v46, %v472_v48  ;;  %v475_v51 = vsel %vm450_vm1, %v472_v48, %v474_v49  ;;  %v887_v58 = vrot.slane %v345_v45, 2 }
  0x2f   : > { %v929_v59 = vrot.slane %v4045_v14, 2  ;;  %v4176_v60 = vpack.c.bf16 %v475_v51, %v473_v50  ;;  %v930_v61 = vrot.slane %v4048_v15, 2  ;;  %v932_v62 = vrot.slane %v4051_v17, 2  ;;  %v347_v15 = vld [vmem:[%s4039_s21 + $0x80] sm:$0xff] }
  0x30   : > { %3438 = vmatmul.msk.bf16.gmra.mxu0 %vm581_vm2, %v4090_v53  ;;  %v886_v2 = vsel %vm863_vm3, %v884_v54, %v885_v55  ;;  %v888_v3 = vsel %vm863_vm3, %v885_v55, %v887_v58  ;;  %v4186_v4 = vpack.c.bf16 %v4076_v40, %v4072_v36  ;;  %v476_v10 = vrot.slane %v346_v5, 1 }
  0x31   : > { %v4190_v14 = vpack.c.bf16 %v888_v3, %v886_v2  ;;  %v931_v17 = vsel %vm863_vm3, %v929_v59, %v930_v61  ;;  %v933_v8 = vsel %vm863_vm3, %v930_v61, %v932_v62  ;;  %v477_v11 = vrot.slane %v347_v15, 1  ;;  %v352_v59 = vld [vmem:[%s4039_s21 + $0xa8] sm:$0xff]  ;;  %v353_v61 = vld [vmem:[%s4039_s21 + $0xb0] sm:$0xff]  ;;  %v354_v62 = vld [vmem:[%s4039_s21 + $0xb8] sm:$0x3] }
  0x32   : > { %3451 = vmatmul.msk.bf16.gmra.mxu3 %vm581_vm2, %v4096_v56  ;;  %3471 = vmatmul.msk.bf16.gmra.mxu2 %vm581_vm2, %v4100_v57  ;;  %5476 = vst [vmem:[#allocation9_spill] sm:$0xff] %v4186_v4  ;;  %v4199_v9 = vpack.c.bf16 %v933_v8, %v931_v17  ;;  %v479_v12 = vrot.slane %v348_v6, 1  ;;  %v4205_v19 = vpack.c.bf16 %v347_v15, %v346_v5  ;;  %v889_v22 = vrot.slane %v346_v5, 2 }
  0x33   : > { %v478_v13 = vsel %vm450_vm1, %v476_v10, %v477_v11  ;;  %v890_v23 = vrot.slane %v347_v15, 2  ;;  %v892_v24 = vrot.slane %v348_v6, 2  ;;  %v4215_v28 = vpack.c.bf16 %v4113_v0, %v4110_v63 }
  0x34   : > { %5477 = vst [vmem:[#allocation10_spill] sm:$0xff] %v4199_v9  ;;  %v480_v18 = vsel %vm450_vm1, %v477_v11, %v479_v12  ;;  %v481_v37 = vrot.slane %v349_v32, 1  ;;  %v482_v38 = vrot.slane %v350_v33, 1  ;;  %v484_v43 = vrot.slane %v351_v34, 1 }
  0x35   : > { %v4207_v25 = vpack.c.bf16 %v480_v18, %v478_v13  ;;  %v891_v26 = vsel %vm863_vm3, %v889_v22, %v890_v23  ;;  %v893_v27 = vsel %vm863_vm3, %v890_v23, %v892_v24  ;;  %5478 = vst [vmem:[#allocation11_spill] sm:$0xff] %v4215_v28  ;;  %v4230_v46 = vpack.c.bf16 %v350_v33, %v349_v32 }
  0x36   : > { %v4219_v30 = vpack.c.bf16 %v893_v27, %v891_v26  ;;  %v483_v44 = vsel %vm450_vm1, %v481_v37, %v482_v38  ;;  %v485_v45 = vsel %vm450_vm1, %v482_v38, %v484_v43  ;;  %v894_v48 = vrot.slane %v349_v32, 2  ;;  %v3486_v26 = vld [vmem:[%s5430_s1 + $0x6] sm:$0x3]  ;;  %v356_v38 = vld [vmem:[%s4039_s21 + $0xc8] sm:$0xff]  ;;  %v357_v43 = vld [vmem:[%s4039_s21 + $0xd0] sm:$0x3] }
  0x37   : > { %v895_v49 = vrot.slane %v350_v33, 2  ;;  %v897_v50 = vrot.slane %v351_v34, 2  ;;  %v4232_v51 = vpack.c.bf16 %v485_v45, %v483_v44  ;;  %v486_v2 = vrot.slane %v352_v59, 1  ;;  %v3520_v33 = vld [vmem:[%s5430_s1 + $0xa] sm:$0x3]  ;;  %v355_v37 = vld [vmem:[%s4039_s21 + $0xc0] sm:$0xff] }
  0x38   : > { %v487_v3 = vrot.slane %v353_v61, 1  ;;  %v489_v5 = vrot.slane %v354_v62, 1  ;;  %v934_v15 = vrot.slane %v4072_v36, 2  ;;  %v935_v6 = vrot.slane %v4076_v40, 2 }
  0x39   : > { %v896_v54 = vsel %vm863_vm3, %v894_v48, %v895_v49  ;;  %v898_v55 = vsel %vm863_vm3, %v895_v49, %v897_v50  ;;  %v937_v17 = vrot.slane %v4079_v41, 2  ;;  %v4254_v11 = vpack.c.bf16 %v353_v61, %v352_v59 }
  0x3a   : > { %v4240_v58 = vpack.c.bf16 %v898_v55, %v896_v54  ;;  %v488_v8 = vsel %vm450_vm1, %v486_v2, %v487_v3  ;;  %v490_v10 = vsel %vm450_vm1, %v487_v3, %v489_v5  ;;  %v899_v12 = vrot.slane %v352_v59, 2 }
  0x3b   : > { %v900_v13 = vrot.slane %v353_v61, 2  ;;  %v902_v18 = vrot.slane %v354_v62, 2  ;;  %v936_v22 = vsel %vm863_vm3, %v934_v15, %v935_v6  ;;  %v938_v23 = vsel %vm863_vm3, %v935_v6, %v937_v17 }
  0x3c   : > { %5479 = vst [vmem:[#allocation12_spill] sm:$0xff] %v4240_v58  ;;  %v4258_v36 = vpack.c.bf16 %v490_v10, %v488_v8  ;;  %v4264_v24 = vpack.c.bf16 %v938_v23, %v936_v22  ;;  %v1173_v32 = vsel %vm630_vm0, %v3486_v26, 0  ;;  %v1450_v34 = vsel %vm630_vm0, %v3520_v33, 0  ;;  %v359_v22 = vld [vmem:[%s4039_s21 + $0xe0] sm:$0xff]  ;;  %v360_v23 = vld [vmem:[%s4039_s21 + $0xe8] sm:$0x3] }
  0x3d   : > { %3455 = vmatmul.msk.bf16.gmra.mxu1 %vm581_vm2, %v4122_v7  ;;  %v901_v40 = vsel %vm863_vm3, %v899_v12, %v900_v13  ;;  %v903_v41 = vsel %vm863_vm3, %v900_v13, %v902_v18  ;;  %v491_v44 = vrot.slane %v355_v37, 1  ;;  %v492_v45 = vrot.slane %v356_v38, 1  ;;  %v358_v18 = vld [vmem:[%s4039_s21 + $0xd8] sm:$0xff] }
  0x3e   : > { %5480 = vst [vmem:[#allocation13_spill] sm:$0xff] %v4264_v24  ;;  %v4271_v27 = vpack.c.bf16 %v903_v41, %v901_v40  ;;  %1459 = vmatpush.bf16.msrb.mxu1 %v1450_v34  ;;  %v494_v48 = vrot.slane %v357_v43, 1  ;;  %v939_v49 = vrot.slane %v4110_v63, 2  ;;  %v940_v50 = vrot.slane %v4113_v0, 2 }
  0x3f   : > { %v942_v54 = vrot.slane %v4116_v1, 2  ;;  %v4288_v55 = vpack.c.bf16 %v356_v38, %v355_v37  ;;  %v904_v59 = vrot.slane %v355_v37, 2  ;;  %v493_v61 = vsel %vm450_vm1, %v491_v44, %v492_v45 }
  0x40   : > { %3439 = vmatmul.msk.bf16.gmra.mxu0 %vm581_vm2, %v4127_v16  ;;  %5481 = vst [vmem:[#allocation14_spill] sm:$0xff] %v4271_v27  ;;  %v495_v62 = vsel %vm450_vm1, %v492_v45, %v494_v48  ;;  %v905_v2 = vrot.slane %v356_v38, 2  ;;  %v907_v3 = vrot.slane %v357_v43, 2  ;;  %v941_v15 = vsel %vm863_vm3, %v939_v49, %v940_v50 }
  0x41   : > { %v943_v63 = vsel %vm863_vm3, %v940_v50, %v942_v54  ;;  %v4294_v0 = vpack.c.bf16 %v495_v62, %v493_v61  ;;  %v496_v26 = vrot.slane %v358_v18, 1  ;;  %v499_v33 = vrot.slane %v360_v23, 1 }
  0x42   : > { %3452 = vmatmul.msk.bf16.gmra.mxu3 %vm581_vm2, %v4133_v20  ;;  %3472 = vmatmul.msk.bf16.gmra.mxu2 %vm581_vm2, %v4137_v21  ;;  %v906_v6 = vsel %vm863_vm3, %v904_v59, %v905_v2  ;;  %v908_v17 = vsel %vm863_vm3, %v905_v2, %v907_v3  ;;  %v4300_v10 = vpack.c.bf16 %v943_v63, %v941_v15  ;;  %v909_v44 = vrot.slane %v358_v18, 2 }
  0x43   : > { %v4304_v12 = vpack.c.bf16 %v908_v17, %v906_v6  ;;  %v4317_v43 = vpack.c.bf16 %v359_v22, %v358_v18  ;;  %v910_v49 = vrot.slane %v359_v22, 2  ;;  %v912_v50 = vrot.slane %v360_v23, 2  ;;  %v361_v17 = vld [vmem:[%s4039_s21 + $0xf0] sm:$0xff] }
  0x44   : > { %5482 = vst [vmem:[#allocation15_spill] sm:$0xff] %v4300_v10  ;;  %v501_v23 = vrot.slane %v361_v17, 1 }
  0x45   : > { %5483 = vst [vmem:[#allocation16_spill] sm:$0xff] %v4304_v12  ;;  %v911_v2 = vsel %vm863_vm3, %v909_v44, %v910_v49  ;;  %v913_v3 = vsel %vm863_vm3, %v910_v49, %v912_v50 }
  0x4d   : > { %3456 = vmatmul.msk.bf16.gmra.mxu1 %vm581_vm2, %v4148_v31 }
  0x50   : > { %3440 = vmatmul.msk.bf16.gmra.mxu0 %vm581_vm2, %v4150_v35 }
  0x52   : > { %3466 = vmatmul.msk.bf16.vlgmr.msrb.gmra.mxu3 %vm581_vm2, %v4158_v39  ;;  %3473 = vmatmul.msk.bf16.gmra.mxu2 %vm581_vm2, %v4162_v42 }
  0x53   : > { %1182 = vmatpush.bf16.msrb.mxu3 %v1173_v32  ;;  %v497_v32 = vrot.slane %v359_v22, 1 }
  0x55   : > { %v498_v45 = vsel %vm450_vm1, %v496_v26, %v497_v32  ;;  %v500_v48 = vsel %vm450_vm1, %v497_v32, %v499_v33 }
  0x56   : > { %v4321_v59 = vpack.c.bf16 %v500_v48, %v498_v45 }
  0x5d   : > { %3457 = vmatmul.msk.bf16.gmra.mxu1 %vm581_vm2, %v4173_v52 }
  0x60   : > { %3441 = vmatmul.msk.bf16.gmra.mxu0 %vm581_vm2, %v4176_v60 }
  0x62   : > { %3467 = vmatmul.msk.bf16.gmra.mxu3 %vm581_vm2, %v4186_v4  ;;  %3474 = vmatmul.msk.bf16.gmra.mxu2 %vm581_vm2, %v4190_v14 }
  0x6d   : > { %3458 = vmatmul.msk.bf16.gmra.mxu1 %vm581_vm2, %v4205_v19 }
  0x70   : > { %3442 = vmatmul.msk.bf16.gmra.mxu0 %vm581_vm2, %v4207_v25 }
  0x72   : > { %3468 = vmatmul.msk.bf16.gmra.mxu3 %vm581_vm2, %v4215_v28  ;;  %3475 = vmatmul.msk.bf16.gmra.mxu2 %vm581_vm2, %v4219_v30 }
  0x7d   : > { %3459 = vmatmul.msk.bf16.gmra.mxu1 %vm581_vm2, %v4230_v46 }
  0x80   : > { %3443 = vmatmul.msk.bf16.gmra.mxu0 %vm581_vm2, %v4232_v51 }
  0x82   : > { %3483 = vmatmul.msk.bf16.vlgmr.msra.gmra.mxu3 %vm581_vm2, %v4199_v9  ;;  %3476 = vmatmul.msk.bf16.gmra.mxu2 %vm581_vm2, %v4240_v58 }
  0x8d   : > { %3460 = vmatmul.msk.bf16.gmra.mxu1 %vm581_vm2, %v4254_v11 }
  0x90   : > { %3444 = vmatmul.msk.bf16.gmra.mxu0 %vm581_vm2, %v4258_v36 }
  0x92   : > { %3484 = vmatmul.msk.bf16.gmra.mxu3 %vm581_vm2, %v4264_v24  ;;  %3477 = vmatmul.msk.bf16.gmra.mxu2 %vm581_vm2, %v4271_v27 }
  0x9a   : > { %v783_v5 = vpop.f32.mrf.mxu1 }
  0x9d   : > { %v643_v1 = vpop.f32.mrf.mxu0  ;;  %3461 = vmatmul.msk.bf16.gmra.mxu1 %vm581_vm2, %v4288_v55 }
  0x9e   : > { %v784_v8 = vadd.f32 %v783_v5, %v643_v1  ;;  %v4333_v1 = vpack.c.bf16 %v913_v3, %v911_v2 }
  0xa0   : > { %3445 = vmatmul.msk.bf16.gmra.mxu0 %vm581_vm2, %v4294_v0  ;;  %5484 = vst [vmem:[#allocation17_spill] sm:$0xff] %v4333_v1 }
  0xa2   : > { %3485 = vmatmul.msk.bf16.gmra.mxu3 %vm581_vm2, %v4300_v10  ;;  %v785_v13 = vpop.f32.mrf.mxu1  ;;  %3478 = vmatmul.msk.bf16.gmra.mxu2 %vm581_vm2, %v4304_v12 }
  0xa5   : > { %v4313_v40 = vpop.f32.mrf.mxu3  ;;  %v645_v41 = vpop.f32.mrf.mxu0 }
  0xa6   : > { %v786_v34 = vadd.f32 %v785_v13, %v645_v41  ;;  %v1054_v37 = vpop.f32.mrf.mxu2  ;;  %v363_v13 = vld [vmem:[%s4039_s21 + $0x100] sm:$0x3] }
  0xa7   : > { %v4315_v38 = vadd.f32 %v1054_v37, %v784_v8  ;;  %v362_v8 = vld [vmem:[%s4039_s21 + $0xf8] sm:$0xff]  ;;  %v504_v26 = vrot.slane %v363_v13, 1  ;;  %v917_v49 = vrot.slane %v363_v13, 2 }
  0xa8   : > { %v502_v41 = vrot.slane %v362_v8, 1  ;;  %v4346_v37 = vpack.c.bf16 %v362_v8, %v361_v17  ;;  %v915_v48 = vrot.slane %v362_v8, 2 }
  0xaa   : > { %v788_v54 = vpop.f32.mrf.mxu1  ;;  %v503_v44 = vsel %vm450_vm1, %v501_v23, %v502_v41  ;;  %v505_v45 = vsel %vm450_vm1, %v502_v41, %v504_v26  ;;  %v365_v23 = vld [vmem:[%s4039_s21 + $0x110] sm:$0xff]  ;;  %v366_v41 = vld [vmem:[%s4039_s21 + $0x118] sm:$0x3] }
  0xab   : > { %v922_v10 = vrot.slane %v366_v41, 2 }
  0xad   : > { %v4323_v61 = vpop.f32.mrf.mxu3  ;;  %v648_v62 = vpop.f32.mrf.mxu0  ;;  %3462 = vmatmul.msk.bf16.gmra.mxu1 %vm581_vm2, %v4317_v43 }
  0xae   : > { %v789_v5 = vadd.f32 %v788_v54, %v648_v62  ;;  %v1056_v15 = vpop.f32.mrf.mxu2  ;;  %v4350_v54 = vpack.c.bf16 %v505_v45, %v503_v44  ;;  %v509_v44 = vrot.slane %v366_v41, 1 }
  0xaf   : > { %v4329_v63 = vadd.f32 %v1056_v15, %v786_v34 }
  0xb0   : > { %3446 = vmatmul.msk.bf16.gmra.mxu0 %vm581_vm2, %v4321_v59  ;;  %5485 = vst [vmem:[#allocation18_spill] sm:$0xff] %v4350_v54 }
  0xb2   : > { %3487 = vmatmul.msk.bf16.vlgmr.msrb.gmra.mxu3 %vm581_vm2, %v4086_v47  ;;  %v790_v6 = vpop.f32.mrf.mxu1  ;;  %3479 = vmatmul.msk.bf16.gmra.mxu2 %vm581_vm2, %v4333_v1  ;;  %v914_v47 = vrot.slane %v361_v17, 2 }
  0xb4   : > { %v916_v3 = vsel %vm863_vm3, %v914_v47, %v915_v48  ;;  %v507_v47 = vrot.slane %v365_v23, 1 }
  0xb5   : > { %v4342_v18 = vpop.f32.mrf.mxu3  ;;  %v650_v22 = vpop.f32.mrf.mxu0 }
  0xb6   : > { %v791_v32 = vadd.f32 %v790_v6, %v650_v22  ;;  %v1059_v33 = vpop.f32.mrf.mxu2  ;;  %v364_v22 = vld [vmem:[%s4039_s21 + $0x108] sm:$0xff]  ;;  %v510_v20 = vsel %vm450_vm1, %v507_v47, %v509_v44 }
  0xb7   : > { %v4344_v34 = vadd.f32 %v1059_v33, %v789_v5  ;;  %v918_v5 = vsel %vm863_vm3, %v915_v48, %v917_v49 }
  0xb8   : > { %v4362_v8 = vpack.c.bf16 %v918_v5, %v916_v3  ;;  %v920_v3 = vrot.slane %v365_v23, 2  ;;  %v3554_v5 = vld [vmem:[%s5430_s1 + $0xe] sm:$0x3] }
  0xb9   : > { %v1720_v56 = vsel %vm630_vm0, %v3554_v5, 0 }
  0xba   : > { %v793_v50 = vpop.f32.mrf.mxu1  ;;  %5486 = vst [vmem:[#allocation19_spill] sm:$0xff] %v4362_v8  ;;  %1729 = vmatpush.bf16.msra.mxu3 %v1720_v56  ;;  %v3537_v56 = vld [vmem:[%s5430_s1 + $0xc] sm:$0x3] }
  0xbb   : > { %v1580_v44 = vsel %vm630_vm0, %v3537_v56, 0 }
  0xbc   : > { %1589 = vmatpush.bf16.msrb.mxu2 %v1580_v44 }
  0xbd   : > { %v4352_v62 = vpop.f32.mrf.mxu3  ;;  %v653_v2 = vpop.f32.mrf.mxu0  ;;  %3463 = vmatmul.msk.bf16.gmra.mxu1 %vm581_vm2, %v4346_v37 }
  0xbe   : > { %v794_v15 = vadd.f32 %v793_v50, %v653_v2  ;;  %v1061_v6 = vpop.f32.mrf.mxu2  ;;  %v4375_v50 = vpack.c.bf16 %v365_v23, %v364_v22  ;;  %v919_v2 = vrot.slane %v364_v22, 2 }
  0xbf   : > { %v4358_v17 = vadd.f32 %v1061_v6, %v791_v32  ;;  %v506_v32 = vrot.slane %v364_v22, 1 }
  0xc0   : > { %3447 = vmatmul.msk.bf16.gmra.mxu0 %vm581_vm2, %v4350_v54  ;;  %v921_v23 = vsel %vm863_vm3, %v919_v2, %v920_v3  ;;  %v369_v2 = vld [vmem:[%s4039_s21 + $0x130] sm:$0x3] }
  0xc1   : > { %v508_v6 = vsel %vm450_vm1, %v506_v32, %v507_v47  ;;  %v927_v54 = vrot.slane %v369_v2, 2 }
  0xc2   : > { %3488 = vmatmul.msk.bf16.gmra.mxu3 %vm581_vm2, %v4122_v7  ;;  %v795_v13 = vpop.f32.mrf.mxu1  ;;  %3480 = vmatmul.msk.bf16.gmra.mxu2 %vm581_vm2, %v4362_v8 }
  0xc5   : > { %v4371_v26 = vpop.f32.mrf.mxu3  ;;  %v655_v33 = vpop.f32.mrf.mxu0 }
  0xc6   : > { %v796_v45 = vadd.f32 %v795_v13, %v655_v33  ;;  %v1064_v48 = vpop.f32.mrf.mxu2  ;;  %v4383_v13 = vpack.c.bf16 %v510_v20, %v508_v6  ;;  %v923_v33 = vsel %vm863_vm3, %v920_v3, %v922_v10 }
  0xc7   : > { %v4373_v49 = vadd.f32 %v1064_v48, %v794_v15  ;;  %v4398_v47 = vpack.c.bf16 %v923_v33, %v921_v23  ;;  %v368_v48 = vld [vmem:[%s4039_s21 + $0x128] sm:$0xff]  ;;  %v514_v23 = vrot.slane %v369_v2, 1 }
  0xc8   : > { %5487 = vst [vmem:[#allocation20_spill] sm:$0xff] %v4383_v13  ;;  %v925_v4 = vrot.slane %v368_v48, 2 }
  0xc9   : > { %5488 = vst [vmem:[#allocation21_spill] sm:$0xff] %v4398_v47 }
  0xca   : > { %v798_v24 = vpop.f32.mrf.mxu1 }
  0xcd   : > { %v4385_v15 = vpop.f32.mrf.mxu3  ;;  %v658_v22 = vpop.f32.mrf.mxu0  ;;  %3464 = vmatmul.msk.bf16.gmra.mxu1 %vm581_vm2, %v4375_v50 }
  0xce   : > { %v799_v41 = vadd.f32 %v798_v24, %v658_v22  ;;  %v1066_v32 = vpop.f32.mrf.mxu2  ;;  %v367_v24 = vld [vmem:[%s4039_s21 + $0x120] sm:$0xff]  ;;  %v512_v22 = vrot.slane %v368_v48, 1 }
  0xcf   : > { %v4394_v20 = vadd.f32 %v1066_v32, %v796_v45  ;;  %v3571_v45 = vld [vmem:[%s5430_s1 + $0x10] sm:$0x3]  ;;  %v511_v6 = vrot.slane %v367_v24, 1  ;;  %v4417_v9 = vpack.c.bf16 %v368_v48, %v367_v24  ;;  %v924_v28 = vrot.slane %v367_v24, 2 }
  0xd0   : > { %3448 = vmatmul.msk.bf16.gmra.mxu0 %vm581_vm2, %v4383_v13  ;;  %v1857_v33 = vsel %vm630_vm0, %v3571_v45, 0 }
  0xd1   : > { %1866 = vmatpush.bf16.msra.mxu0 %v1857_v33  ;;  %v513_v13 = vsel %vm450_vm1, %v511_v6, %v512_v22 }
  0xd2   : > { %3489 = vmatmul.msk.bf16.gmra.mxu3 %vm581_vm2, %v4148_v31  ;;  %v800_v10 = vpop.f32.mrf.mxu1  ;;  %3481 = vmatmul.msk.bf16.gmra.mxu2 %vm581_vm2, %v4398_v47  ;;  %v515_v47 = vsel %vm450_vm1, %v512_v22, %v514_v23 }
  0xd3   : > { %v4421_v39 = vpack.c.bf16 %v515_v47, %v513_v13 }
  0xd5   : > { %v848_v3 = vpop.f32.mrf.mxu3  ;;  %v660_v5 = vpop.f32.mrf.mxu0 }
  0xd6   : > { %v4413_v32 = vadd.f32 %v848_v3, %v4313_v40  ;;  %v801_v56 = vadd.f32 %v800_v10, %v660_v5  ;;  %v1069_v44 = vpop.f32.mrf.mxu2  ;;  %v928_v10 = vsel %vm863_vm3, %v925_v4, %v927_v54 }
  0xd7   : > { %v4415_v29 = vadd.f32 %v1069_v44, %v799_v41  ;;  %v926_v41 = vsel %vm863_vm3, %v924_v28, %v925_v4 }
  0xd8   : > { %v4432_v13 = vpack.c.bf16 %v928_v10, %v926_v41 }
  0xda   : > { %v803_v8 = vpop.f32.mrf.mxu1  ;;  %5489 = vst [vmem:[#allocation22_spill] sm:$0xff] %v4432_v13 }
  0xdd   : > { %v850_v45 = vpop.f32.mrf.mxu3  ;;  %v663_v40 = vpop.f32.mrf.mxu0  ;;  %3465 = vmatmul.msk.bf16.gmra.mxu1 %vm581_vm2, %v4417_v9 }
  0xde   : > { %v851_v24 = vadd.f32 %v850_v45, %v4323_v61  ;;  %v804_v3 = vadd.f32 %v803_v8, %v663_v40  ;;  %v1071_v5 = vpop.f32.mrf.mxu2 }
  0xdf   : > { %v4428_v6 = vadd.f32 %v1071_v5, %v801_v56 }
  0xe0   : > { %3449 = vmatmul.msk.bf16.gmra.mxu0 %vm581_vm2, %v4421_v39 }
  0xe2   : > { %3490 = vmatmul.msk.bf16.gmra.mxu3 %vm581_vm2, %v4173_v52  ;;  %v805_v47 = vpop.f32.mrf.mxu1  ;;  %3482 = vmatmul.msk.bf16.gmra.mxu2 %vm581_vm2, %v4432_v13 }
  0xe5   : > { %v853_v28 = vpop.f32.mrf.mxu3  ;;  %v665_v4 = vpop.f32.mrf.mxu0 }
  0xe6   : > { %v854_v61 = vadd.f32 %v853_v28, %v4342_v18  ;;  %v806_v54 = vadd.f32 %v805_v47, %v665_v4  ;;  %v1074_v8 = vpop.f32.mrf.mxu2 }
  0xe7   : > { %v4439_v48 = vadd.f32 %v1074_v8, %v804_v3 }
  0xea   : > { %v808_v2 = vpop.f32.mrf.mxu1 }
  0xed   : > { %v855_v22 = vpop.f32.mrf.mxu3  ;;  %v668_v23 = vpop.f32.mrf.mxu0  ;;  %3521 = vmatmul.msk.bf16.vlgmr.msrb.gmra.mxu1 %vm581_vm2, %v4100_v57 }
  0xee   : > { %v856_v33 = vadd.f32 %v855_v22, %v4352_v62  ;;  %v809_v56 = vadd.f32 %v808_v2, %v668_v23  ;;  %v1076_v44 = vpop.f32.mrf.mxu2 }
  0xef   : > { %v4444_v45 = vadd.f32 %v1076_v44, %v806_v54 }
  0xf0   : > { %3504 = vmatmul.msk.bf16.vlgmr.msrb.gmra.mxu0 %vm581_vm2, %v4090_v53 }
  0xf2   : > { %3491 = vmatmul.msk.bf16.gmra.mxu3 %vm581_vm2, %v4205_v19  ;;  %v810_v18 = vpop.f32.mrf.mxu1  ;;  %3538 = vmatmul.msk.bf16.vlgmr.msrb.gmra.mxu2 %vm581_vm2, %v4122_v7 }
  0xf5   : > { %v858_v40 = vpop.f32.mrf.mxu3  ;;  %v670_v41 = vpop.f32.mrf.mxu0 }
  0xf6   : > { %v859_v57 = vadd.f32 %v858_v40, %v4371_v26  ;;  %v811_v10 = vadd.f32 %v810_v18, %v670_v41  ;;  %v1079_v62 = vpop.f32.mrf.mxu2 }
  0xf7   : > { %v4453_v3 = vadd.f32 %v1079_v62, %v809_v56 }
  0xfa   : > { %v813_v5 = vpop.f32.mrf.mxu1 }
  0xfd   : > { %v860_v47 = vpop.f32.mrf.mxu3  ;;  %v673_v28 = vpop.f32.mrf.mxu0  ;;  %3522 = vmatmul.msk.bf16.gmra.mxu1 %vm581_vm2, %v4137_v21 }
  0xfe   : > { %v861_v53 = vadd.f32 %v860_v47, %v4385_v15  ;;  %v814_v4 = vadd.f32 %v813_v5, %v673_v28  ;;  %v1081_v54 = vpop.f32.mrf.mxu2 }
  0xff   : > { %v4458_v8 = vadd.f32 %v1081_v54, %v811_v10 }
 0x100   : > { %3505 = vmatmul.msk.bf16.gmra.mxu0 %vm581_vm2, %v4127_v16 }
 0x102   : > { %3492 = vmatmul.msk.bf16.gmra.mxu3 %vm581_vm2, %v4230_v46  ;;  %v815_v7 = vpop.f32.mrf.mxu1  ;;  %3539 = vmatmul.msk.bf16.gmra.mxu2 %vm581_vm2, %v4148_v31 }
 0x105   : > { %v1119_v26 = vpop.f32.mrf.mxu3  ;;  %v675_v2 = vpop.f32.mrf.mxu0 }
 0x106   : > { %v4467_v22 = vadd.f32 %v1119_v26, %v4413_v32  ;;  %v816_v15 = vadd.f32 %v815_v7, %v675_v2  ;;  %v1084_v23 = vpop.f32.mrf.mxu2 }
 0x107   : > { %v4469_v56 = vadd.f32 %v1084_v23, %v814_v4 }
 0x10a   : > { %v818_v44 = vpop.f32.mrf.mxu1 }
 0x10d   : > { %v1121_v18 = vpop.f32.mrf.mxu3  ;;  %v678_v40 = vpop.f32.mrf.mxu0  ;;  %3523 = vmatmul.msk.bf16.gmra.mxu1 %vm581_vm2, %v4162_v42 }
 0x10e   : > { %v4473_v41 = vadd.f32 %v1121_v18, %v851_v24  ;;  %v819_v10 = vadd.f32 %v818_v44, %v678_v40  ;;  %v1086_v62 = vpop.f32.mrf.mxu2 }
 0x10f   : > { %v4475_v31 = vadd.f32 %v1086_v62, %v816_v15 }
 0x110   : > { %3506 = vmatmul.msk.bf16.gmra.mxu0 %vm581_vm2, %v4150_v35 }
 0x112   : > { %3493 = vmatmul.msk.bf16.gmra.mxu3 %vm581_vm2, %v4254_v11  ;;  %v820_v32 = vpop.f32.mrf.mxu1  ;;  %3540 = vmatmul.msk.bf16.gmra.mxu2 %vm581_vm2, %v4173_v52 }
 0x115   : > { %v1124_v5 = vpop.f32.mrf.mxu3  ;;  %v680_v47 = vpop.f32.mrf.mxu0 }
 0x116   : > { %v4483_v28 = vadd.f32 %v1124_v5, %v854_v61  ;;  %v821_v24 = vadd.f32 %v820_v32, %v680_v47  ;;  %v1089_v4 = vpop.f32.mrf.mxu2 }
 0x117   : > { %v4485_v54 = vadd.f32 %v1089_v4, %v819_v10 }
 0x11a   : > { %v823_v7 = vpop.f32.mrf.mxu1 }
 0x11d   : > { %v1126_v26 = vpop.f32.mrf.mxu3  ;;  %v683_v2 = vpop.f32.mrf.mxu0  ;;  %3524 = vmatmul.msk.bf16.gmra.mxu1 %vm581_vm2, %v4190_v14 }
 0x11e   : > { %v4489_v15 = vadd.f32 %v1126_v26, %v856_v33  ;;  %v824_v23 = vadd.f32 %v823_v7, %v683_v2  ;;  %v1091_v44 = vpop.f32.mrf.mxu2 }
 0x11f   : > { %v4491_v18 = vadd.f32 %v1091_v44, %v821_v24 }
 0x120   : > { %3507 = vmatmul.msk.bf16.gmra.mxu0 %vm581_vm2, %v4176_v60 }
 0x122   : > { %3494 = vmatmul.msk.bf16.gmra.mxu3 %vm581_vm2, %v4288_v55  ;;  %v825_v52 = vpop.f32.mrf.mxu1  ;;  %3541 = vmatmul.msk.bf16.gmra.mxu2 %vm581_vm2, %v4205_v19 }
 0x125   : > { %v1129_v61 = vpop.f32.mrf.mxu3  ;;  %v685_v40 = vpop.f32.mrf.mxu0 }
 0x126   : > { %v4499_v10 = vadd.f32 %v1129_v61, %v859_v57  ;;  %v826_v33 = vadd.f32 %v825_v52, %v685_v40  ;;  %v1094_v62 = vpop.f32.mrf.mxu2 }
 0x127   : > { %v4501_v32 = vadd.f32 %v1094_v62, %v824_v23 }
 0x12a   : > { %v828_v5 = vpop.f32.mrf.mxu1 }
 0x12d   : > { %v1131_v47 = vpop.f32.mrf.mxu3  ;;  %v688_v24 = vpop.f32.mrf.mxu0  ;;  %3525 = vmatmul.msk.bf16.gmra.mxu1 %vm581_vm2, %v4219_v30 }
 0x12e   : > { %v4505_v4 = vadd.f32 %v1131_v47, %v861_v53  ;;  %v829_v7 = vadd.f32 %v828_v5, %v688_v24  ;;  %v1096_v26 = vpop.f32.mrf.mxu2 }
 0x12f   : > { %v4507_v2 = vadd.f32 %v1096_v26, %v826_v33 }
 0x130   : > { %3508 = vmatmul.msk.bf16.gmra.mxu0 %vm581_vm2, %v4207_v25 }
 0x132   : > { %3495 = vmatmul.msk.bf16.gmra.mxu3 %vm581_vm2, %v4317_v43  ;;  %v830_v19 = vpop.f32.mrf.mxu1  ;;  %3542 = vmatmul.msk.bf16.gmra.mxu2 %vm581_vm2, %v4230_v46 }
 0x135   : > { %v1184_v57 = vpop.f32.mrf.mxu3  ;;  %v690_v23 = vpop.f32.mrf.mxu0 }
 0x136   : > { %v4516_v44 = vadd.f32 %v1184_v57, %v4315_v38  ;;  %v831_v53 = vadd.f32 %v830_v19, %v690_v23  ;;  %v1099_v52 = vpop.f32.mrf.mxu2 }
 0x137   : > { %v4518_v61 = vadd.f32 %v1099_v52, %v829_v7 }
 0x13a   : > { %v833_v40 = vpop.f32.mrf.mxu1 }
 0x13d   : > { %v1186_v33 = vpop.f32.mrf.mxu3  ;;  %v693_v62 = vpop.f32.mrf.mxu0  ;;  %3526 = vmatmul.msk.bf16.gmra.mxu1 %vm581_vm2, %v4240_v58 }
 0x13e   : > { %v4523_v5 = vadd.f32 %v1186_v33, %v4329_v63  ;;  %v834_v47 = vadd.f32 %v833_v40, %v693_v62  ;;  %v1101_v46 = vpop.f32.mrf.mxu2 }
 0x13f   : > { %v4525_v24 = vadd.f32 %v1101_v46, %v831_v53 }
 0x140   : > { %3509 = vmatmul.msk.bf16.gmra.mxu0 %vm581_vm2, %v4232_v51 }
 0x142   : > { %3496 = vmatmul.msk.bf16.gmra.mxu3 %vm581_vm2, %v4346_v37  ;;  %v835_v38 = vpop.f32.mrf.mxu1  ;;  %3543 = vmatmul.msk.bf16.gmra.mxu2 %vm581_vm2, %v4254_v11 }
 0x145   : > { %v1189_v7 = vpop.f32.mrf.mxu3  ;;  %v695_v26 = vpop.f32.mrf.mxu0 }
 0x146   : > { %v4534_v19 = vadd.f32 %v1189_v7, %v4344_v34  ;;  %v836_v63 = vadd.f32 %v835_v38, %v695_v26  ;;  %v1104_v57 = vpop.f32.mrf.mxu2 }
 0x147   : > { %v4536_v23 = vadd.f32 %v1104_v57, %v834_v47 }
 0x14a   : > { %v838_v53 = vpop.f32.mrf.mxu1 }
 0x14d   : > { %v1191_v52 = vpop.f32.mrf.mxu3  ;;  %v698_v40 = vpop.f32.mrf.mxu0  ;;  %3527 = vmatmul.msk.bf16.gmra.mxu1 %vm581_vm2, %v4271_v27 }
 0x14e   : > { %v4541_v33 = vadd.f32 %v1191_v52, %v4358_v17  ;;  %v839_v62 = vadd.f32 %v838_v53, %v698_v40  ;;  %v1106_v11 = vpop.f32.mrf.mxu2 }
 0x14f   : > { %v4543_v46 = vadd.f32 %v1106_v11, %v836_v63 }
 0x150   : > { %3510 = vmatmul.msk.bf16.gmra.mxu0 %vm581_vm2, %v4258_v36 }
 0x152   : > { %3497 = vmatmul.msk.bf16.gmra.mxu3 %vm581_vm2, %v4375_v50  ;;  %v840_v34 = vpop.f32.mrf.mxu1  ;;  %3544 = vmatmul.msk.bf16.gmra.mxu2 %vm581_vm2, %v4288_v55 }
 0x155   : > { %v1194_v47 = vpop.f32.mrf.mxu3  ;;  %v700_v38 = vpop.f32.mrf.mxu0 }
 0x156   : > { %v4552_v7 = vadd.f32 %v1194_v47, %v4373_v49  ;;  %v841_v17 = vadd.f32 %v840_v34, %v700_v38  ;;  %v1109_v26 = vpop.f32.mrf.mxu2  ;;  %v3672_v49 = vld [vmem:[%s5432_s3 + $0x8] sm:$0xff] }
 0x157   : > { %v4554_v57 = vadd.f32 %v1109_v26, %v839_v62  ;;  %2139 = vmatpush.bf16.msra.mxu1 %v3672_v49 }
 0x15a   : > { %v843_v63 = vpop.f32.mrf.mxu1 }
 0x15d   : > { %v1196_v53 = vpop.f32.mrf.mxu3  ;;  %v703_v52 = vpop.f32.mrf.mxu0  ;;  %3528 = vmatmul.msk.bf16.gmra.mxu1 %vm581_vm2, %v4304_v12 }
 0x15e   : > { %v4559_v40 = vadd.f32 %v1196_v53, %v4394_v20  ;;  %v844_v11 = vadd.f32 %v843_v63, %v703_v52  ;;  %v1111_v55 = vpop.f32.mrf.mxu2 }
 0x15f   : > { %v4561_v27 = vadd.f32 %v1111_v55, %v841_v17 }
 0x160   : > { %3511 = vmatmul.msk.bf16.gmra.mxu0 %vm581_vm2, %v4294_v0 }
 0x162   : > { %3498 = vmatmul.msk.bf16.gmra.mxu3 %vm581_vm2, %v4417_v9  ;;  %v845_v62 = vpop.f32.mrf.mxu1  ;;  %3545 = vmatmul.msk.bf16.gmra.mxu2 %vm581_vm2, %v4317_v43 }
 0x165   : > { %v1199_v20 = vpop.f32.mrf.mxu3  ;;  %v705_v34 = vpop.f32.mrf.mxu0 }
 0x166   : > { %v4573_v47 = vadd.f32 %v1199_v20, %v4415_v29  ;;  %v846_v38 = vadd.f32 %v845_v62, %v705_v34  ;;  %v1114_v17 = vpop.f32.mrf.mxu2 }
 0x167   : > { %v4575_v26 = vadd.f32 %v1114_v17, %v844_v11  ;;  %v5490_v11 = vld [vmem:[#allocation8_spill] sm:$0xff] }
 0x16a   : > { %v1461_v63 = vpop.f32.mrf.mxu1 }
 0x16d   : > { %v1201_v53 = vpop.f32.mrf.mxu3  ;;  %v1324_v52 = vpop.f32.mrf.mxu0  ;;  %3529 = vmatmul.msk.bf16.gmra.mxu1 %vm581_vm2, %v4333_v1 }
 0x16e   : > { %v4580_v55 = vadd.f32 %v1201_v53, %v4428_v6  ;;  %v1404_v43 = vadd.f32 %v1324_v52, %v4516_v44  ;;  %v1116_v49 = vpop.f32.mrf.mxu2 }
 0x16f   : > { %v4583_v12 = vadd.f32 %v1116_v49, %v846_v38  ;;  %v5491_v49 = vld [vmem:[#allocation19_spill] sm:$0xff] }
 0x170   : > { %v1541_v29 = vadd.f32 %v1461_v63, %v1404_v43  ;;  %3512 = vmatmul.msk.bf16.gmra.mxu0 %vm581_vm2, %v4321_v59 }
 0x172   : > { %3499 = vmatmul.msk.bf16.gmra.mxu3 %vm581_vm2, %v5490_v11  ;;  %v1463_v62 = vpop.f32.mrf.mxu1  ;;  %3546 = vmatmul.msk.bf16.gmra.mxu2 %vm581_vm2, %v4346_v37 }
 0x175   : > { %v1204_v20 = vpop.f32.mrf.mxu3  ;;  %v1326_v34 = vpop.f32.mrf.mxu0 }
 0x176   : > { %v4592_v6 = vadd.f32 %v1204_v20, %v4439_v48  ;;  %v1405_v44 = vadd.f32 %v1326_v34, %v4523_v5  ;;  %v1591_v38 = vpop.f32.mrf.mxu2  ;;  %v5493_v5 = vld [vmem:[#allocation18_spill] sm:$0xff] }
 0x177   : > { %v4595_v17 = vadd.f32 %v1591_v38, %v1541_v29  ;;  %v5494_v29 = vld [vmem:[#allocation9_spill] sm:$0xff] }
 0x178   : > { %v1542_v63 = vadd.f32 %v1463_v62, %v1405_v44 }
 0x17a   : > { %v1466_v53 = vpop.f32.mrf.mxu1 }
 0x17d   : > { %v1206_v52 = vpop.f32.mrf.mxu3  ;;  %v1329_v43 = vpop.f32.mrf.mxu0  ;;  %3530 = vmatmul.msk.bf16.gmra.mxu1 %vm581_vm2, %v5491_v49 }
 0x17e   : > { %v4600_v1 = vadd.f32 %v1206_v52, %v4444_v45  ;;  %v1406_v37 = vadd.f32 %v1329_v43, %v4534_v19  ;;  %v1593_v58 = vpop.f32.mrf.mxu2 }
 0x17f   : > { %v4603_v48 = vadd.f32 %v1593_v58, %v1542_v63 }
 0x180   : > { %v1543_v20 = vadd.f32 %v1466_v53, %v1406_v37  ;;  %3513 = vmatmul.msk.bf16.gmra.mxu0 %vm581_vm2, %v5493_v5  ;;  %v5495_v37 = vld [vmem:[#allocation21_spill] sm:$0xff] }
 0x181   : > { %5492 = vst [vmem:[#allocation8_spill] sm:$0xff] %v4603_v48 }
 0x182   : > { %3500 = vmatmul.msk.bf16.gmra.mxu3 %vm581_vm2, %v5494_v29  ;;  %v1468_v62 = vpop.f32.mrf.mxu1  ;;  %3547 = vmatmul.msk.bf16.gmra.mxu2 %vm581_vm2, %v4375_v50 }
 0x185   : > { %v1209_v34 = vpop.f32.mrf.mxu3  ;;  %v1331_v44 = vpop.f32.mrf.mxu0 }
 0x186   : > { %v4612_v45 = vadd.f32 %v1209_v34, %v4453_v3  ;;  %v1407_v19 = vadd.f32 %v1331_v44, %v4541_v33  ;;  %v1596_v58 = vpop.f32.mrf.mxu2 }
 0x187   : > { %v4615_v38 = vadd.f32 %v1596_v58, %v1543_v20  ;;  %v5497_v20 = vld [vmem:[#allocation20_spill] sm:$0xff] }
 0x188   : > { %v1544_v63 = vadd.f32 %v1468_v62, %v1407_v19  ;;  %v5498_v62 = vld [vmem:[#allocation11_spill] sm:$0xff] }
 0x18a   : > { %v1471_v53 = vpop.f32.mrf.mxu1 }
 0x18d   : > { %v1211_v52 = vpop.f32.mrf.mxu3  ;;  %v1334_v43 = vpop.f32.mrf.mxu0  ;;  %3531 = vmatmul.msk.bf16.gmra.mxu1 %vm581_vm2, %v5495_v37 }
 0x18e   : > { %v4620_v48 = vadd.f32 %v1211_v52, %v4458_v8  ;;  %v1408_v50 = vadd.f32 %v1334_v43, %v4552_v7  ;;  %v1598_v3 = vpop.f32.mrf.mxu2 }
 0x18f   : > { %v4623_v34 = vadd.f32 %v1598_v3, %v1544_v63  ;;  %v4641_v3 = vld [vmem:[%s4039_s21 + $0x188] sm:$0xff] }
 0x190   : > { %v1545_v33 = vadd.f32 %v1471_v53, %v1408_v50  ;;  %3514 = vmatmul.msk.bf16.gmra.mxu0 %vm581_vm2, %v5497_v20  ;;  %v4638_v50 = vld [vmem:[%s4039_s21 + $0x180] sm:$0xff] }
 0x191   : > { %5496 = vst [vmem:[#allocation19_spill] sm:$0xff] %v4623_v34 }
 0x192   : > { %3501 = vmatmul.msk.bf16.gmra.mxu3 %vm581_vm2, %v5498_v62  ;;  %v1473_v44 = vpop.f32.mrf.mxu1  ;;  %3548 = vmatmul.msk.bf16.gmra.mxu2 %vm581_vm2, %v4417_v9 }
 0x195   : > { %v1214_v8 = vpop.f32.mrf.mxu3  ;;  %v1336_v19 = vpop.f32.mrf.mxu0 }
 0x196   : > { %v4632_v7 = vadd.f32 %v1214_v8, %v4469_v56  ;;  %v1409_v58 = vadd.f32 %v1336_v19, %v4559_v40  ;;  %v1601_v63 = vpop.f32.mrf.mxu2  ;;  %v1166_v40 = vpack.c.bf16 %v4641_v3, %v4638_v50 }
 0x197   : > { %v4635_v52 = vadd.f32 %v1601_v63, %v1545_v33 }
 0x198   : > { %v1546_v53 = vadd.f32 %v1473_v44, %v1409_v58 }
 0x199   : > { %5499 = vst [vmem:[#allocation18_spill] sm:$0xff] %v4635_v52 }
 0x19a   : > { %v1476_v43 = vpop.f32.mrf.mxu1 }
 0x19d   : > { %v1216_v34 = vpop.f32.mrf.mxu3  ;;  %v1339_v37 = vpop.f32.mrf.mxu0  ;;  %3532 = vmatmul.msk.bf16.gmra.mxu1 %vm581_vm2, %v4432_v13 }
 0x19e   : > { %v4646_v9 = vadd.f32 %v1216_v34, %v4475_v31  ;;  %v1410_v56 = vadd.f32 %v1339_v37, %v4573_v47  ;;  %v1603_v33 = vpop.f32.mrf.mxu2 }
 0x19f   : > { %v4651_v44 = vadd.f32 %v1603_v33, %v1546_v53 }
 0x1a0   : > { %v1547_v8 = vadd.f32 %v1476_v43, %v1410_v56  ;;  %3515 = vmatmul.msk.bf16.gmra.mxu0 %vm581_vm2, %v4421_v39 }
 0x1a1   : > { %5500 = vst [vmem:[#allocation9_spill] sm:$0xff] %v4651_v44  ;;  %v5501_v44 = vld [vmem:[#allocation10_spill] sm:$0xff] }
 0x1a2   : > { %3502 = vmatmul.msk.bf16.gmra.mxu3 %vm581_vm2, %v1166_v40  ;;  %v1478_v19 = vpop.f32.mrf.mxu1  ;;  %3549 = vmatmul.msk.bf16.gmra.mxu2 %vm581_vm2, %v5490_v11 }
 0x1a5   : > { %v1219_v31 = vpop.f32.mrf.mxu3  ;;  %v1341_v34 = vpop.f32.mrf.mxu0 }
 0x1a6   : > { %v4659_v47 = vadd.f32 %v1219_v31, %v4485_v54  ;;  %v1411_v37 = vadd.f32 %v1341_v34, %v4580_v55  ;;  %v1606_v58 = vpop.f32.mrf.mxu2  ;;  %v5502_v55 = vld [vmem:[#allocation5_spill] sm:$0xff] }
 0x1a7   : > { %v4662_v63 = vadd.f32 %v1606_v58, %v1547_v8 }
 0x1a8   : > { %v1548_v53 = vadd.f32 %v1478_v19, %v1411_v37 }
 0x1aa   : > { %v1481_v43 = vpop.f32.mrf.mxu1 }
 0x1ad   : > { %v1221_v56 = vpop.f32.mrf.mxu3  ;;  %v1344_v33 = vpop.f32.mrf.mxu0  ;;  %3533 = vmatmul.msk.bf16.gmra.mxu1 %vm581_vm2, %v5501_v44 }
 0x1ae   : > { %v4667_v13 = vadd.f32 %v1221_v56, %v4491_v18  ;;  %v1412_v11 = vadd.f32 %v1344_v33, %v4592_v6  ;;  %v1608_v52 = vpop.f32.mrf.mxu2  ;;  %v5505_v56 = vld [vmem:[#allocation6_spill] sm:$0xff] }
 0x1af   : > { %v4670_v54 = vadd.f32 %v1608_v52, %v1548_v53  ;;  %v5503_v53 = vld [vmem:[#allocation13_spill] sm:$0xff] }
 0x1b0   : > { %v4672_v31 = vadd.f32 %v1481_v43, %v1412_v11  ;;  %3516 = vmatmul.msk.bf16.gmra.mxu0 %vm581_vm2, %v5502_v55 }
 0x1b2   : > { %3555 = vmatmul.msk.bf16.vlgmr.msra.gmra.mxu3 %vm581_vm2, %v4127_v16  ;;  %v4678_v8 = vpop.f32.mrf.mxu1  ;;  %3550 = vmatmul.msk.bf16.gmra.mxu2 %vm581_vm2, %v5494_v29 }
 0x1b5   : > { %v1224_v18 = vpop.f32.mrf.mxu3  ;;  %v1346_v19 = vpop.f32.mrf.mxu0 }
 0x1b6   : > { %v4683_v6 = vadd.f32 %v1224_v18, %v4501_v32  ;;  %v4686_v52 = vadd.f32 %v1346_v19, %v4600_v1 }
 0x1ba   : > { %v1486_v34 = vpop.f32.mrf.mxu1 }
 0x1bd   : > { %v1226_v37 = vpop.f32.mrf.mxu3  ;;  %v1349_v58 = vpop.f32.mrf.mxu0  ;;  %3534 = vmatmul.msk.bf16.gmra.mxu1 %vm581_vm2, %v5503_v53 }
 0x1be   : > { %v4691_v16 = vadd.f32 %v1226_v37, %v4507_v2  ;;  %v1414_v43 = vadd.f32 %v1349_v58, %v4612_v45  ;;  %v5510_v58 = vld [vmem:[#allocation7_spill] sm:$0xff] }
 0x1c0   : > { %v4694_v29 = vadd.f32 %v1486_v34, %v1414_v43  ;;  %3517 = vmatmul.msk.bf16.gmra.mxu0 %vm581_vm2, %v5505_v56  ;;  %v5508_v34 = vld [vmem:[#allocation15_spill] sm:$0xff]  ;;  %v1437_v43 = vrot.slane %v4641_v3, 2 }
 0x1c2   : > { %5504 = vst [vmem:[#allocation20_spill] sm:$0xff] %v4694_v29  ;;  %3556 = vmatmul.msk.bf16.gmra.mxu3 %vm581_vm2, %v4150_v35  ;;  %v4700_v1 = vpop.f32.mrf.mxu1  ;;  %3551 = vmatmul.msk.bf16.gmra.mxu2 %vm581_vm2, %v5498_v62  ;;  %v4743_v29 = vld [vmem:[%s4039_s21 + $0x198] sm:$0xff] }
 0x1c3   : > { %5506 = vst [vmem:[#allocation11_spill] sm:$0xff] %v4700_v1 }
 0x1c5   : > { %v1229_v32 = vpop.f32.mrf.mxu3  ;;  %v1351_v33 = vpop.f32.mrf.mxu0 }
 0x1c6   : > { %v4705_v2 = vadd.f32 %v1229_v32, %v4518_v61  ;;  %v4708_v45 = vadd.f32 %v1351_v33, %v4620_v48  ;;  %v381_v61 = vld [vmem:[%s4039_s21 + $0x190] sm:$0x3]  ;;  %v1436_v48 = vrot.slane %v4638_v50, 2 }
 0x1c7   : > { %v1439_v33 = vrot.slane %v381_v61, 2 }
 0x1c8   : > { %5507 = vst [vmem:[#allocation10_spill] sm:$0xff] %v4708_v45 }
 0x1ca   : > { %v1491_v11 = vpop.f32.mrf.mxu1 }
 0x1cd   : > { %v1231_v18 = vpop.f32.mrf.mxu3  ;;  %v1354_v19 = vpop.f32.mrf.mxu0  ;;  %3535 = vmatmul.msk.bf16.gmra.mxu1 %vm581_vm2, %v5508_v34 }
 0x1ce   : > { %v4713_v35 = vadd.f32 %v1231_v18, %v4525_v24  ;;  %v1416_v37 = vadd.f32 %v1354_v19, %v4632_v7  ;;  %v1299_v24 = vrot.slane %v4638_v50, 1  ;;  %v1300_v7 = vrot.slane %v4641_v3, 1 }
 0x1cf   : > { %v1302_v19 = vrot.slane %v381_v61, 1 }
 0x1d0   : > { %v4716_v62 = vadd.f32 %v1491_v11, %v1416_v37  ;;  %3518 = vmatmul.msk.bf16.gmra.mxu0 %vm581_vm2, %v5510_v58 }
 0x1d1   : > { %v1303_v50 = vsel %vm450_vm1, %v1300_v7, %v1302_v19 }
 0x1d2   : > { %5509 = vst [vmem:[#allocation5_spill] sm:$0xff] %v4716_v62  ;;  %3557 = vmatmul.msk.bf16.gmra.mxu3 %vm581_vm2, %v4176_v60  ;;  %v4725_v32 = vpop.f32.mrf.mxu1  ;;  %3552 = vmatmul.msk.bf16.gmra.mxu2 %vm581_vm2, %v1166_v40  ;;  %v1438_v60 = vsel %vm863_vm3, %v1436_v48, %v1437_v43  ;;  %v1301_v40 = vsel %vm450_vm1, %v1299_v24, %v1300_v7 }
 0x1d3   : > { %5511 = vst [vmem:[#allocation13_spill] sm:$0xff] %v4725_v32  ;;  %v1440_v32 = vsel %vm863_vm3, %v1437_v43, %v1439_v33  ;;  %v4740_v1 = vpack.c.bf16 %v1303_v50, %v1301_v40  ;;  %v3671_v33 = vld [vmem:[%s5432_s3] sm:$0xff] }
 0x1d4   : > { %v4738_v34 = vpack.c.bf16 %v1440_v32, %v1438_v60  ;;  %2140 = vmatpush.bf16.msra.mxu1 %v3671_v33 }
 0x1d5   : > { %v1234_v11 = vpop.f32.mrf.mxu3  ;;  %v1356_v18 = vpop.f32.mrf.mxu0 }
 0x1d6   : > { %v1284_v37 = vadd.f32 %v1234_v11, %v4536_v23  ;;  %v4732_v62 = vadd.f32 %v1356_v18, %v4646_v9  ;;  %v4746_v23 = vld [vmem:[%s4039_s21 + $0x1a0] sm:$0xff] }
 0x1d7   : > { %v1573_v32 = vpack.c.bf16 %v4746_v23, %v4743_v29 }
 0x1da   : > { %v1496_v3 = vpop.f32.mrf.mxu1 }
 0x1dd   : > { %v1236_v45 = vpop.f32.mrf.mxu3  ;;  %v1359_v61 = vpop.f32.mrf.mxu0  ;;  %3536 = vmatmul.msk.bf16.gmra.mxu1 %vm581_vm2, %v4738_v34 }
 0x1de   : > { %v1285_v9 = vadd.f32 %v1236_v45, %v4543_v46  ;;  %v1418_v48 = vadd.f32 %v1359_v61, %v4659_v47 }
 0x1e0   : > { %v4752_v43 = vadd.f32 %v1496_v3, %v1418_v48  ;;  %3519 = vmatmul.msk.bf16.gmra.mxu0 %vm581_vm2, %v4740_v1 }
 0x1e2   : > { %3558 = vmatmul.msk.bf16.gmra.mxu3 %vm581_vm2, %v4207_v25  ;;  %v4763_v24 = vpop.f32.mrf.mxu1  ;;  %3553 = vmatmul.msk.bf16.gmra.mxu2 %vm581_vm2, %v1573_v32 }
 0x1e5   : > { %v1239_v46 = vpop.f32.mrf.mxu3  ;;  %v1361_v47 = vpop.f32.mrf.mxu0 }
 0x1e6   : > { %v1286_v45 = vadd.f32 %v1239_v46, %v4554_v57  ;;  %v4768_v7 = vadd.f32 %v1361_v47, %v4667_v13 }
 0x1ea   : > { %v1501_v11 = vpop.f32.mrf.mxu1 }
 0x1ed   : > { %v1241_v18 = vpop.f32.mrf.mxu3  ;;  %v1364_v19 = vpop.f32.mrf.mxu0 }
 0x1ee   : > { %v1287_v60 = vadd.f32 %v1241_v18, %v4561_v27  ;;  %v1420_v40 = vadd.f32 %v1364_v19, %v4683_v6 }
 0x1f0   : > { %v4772_v25 = vadd.f32 %v1501_v11, %v1420_v40  ;;  %3572 = vmatmul.msk.bf16.vlgmr.msra.gmra.mxu0 %vm581_vm2, %v4137_v21 }
 0x1f2   : > { %3559 = vmatmul.msk.bf16.gmra.mxu3 %vm581_vm2, %v4232_v51  ;;  %v4778_v50 = vpop.f32.mrf.mxu1 }
 0x1f5   : > { %v1244_v57 = vpop.f32.mrf.mxu3  ;;  %v1366_v13 = vpop.f32.mrf.mxu0 }
 0x1f6   : > { %v1288_v3 = vadd.f32 %v1244_v57, %v4575_v26  ;;  %v4782_v61 = vadd.f32 %v1366_v13, %v4691_v16 }
 0x1fa   : > { %v1506_v27 = vpop.f32.mrf.mxu1 }
 0x1fd   : > { %v1246_v48 = vpop.f32.mrf.mxu3  ;;  %v1369_v6 = vpop.f32.mrf.mxu0 }
 0x1fe   : > { %v1289_v32 = vadd.f32 %v1246_v48, %v4583_v12  ;;  %v1422_v33 = vadd.f32 %v1369_v6, %v4705_v2  ;;  %v3674_v12 = vld [vmem:[%s5434_s5 + $0x8] sm:$0xff] }
 0x1ff   : > { %3044 = vmatpush.bf16.msra.mxu2 %v3674_v12 }
 0x200   : > { %v4786_v21 = vadd.f32 %v1506_v27, %v1422_v33  ;;  %3573 = vmatmul.msk.bf16.gmra.mxu0 %vm581_vm2, %v4162_v42 }
 0x202   : > { %3560 = vmatmul.msk.bf16.gmra.mxu3 %vm581_vm2, %v4258_v36  ;;  %v4792_v51 = vpop.f32.mrf.mxu1 }
 0x205   : > { %v1249_v26 = vpop.f32.mrf.mxu3  ;;  %v1371_v16 = vpop.f32.mrf.mxu0 }
 0x206   : > { %v1290_v46 = vadd.f32 %v1249_v26, %v4467_v22  ;;  %v4796_v47 = vadd.f32 %v1371_v16, %v4713_v35 }
 0x20a   : > { %v1511_v2 = vpop.f32.mrf.mxu1 }
 0x20d   : > { %v1251_v11 = vpop.f32.mrf.mxu3  ;;  %v1374_v42 = vpop.f32.mrf.mxu0 }
 0x20e   : > { %v1291_v18 = vadd.f32 %v1251_v11, %v4473_v41  ;;  %v1424_v36 = vadd.f32 %v1374_v42, %v1284_v37 }
 0x210   : > { %v4802_v19 = vadd.f32 %v1511_v2, %v1424_v36  ;;  %3574 = vmatmul.msk.bf16.gmra.mxu0 %vm581_vm2, %v4190_v14 }
 0x212   : > { %3561 = vmatmul.msk.bf16.gmra.mxu3 %vm581_vm2, %v4294_v0  ;;  %v4808_v22 = vpop.f32.mrf.mxu1 }
 0x215   : > { %v1254_v35 = vpop.f32.mrf.mxu3  ;;  %v1376_v40 = vpop.f32.mrf.mxu0 }
 0x216   : > { %v1292_v57 = vadd.f32 %v1254_v35, %v4483_v28  ;;  %v4811_v13 = vadd.f32 %v1376_v40, %v1285_v9 }
 0x21a   : > { %v1516_v27 = vpop.f32.mrf.mxu1 }
 0x21d   : > { %v1256_v48 = vpop.f32.mrf.mxu3  ;;  %v1379_v41 = vpop.f32.mrf.mxu0 }
 0x21e   : > { %v1293_v37 = vadd.f32 %v1256_v48, %v4489_v15  ;;  %v1426_v6 = vadd.f32 %v1379_v41, %v1286_v45 }
 0x220   : > { %v4814_v33 = vadd.f32 %v1516_v27, %v1426_v6  ;;  %3575 = vmatmul.msk.bf16.gmra.mxu0 %vm581_vm2, %v4219_v30  ;;  %v5512_v30 = vld [vmem:[#allocation12_spill] sm:$0xff] }
 0x222   : > { %3562 = vmatmul.msk.bf16.gmra.mxu3 %vm581_vm2, %v4321_v59  ;;  %v4820_v14 = vpop.f32.mrf.mxu1 }
 0x225   : > { %v1259_v0 = vpop.f32.mrf.mxu3  ;;  %v1381_v28 = vpop.f32.mrf.mxu0 }
 0x226   : > { %v1294_v9 = vadd.f32 %v1259_v0, %v4499_v10  ;;  %v4823_v26 = vadd.f32 %v1381_v28, %v1287_v60 }
 0x22a   : > { %v1521_v16 = vpop.f32.mrf.mxu1 }
 0x22d   : > { %v1261_v12 = vpop.f32.mrf.mxu3  ;;  %v1384_v15 = vpop.f32.mrf.mxu0 }
 0x22e   : > { %v1295_v45 = vadd.f32 %v1261_v12, %v4505_v4  ;;  %v1428_v2 = vadd.f32 %v1384_v15, %v1288_v3  ;;  %v5513_v3 = vld [vmem:[#allocation14_spill] sm:$0xff] }
 0x230   : > { %v4826_v11 = vadd.f32 %v1521_v16, %v1428_v2  ;;  %3576 = vmatmul.msk.bf16.gmra.mxu0 %vm581_vm2, %v5512_v30 }
 0x232   : > { %3563 = vmatmul.msk.bf16.gmra.mxu3 %vm581_vm2, %v5493_v5  ;;  %v4832_v59 = vpop.f32.mrf.mxu1 }
 0x235   : > { %v1731_v42 = vpop.f32.mrf.mxu3  ;;  %v1386_v10 = vpop.f32.mrf.mxu0 }
 0x236   : > { %v4834_v60 = vadd.f32 %v1386_v10, %v1289_v32 }
 0x23a   : > { %v1526_v36 = vpop.f32.mrf.mxu1 }
 0x23d   : > { %v1733_v35 = vpop.f32.mrf.mxu3  ;;  %v1389_v40 = vpop.f32.mrf.mxu0 }
 0x23e   : > { %v1430_v27 = vadd.f32 %v1389_v40, %v1290_v46  ;;  %v5514_v46 = vld [vmem:[#allocation16_spill] sm:$0xff] }
 0x240   : > { %v4836_v4 = vadd.f32 %v1526_v36, %v1430_v27  ;;  %3577 = vmatmul.msk.bf16.gmra.mxu0 %vm581_vm2, %v5513_v3 }
 0x242   : > { %3564 = vmatmul.msk.bf16.gmra.mxu3 %vm581_vm2, %v5497_v20  ;;  %v4842_v48 = vpop.f32.mrf.mxu1 }
 0x245   : > { %v1736_v5 = vpop.f32.mrf.mxu3  ;;  %v1391_v41 = vpop.f32.mrf.mxu0 }
 0x246   : > { %v4844_v6 = vadd.f32 %v1391_v41, %v1291_v18 }
 0x24a   : > { %v1531_v32 = vpop.f32.mrf.mxu1 }
 0x24d   : > { %v1738_v0 = vpop.f32.mrf.mxu3  ;;  %v1394_v28 = vpop.f32.mrf.mxu0 }
 0x24e   : > { %v1432_v16 = vadd.f32 %v1394_v28, %v1292_v57  ;;  %v5516_v57 = vld [vmem:[#allocation17_spill] sm:$0xff] }
 0x250   : > { %v4846_v12 = vadd.f32 %v1531_v32, %v1432_v16  ;;  %3578 = vmatmul.msk.bf16.gmra.mxu0 %vm581_vm2, %v5514_v46  ;;  %v4874_v16 = vld [vmem:[%s5431_s2] ss:$0 sm:$0xff] }
 0x252   : > { %3565 = vmatmul.msk.bf16.gmra.mxu3 %vm581_vm2, %v4421_v39  ;;  %v4852_v15 = vpop.f32.mrf.mxu1 }
 0x255   : > { %v1741_v20 = vpop.f32.mrf.mxu3  ;;  %v1396_v2 = vpop.f32.mrf.mxu0 }
 0x256   : > { %v4854_v30 = vadd.f32 %v1396_v2, %v1293_v37  ;;  %v1811_v37 = vadd.f32 %v1731_v42, %v4595_v17  ;;  %v4880_v2 = vpop.f32.mrf.mxu2 }
 0x25a   : > { %v1536_v18 = vpop.f32.mrf.mxu1 }
 0x25d   : > { %v1743_v10 = vpop.f32.mrf.mxu3  ;;  %v1399_v36 = vpop.f32.mrf.mxu0 }
 0x25e   : > { %v1434_v40 = vadd.f32 %v1399_v36, %v1294_v9 }
 0x260   : > { %v4856_v27 = vadd.f32 %v1536_v18, %v1434_v40  ;;  %3579 = vmatmul.msk.bf16.gmra.mxu0 %vm581_vm2, %v5516_v57 }
 0x262   : > { %5515 = vst [vmem:[#allocation6_spill] sm:$0xff] %v4856_v27  ;;  %3566 = vmatmul.msk.bf16.gmra.mxu3 %vm581_vm2, %v5502_v55  ;;  %v5518_v55 = vld [vmem:[#allocation8_spill] sm:$0xff] }
 0x265   : > { %v1401_v3 = vpop.f32.mrf.mxu0  ;;  %v4862_v39 = vpop.f32.mrf.mxu3 }
 0x266   : > { %v4864_v41 = vadd.f32 %v1401_v3, %v1295_v45  ;;  %v1812_v45 = vadd.f32 %v1733_v35, %v5518_v55  ;;  %v1706_v3 = vrot.slane %v4743_v29, 1  ;;  %v4889_v35 = vld [vmem:[%s4039_s21 + $0x1a8] sm:$0x3]  ;;  %s3376_s21 = sshll.u32 %s3372_s24, 4  ;;  %s3377_s21 = int_to_ptr.hbm [resolvable:$true] %s3376_s21 }
 0x267   : > { %v5519_v55 = vld [vmem:[#allocation21_spill] sm:$0xff]  ;;  %s3870_s14 = sshra.s32 %s3377_s21, 4  ;;  %s3871_s14 = int_to_ptr.hbm [resolvable:$true] %s3870_s14 }
 0x268   : > { %5517 = vst [vmem:[#allocation7_spill] sm:$0xff] %v4864_v41  ;;  %s3872_s16 = scalar_lea.hbm %s3871_s14, 1  ;;  %p3877_p0 = scmp.lt.s32.totalorder %s3871_s14, %s5438_s9 }
 0x269   : > { %p3873_p11 = scmp.ne.s32.totalorder %s3871_s14, %s3872_s16  ;;  %p3878_p1 = scmp.lt.s32.totalorder %s3876_s23, %s3872_s16 }
 0x26b   : > { %p3874_p12 = pnand %p3873_p11, %p4008_p5  ;;  %p3879_p2 = por %p3878_p1, %p3877_p0 }
 0x26d   : > { %v1868_v32 = vpop.f32.mrf.mxu0  ;;  %v4867_v28 = vpop.f32.mrf.mxu3  ;;  %p3875_p13 = pneg %p3874_p12 }
 0x26e   : > { %v1948_v9 = vadd.f32 %v1868_v32, %v1811_v37  ;;  %v1709_v37 = vrot.slane %v4889_v35, 1 }
 0x26f   : > { %p3880_p3 = pnand %p3879_p2, %p3875_p13 }
 0x270   : > { %3580 = vmatmul.msk.bf16.gmra.mxu0 %vm581_vm2, %v5491_v49  ;;  %v1984_v17 = vadd.f32 %v4874_v16, %v1948_v9  ;;  %v1813_v9 = vadd.f32 %v1736_v5, %v4615_v38  ;;  %v3673_v5 = vld [vmem:[%s5434_s5] sm:$0xff] }
 0x271   : > { %3045 = vmatpush.bf16.msra.mxu2 %v3673_v5 }
 0x272   : > { %3567 = vmatmul.msk.bf16.gmra.mxu3 %vm581_vm2, %v5505_v56  ;;  %v2016_v18 = vmax.f32 %v1984_v17, 0.0  ;;  %v1707_v56 = vrot.slane %v4746_v23, 1  ;;  %v1613_v17 = vpop.f32.mrf.mxu2 }
 0x275   : > { %v1870_v46 = vpop.f32.mrf.mxu0  ;;  %v4883_v36 = vpop.f32.mrf.mxu3 }
 0x276   : > { %v1949_v42 = vadd.f32 %v1870_v46, %v1812_v45  ;;  %v1708_v45 = vsel %vm450_vm1, %v1706_v3, %v1707_v56  ;;  %v1710_v46 = vsel %vm450_vm1, %v1707_v56, %v1709_v37 }
 0x278   : > { %v1985_v49 = vadd.f32 %v4874_v16, %v1949_v42 }
 0x27a   : > { %v2017_v40 = vmax.f32 %v1985_v49, 0.0  ;;  %v1713_v49 = vpack.c.bf16 %v1710_v46, %v1708_v45  ;;  %v1616_v37 = vpop.f32.mrf.mxu2  ;;  %v5522_v46 = vld [vmem:[#allocation22_spill] sm:$0xff] }
 0x27c   : > { %v2048_v57 = vpack.c.bf16 %v2017_v40, %v2016_v18  ;;  %v5520_v18 = vld [vmem:[#allocation19_spill] sm:$0xff] }
 0x27d   : > { %v1873_v32 = vpop.f32.mrf.mxu0  ;;  %v1814_v40 = vadd.f32 %v1738_v0, %v5520_v18  ;;  %v5521_v0 = vld [vmem:[#allocation18_spill] sm:$0xff] }
 0x27e   : > { %3596 = vmatmul.msk.bf16.vlgmr.msra.gmra.mxu1 %vm2084_vm4, %v2048_v57  ;;  %v1950_v42 = vadd.f32 %v1873_v32, %v1813_v9  ;;  %v1753_v57 = vpop.f32.mrf.mxu3  ;;  %v1815_v45 = vadd.f32 %v1741_v20, %v5521_v0 }
 0x280   : > { %3581 = vmatmul.msk.bf16.gmra.mxu0 %vm581_vm2, %v5519_v55  ;;  %v1986_v27 = vadd.f32 %v4874_v16, %v1950_v42  ;;  %v5523_v42 = vld [vmem:[#allocation9_spill] sm:$0xff] }
 0x281   : > { %v1816_v18 = vadd.f32 %v1743_v10, %v5523_v42 }
 0x282   : > { %3568 = vmatmul.msk.bf16.gmra.mxu3 %vm581_vm2, %v5510_v58  ;;  %v2018_v56 = vmax.f32 %v1986_v27, 0.0  ;;  %v1618_v27 = vpop.f32.mrf.mxu2 }
 0x285   : > { %v1875_v41 = vpop.f32.mrf.mxu0 }
 0x286   : > { %v1951_v38 = vadd.f32 %v1875_v41, %v1814_v40  ;;  %v1756_v55 = vpop.f32.mrf.mxu3 }
 0x288   : > { %v1987_v3 = vadd.f32 %v4874_v16, %v1951_v38 }
 0x28a   : > { %v2019_v32 = vmax.f32 %v1987_v3, 0.0 }
 0x28c   : > { %v2049_v9 = vpack.c.bf16 %v2019_v32, %v2018_v56 }
 0x28d   : > { %v1878_v58 = vpop.f32.mrf.mxu0 }
 0x28e   : > { %3597 = vmatmul.msk.bf16.gmra.mxu1 %vm2084_vm4, %v2049_v9  ;;  %v1952_v41 = vadd.f32 %v1878_v58, %v1815_v45  ;;  %v1758_v3 = vpop.f32.mrf.mxu3  ;;  %v1621_v58 = vpop.f32.mrf.mxu2 }
 0x290   : > { %3582 = vmatmul.msk.bf16.gmra.mxu0 %vm581_vm2, %v5522_v46  ;;  %v1988_v38 = vadd.f32 %v4874_v16, %v1952_v41  ;;  %v1818_v46 = vadd.f32 %v4867_v28, %v4670_v54  ;;  %v1550_v54 = vadd.f32 %v4678_v8, %v4686_v52  ;;  %v1843_v8 = vrot.slane %v4743_v29, 2 }
 0x291   : > { %v1844_v52 = vrot.slane %v4746_v23, 2 }
 0x292   : > { %3569 = vmatmul.msk.bf16.gmra.mxu3 %vm581_vm2, %v4740_v1  ;;  %v2020_v32 = vmax.f32 %v1988_v38, 0.0  ;;  %v1817_v1 = vadd.f32 %v4862_v39, %v4662_v63 }
 0x293   : > { %v1845_v29 = vsel %vm863_vm3, %v1843_v8, %v1844_v52 }
 0x295   : > { %v1880_v40 = vpop.f32.mrf.mxu0 }
 0x296   : > { %v1953_v5 = vadd.f32 %v1880_v40, %v1816_v18  ;;  %v1761_v10 = vpop.f32.mrf.mxu3  ;;  %v1623_v38 = vpop.f32.mrf.mxu2 }
 0x298   : > { %v1989_v56 = vadd.f32 %v4874_v16, %v1953_v5 }
 0x29a   : > { %v2021_v9 = vmax.f32 %v1989_v56, 0.0 }
 0x29c   : > { %v2050_v20 = vpack.c.bf16 %v2021_v9, %v2020_v32 }
 0x29d   : > { %v1883_v0 = vpop.f32.mrf.mxu0 }
 0x29e   : > { %3598 = vmatmul.msk.bf16.gmra.mxu1 %vm2084_vm4, %v2050_v20  ;;  %v1954_v45 = vadd.f32 %v1883_v0, %v1817_v1  ;;  %v1763_v63 = vpop.f32.mrf.mxu3  ;;  %v1626_v20 = vpop.f32.mrf.mxu2 }
 0x2a0   : > { %3583 = vmatmul.msk.bf16.gmra.mxu0 %vm581_vm2, %v5501_v44  ;;  %v1990_v42 = vadd.f32 %v4874_v16, %v1954_v45  ;;  %v1679_v44 = vadd.f32 %v4880_v2, %v4672_v31 }
 0x2a2   : > { %3570 = vmatmul.msk.bf16.gmra.mxu3 %vm581_vm2, %v1713_v49  ;;  %v2022_v5 = vmax.f32 %v1990_v42, 0.0  ;;  %v1819_v28 = vadd.f32 %v4883_v36, %v1679_v44  ;;  %v1680_v49 = vadd.f32 %v1613_v17, %v1550_v54  ;;  %v5527_v54 = vld [vmem:[#allocation15_spill] sm:$0xff] }
 0x2a4   : > { %v1820_v0 = vadd.f32 %v1753_v57, %v1680_v49  ;;  %v1846_v57 = vrot.slane %v4889_v35, 2 }
 0x2a5   : > { %v1885_v41 = vpop.f32.mrf.mxu0 }
 0x2a6   : > { %v1955_v18 = vadd.f32 %v1885_v41, %v1818_v46  ;;  %v1766_v45 = vpop.f32.mrf.mxu3  ;;  %v1847_v23 = vsel %vm863_vm3, %v1844_v52, %v1846_v57 }
 0x2a8   : > { %v1991_v40 = vadd.f32 %v4874_v16, %v1955_v18 }
 0x2aa   : > { %v2023_v56 = vmax.f32 %v1991_v40, 0.0  ;;  %v1628_v40 = vpop.f32.mrf.mxu2 }
 0x2ac   : > { %v2051_v39 = vpack.c.bf16 %v2023_v56, %v2022_v5  ;;  %v5525_v5 = vld [vmem:[#allocation10_spill] sm:$0xff]  ;;  %v5526_v56 = vld [vmem:[#allocation11_spill] sm:$0xff] }
 0x2ad   : > { %v1888_v32 = vpop.f32.mrf.mxu0 }
 0x2ae   : > { %3599 = vmatmul.msk.bf16.gmra.mxu1 %vm2084_vm4, %v2051_v39  ;;  %v1956_v9 = vadd.f32 %v1888_v32, %v1819_v28  ;;  %v1552_v39 = vadd.f32 %v5526_v56, %v5525_v5  ;;  %v1768_v44 = vpop.f32.mrf.mxu3 }
 0x2b0   : > { %3584 = vmatmul.msk.bf16.gmra.mxu0 %vm581_vm2, %v5503_v53  ;;  %v1992_v46 = vadd.f32 %v4874_v16, %v1956_v9  ;;  %v5524_v53 = vld [vmem:[#allocation20_spill] sm:$0xff]  ;;  %v1682_v28 = vadd.f32 %v1618_v27, %v1552_v39  ;;  %v5529_v27 = vld [vmem:[#allocation13_spill] sm:$0xff] }
 0x2b1   : > { %v1681_v17 = vadd.f32 %v1616_v37, %v5524_v53  ;;  %v1850_v37 = vpack.c.bf16 %v1847_v23, %v1845_v29  ;;  %v5528_v53 = vld [vmem:[#allocation5_spill] sm:$0xff]  ;;  %v1554_v52 = vadd.f32 %v5529_v27, %v4732_v62 }
 0x2b2   : > { %v2024_v2 = vmax.f32 %v1992_v46, 0.0  ;;  %v1822_v9 = vadd.f32 %v1758_v3, %v1682_v28  ;;  %v1631_v46 = vpop.f32.mrf.mxu2  ;;  %v1683_v8 = vadd.f32 %v1621_v58, %v5528_v53 }
 0x2b3   : > { %v1821_v32 = vadd.f32 %v1756_v55, %v1681_v17 }
 0x2b4   : > { %v1823_v3 = vadd.f32 %v1761_v10, %v1683_v8  ;;  %v1685_v10 = vadd.f32 %v1626_v20, %v4752_v43 }
 0x2b5   : > { %v1890_v1 = vpop.f32.mrf.mxu0 }
 0x2b6   : > { %v1957_v41 = vadd.f32 %v1890_v1, %v1820_v0  ;;  %v1771_v55 = vpop.f32.mrf.mxu3 }
 0x2b8   : > { %v1993_v31 = vadd.f32 %v4874_v16, %v1957_v41 }
 0x2ba   : > { %v2025_v42 = vmax.f32 %v1993_v31, 0.0  ;;  %v1633_v17 = vpop.f32.mrf.mxu2 }
 0x2bc   : > { %v2052_v18 = vpack.c.bf16 %v2025_v42, %v2024_v2 }
 0x2bd   : > { %v1893_v36 = vpop.f32.mrf.mxu0 }
 0x2be   : > { %3600 = vmatmul.msk.bf16.gmra.mxu1 %vm2084_vm4, %v2052_v18  ;;  %v1958_v49 = vadd.f32 %v1893_v36, %v1821_v32  ;;  %v1684_v36 = vadd.f32 %v1623_v38, %v1554_v52  ;;  %v1773_v56 = vpop.f32.mrf.mxu3  ;;  %v1825_v38 = vadd.f32 %v1766_v45, %v1685_v10  ;;  %v4966_v52 = vpop.f32.mrf.mxu1 }
 0x2c0   : > { %3585 = vmatmul.msk.bf16.gmra.mxu0 %vm581_vm2, %v5527_v54  ;;  %v1994_v1 = vadd.f32 %v4874_v16, %v1958_v49  ;;  %v1824_v5 = vadd.f32 %v1763_v63, %v1684_v36 }
 0x2c2   : > { %v2026_v31 = vmax.f32 %v1994_v1, 0.0  ;;  %v1636_v28 = vpop.f32.mrf.mxu2 }
 0x2c5   : > { %v1895_v0 = vpop.f32.mrf.mxu0 }
 0x2c6   : > { %v1959_v35 = vadd.f32 %v1895_v0, %v1822_v9  ;;  %v1776_v9 = vpop.f32.mrf.mxu3 }
 0x2c8   : > { %v1995_v41 = vadd.f32 %v4874_v16, %v1959_v35 }
 0x2ca   : > { %v2027_v2 = vmax.f32 %v1995_v41, 0.0  ;;  %v1638_v41 = vpop.f32.mrf.mxu2 }
 0x2cc   : > { %v2053_v42 = vpack.c.bf16 %v2027_v2, %v2026_v31 }
 0x2cd   : > { %v1898_v18 = vpop.f32.mrf.mxu0 }
 0x2ce   : > { %3601 = vmatmul.msk.bf16.gmra.mxu1 %vm2084_vm4, %v2053_v42  ;;  %v1960_v57 = vadd.f32 %v1898_v18, %v1823_v3  ;;  %v1778_v42 = vpop.f32.mrf.mxu3 }
 0x2d0   : > { %3586 = vmatmul.msk.bf16.gmra.mxu0 %vm581_vm2, %v4738_v34  ;;  %v1996_v32 = vadd.f32 %v4874_v16, %v1960_v57  ;;  %v1556_v34 = vadd.f32 %v4763_v24, %v4768_v7  ;;  %v1687_v24 = vadd.f32 %v1631_v46, %v4772_v25  ;;  %v1558_v7 = vadd.f32 %v4778_v50, %v4782_v61  ;;  %v4973_v25 = vld [vmem:[%s5433_s4] ss:$0 sm:$0xff] }
 0x2d2   : > { %v2028_v29 = vmax.f32 %v1996_v32, 0.0  ;;  %v1686_v63 = vadd.f32 %v1628_v40, %v1556_v34  ;;  %v1641_v45 = vpop.f32.mrf.mxu2  ;;  %v1827_v40 = vadd.f32 %v1771_v55, %v1687_v24 }
 0x2d4   : > { %v1826_v1 = vadd.f32 %v1768_v44, %v1686_v63  ;;  %v1688_v44 = vadd.f32 %v1633_v17, %v1558_v7 }
 0x2d5   : > { %v1900_v39 = vpop.f32.mrf.mxu0 }
 0x2d6   : > { %v1961_v54 = vadd.f32 %v1900_v39, %v1824_v5  ;;  %v1828_v3 = vadd.f32 %v1773_v56, %v1688_v44 }
 0x2d8   : > { %v1997_v58 = vadd.f32 %v4874_v16, %v1961_v54 }
 0x2da   : > { %v2029_v23 = vmax.f32 %v1997_v58, 0.0  ;;  %v1643_v50 = vpop.f32.mrf.mxu2  ;;  %v1689_v58 = vadd.f32 %v1636_v28, %v4786_v21 }
 0x2dc   : > { %v2054_v49 = vpack.c.bf16 %v2029_v23, %v2028_v29  ;;  %v1560_v23 = vadd.f32 %v4792_v51, %v4796_v47 }
 0x2dd   : > { %v1903_v62 = vpop.f32.mrf.mxu0 }
 0x2de   : > { %3602 = vmatmul.msk.bf16.gmra.mxu1 %vm2084_vm4, %v2054_v49  ;;  %v1962_v0 = vadd.f32 %v1903_v62, %v1825_v38  ;;  %v1829_v49 = vadd.f32 %v1776_v9, %v1689_v58  ;;  %v1690_v62 = vadd.f32 %v1638_v41, %v1560_v23 }
 0x2e0   : > { %3587 = vmatmul.msk.bf16.gmra.mxu0 %vm581_vm2, %v1850_v37  ;;  %v1998_v31 = vadd.f32 %v4874_v16, %v1962_v0  ;;  %v1781_v37 = vpop.f32.mrf.mxu3  ;;  %v1830_v63 = vadd.f32 %v1778_v42, %v1690_v62 }
 0x2e2   : > { %v2030_v20 = vmax.f32 %v1998_v31, 0.0  ;;  %v4980_v38 = vpop.f32.mrf.mxu2 }
 0x2e5   : > { %v1905_v35 = vpop.f32.mrf.mxu0 }
 0x2e6   : > { %v1963_v2 = vadd.f32 %v1905_v35, %v1826_v1 }
 0x2e8   : > { %v1999_v43 = vadd.f32 %v4874_v16, %v1963_v2  ;;  %v1783_v17 = vpop.f32.mrf.mxu3 }
 0x2ea   : > { %v2031_v18 = vmax.f32 %v1999_v43, 0.0  ;;  %v4989_v24 = vpop.f32.mrf.mxu2 }
 0x2ec   : > { %v2055_v53 = vpack.c.bf16 %v2031_v18, %v2030_v20 }
 0x2ed   : > { %v1908_v8 = vpop.f32.mrf.mxu0 }
 0x2ee   : > { %3603 = vmatmul.msk.bf16.gmra.mxu1 %vm2084_vm4, %v2055_v53  ;;  %v1964_v27 = vadd.f32 %v1908_v8, %v1827_v40  ;;  %v1691_v8 = vadd.f32 %v1641_v45, %v4802_v19 }
 0x2f0   : > { %v2000_v57 = vadd.f32 %v4874_v16, %v1964_v27  ;;  %v4983_v31 = vpop.f32.mrf.mxu3  ;;  %v1562_v27 = vadd.f32 %v4808_v22, %v4811_v13 }
 0x2f2   : > { %v2032_v61 = vmax.f32 %v2000_v57, 0.0  ;;  %v5003_v62 = vpop.f32.mrf.mxu2 }
 0x2f5   : > { %v1910_v36 = vpop.f32.mrf.mxu0 }
 0x2f6   : > { %v1965_v5 = vadd.f32 %v1910_v36, %v1828_v3  ;;  %v1831_v3 = vadd.f32 %v1781_v37, %v1691_v8 }
 0x2f8   : > { %v2001_v39 = vadd.f32 %v4874_v16, %v1965_v5  ;;  %v4996_v36 = vpop.f32.mrf.mxu3  ;;  %v1692_v5 = vadd.f32 %v1643_v50, %v1562_v27  ;;  %v1564_v27 = vadd.f32 %v4820_v14, %v4823_v26 }
 0x2fa   : > { %v2033_v46 = vmax.f32 %v2001_v39, 0.0 }
 0x2fb   : > { %v2142_v55 = vpop.f32.mrf.mxu1 }
 0x2fc   : > { %v2056_v32 = vpack.c.bf16 %v2033_v46, %v2032_v61  ;;  %v2143_v54 = vadd.f32 %v4973_v25, %v2142_v55  ;;  %v1832_v55 = vadd.f32 %v1783_v17, %v1692_v5 }
 0x2fd   : > { %v1913_v56 = vpop.f32.mrf.mxu0 }
 0x2fe   : > { %v3612_v29 = vmul.f32 -1.442695, %v2143_v54  ;;  %3604 = vmatmul.msk.bf16.gmra.mxu1 %vm2084_vm4, %v2056_v32  ;;  %v1966_v10 = vadd.f32 %v1913_v56, %v1829_v49 }
 0x300   : > { %3721 = vpow2.f32 %v3612_v29  ;;  %v2002_v21 = vadd.f32 %v4874_v16, %v1966_v10 }
 0x302   : > { %v2034_v47 = vmax.f32 %v2002_v21, 0.0 }
 0x303   : > { %v2144_v34 = vpop.f32.mrf.mxu1 }
 0x304   : > { %v2145_v0 = vadd.f32 %v4973_v25, %v2144_v34 }
 0x305   : > { %v1915_v1 = vpop.f32.mrf.mxu0 }
 0x306   : > { %v3722_v35 = vpop.eup %3721  ;;  %v3613_v28 = vmul.f32 -1.442695, %v2145_v0  ;;  %v1967_v2 = vadd.f32 %v1915_v1, %v1830_v63  ;;  %v5008_v0 = vpop.f32.mrf.mxu3 }
 0x307   : > { %v2318_v43 = vadd.f32 1.0, %v3722_v35 }
 0x308   : > { %3723 = vpow2.f32 %v3613_v28  ;;  %v2003_v51 = vadd.f32 %v4874_v16, %v1967_v2 }
 0x309   : > { %3725 = vrcp.f32 %v2318_v43  ;;  %v2359_v61 = vand.u32 2147483647, %v2318_v43  ;;  %v2361_v46 = vand.u32 2147483648, %v2318_v43  ;;  %vm2355_vm6 = vweird.f32 %v2318_v43 }
 0x30a   : > { %v2035_v9 = vmax.f32 %v2003_v51, 0.0 }
 0x30b   : > { %v2147_v41 = vpop.f32.mrf.mxu1  ;;  %vm2360_vm8 = vcmp.eq.f32.partialorder %v2359_v61, 8.507059e+37  ;;  %v2362_v49 = vor.u32 1.1754944e-38, %v2361_v46 }
 0x30c   : > { %v2057_v20 = vpack.c.bf16 %v2035_v9, %v2034_v47  ;;  %v2148_v42 = vadd.f32 %v4973_v25, %v2147_v41 }
 0x30d   : > { %v1918_v18 = vpop.f32.mrf.mxu0 }
 0x30e   : > { %v3724_v53 = vpop.eup %3723  ;;  %v3614_v7 = vmul.f32 -1.442695, %v2148_v42  ;;  %3605 = vmatmul.msk.bf16.gmra.mxu1 %vm2084_vm4, %v2057_v20  ;;  %v1968_v19 = vadd.f32 %v1918_v18, %v1831_v3  ;;  %v1693_v42 = vadd.f32 %v4980_v38, %v4814_v33 }
 0x30f   : > { %v3726_v40 = vpop.eup %3725  ;;  %v4992_v44 = vadd.f32 1.0, %v3724_v53 }
 0x310   : > { %3727 = vpow2.f32 %v3614_v7  ;;  %v2351_v57 = vmul.f32 %v3726_v40, %v2318_v43  ;;  %vm2356_vm5 = vweird.f32 %v3726_v40  ;;  %v2004_v13 = vadd.f32 %v4874_v16, %v1968_v19 }
 0x311   : > { %3729 = vrcp.f32 %v4992_v44  ;;  %vm2357_vm7 = vmor %vm2355_vm6, %vm2356_vm5  ;;  %v2374_v43 = vand.u32 2147483647, %v4992_v44  ;;  %v2376_v51 = vand.u32 2147483648, %v4992_v44  ;;  %vm2370_vm10 = vweird.f32 %v4992_v44 }
 0x312   : > { %v2352_v45 = vsub.f32 1.0, %v2351_v57  ;;  %v2036_v1 = vmax.f32 %v2004_v13, 0.0  ;;  %v1833_v3 = vadd.f32 %v4983_v31, %v1693_v42 }
 0x313   : > { %v2149_v39 = vpop.f32.mrf.mxu1  ;;  %v2377_v33 = vor.u32 1.1754944e-38, %v2376_v51  ;;  %vm2375_vm12 = vcmp.eq.f32.partialorder %v2374_v43, 8.507059e+37 }
 0x314   : > { %v2150_v32 = vadd.f32 %v4973_v25, %v2149_v39  ;;  %v2353_v54 = vmul.f32 %v3726_v40, %v2352_v45  ;;  %v5027_v45 = vpop.f32.mrf.mxu2 }
 0x315   : > { %v1920_v56 = vpop.f32.mrf.mxu0 }
 0x316   : > { %v3728_v22 = vpop.eup %3727  ;;  %v3615_v37 = vmul.f32 -1.442695, %v2150_v32  ;;  %v1969_v58 = vadd.f32 %v1920_v56, %v1832_v55  ;;  %v2354_v29 = vadd.f32 %v3726_v40, %v2353_v54  ;;  %v5032_v54 = vpop.f32.mrf.mxu3 }
 0x317   : > { %v3730_v23 = vpop.eup %3729  ;;  %v5001_v50 = vadd.f32 1.0, %v3728_v22 }
 0x318   : > { %3731 = vpow2.f32 %v3615_v37  ;;  %v2005_v17 = vadd.f32 %v4874_v16, %v1969_v58  ;;  %v2358_v10 = vsel %vm2357_vm7, %v3726_v40, %v2354_v29  ;;  %v2366_v34 = vmul.f32 %v3730_v23, %v4992_v44 }
 0x319   : > { %3733 = vrcp.f32 %v5001_v50  ;;  %v2363_v63 = vsel %vm2360_vm8, %v2362_v49, %v2358_v10  ;;  %vm2371_vm9 = vweird.f32 %v3730_v23  ;;  %v1694_v44 = vadd.f32 %v4989_v24, %v1564_v27 }
 0x31a   : > { %v2037_v35 = vmax.f32 %v2005_v17, 0.0  ;;  %v2367_v21 = vsub.f32 1.0, %v2366_v34  ;;  %v2830_v28 = vmul.f32 %v2363_v63, %v2363_v63  ;;  %vm2372_vm11 = vmor %vm2370_vm10, %vm2371_vm9  ;;  %v2389_v55 = vand.u32 2147483647, %v5001_v50 }
 0x31b   : > { %v2152_v2 = vpop.f32.mrf.mxu1  ;;  %v1834_v61 = vadd.f32 %v4996_v36, %v1694_v44  ;;  %v2391_v32 = vand.u32 2147483648, %v5001_v50  ;;  %vm2385_vm14 = vweird.f32 %v5001_v50 }
 0x31c   : > { %v2058_v47 = vpack.c.bf16 %v2037_v35, %v2036_v1  ;;  %v2153_v9 = vadd.f32 %v4973_v25, %v2152_v2  ;;  %v2368_v41 = vmul.f32 %v3730_v23, %v2367_v21  ;;  %v2862_v20 = vsel %vm2084_vm4, %v2830_v28, 0.0 }
 0x31d   : > { %v1923_v18 = vpop.f32.mrf.mxu0  ;;  %2863 = vadd.xlane.f32.xlu0 %v2862_v20  ;;  %vm2390_vm0 = vcmp.eq.f32.partialorder %v2389_v55, 8.507059e+37  ;;  %v2392_v10 = vor.u32 1.1754944e-38, %v2391_v32 }
 0x31e   : > { %v3732_v53 = vpop.eup %3731  ;;  %v3616_v8 = vmul.f32 -1.442695, %v2153_v9  ;;  %v2369_v7 = vadd.f32 %v3730_v23, %v2368_v41  ;;  %3606 = vmatmul.msk.bf16.gmra.mxu1 %vm2084_vm4, %v2058_v47  ;;  %v1970_v14 = vadd.f32 %v1923_v18, %v1833_v3  ;;  %v5046_v9 = vpop.f32.mrf.mxu2 }
 0x31f   : > { %v3734_v40 = vpop.eup %3733  ;;  %v5021_v57 = vadd.f32 1.0, %v3732_v53  ;;  %v1695_v53 = vadd.f32 %v5003_v62, %v4826_v11 }
 0x320   : > { %3735 = vpow2.f32 %v3616_v8  ;;  %v2373_v38 = vsel %vm2372_vm11, %v3730_v23, %v2369_v7  ;;  %v2381_v5 = vmul.f32 %v3734_v40, %v5001_v50  ;;  %vm2386_vm13 = vweird.f32 %v3734_v40 }
 0x321   : > { %3737 = vrcp.f32 %v5021_v57  ;;  %v2378_v19 = vsel %vm2375_vm12, %v2377_v33, %v2373_v38  ;;  %v2006_v37 = vadd.f32 %v4874_v16, %v1970_v14  ;;  %vm2387_vm15 = vmor %vm2385_vm14, %vm2386_vm13  ;;  %v2404_v51 = vand.u32 2147483647, %v5021_v57 }
 0x322   : > { %v2958_v26 = vpack.c.bf16 %v2378_v19, %v2363_v63  ;;  %v2831_v31 = vmul.f32 %v2378_v19, %v2378_v19  ;;  %v2382_v39 = vsub.f32 1.0, %v2381_v5  ;;  %v2406_v47 = vand.u32 2147483648, %v5021_v57 }
 0x323   : > { %v2154_v46 = vpop.f32.mrf.mxu1  ;;  %v2038_v35 = vmax.f32 %v2006_v37, 0.0  ;;  %vm2400_vm2 = vweird.f32 %v5021_v57  ;;  %v1566_v38 = vadd.f32 %v4832_v59, %v4834_v60  ;;  %v1835_v5 = vadd.f32 %v5008_v0, %v1695_v53 }
 0x324   : > { %v2155_v24 = vadd.f32 %v4973_v25, %v2154_v46  ;;  %3652 = vmatmul.msk.bf16.vlgmr.msra.gmra.mxu2 %vm2084_vm4, %v2958_v26  ;;  %v2865_v56 = vsel %vm2084_vm4, %v2831_v31, 0.0  ;;  %v2383_v22 = vmul.f32 %v3734_v40, %v2382_v39  ;;  %v2407_v11 = vor.u32 1.1754944e-38, %v2406_v47 }
 0x325   : > { %v1925_v13 = vpop.f32.mrf.mxu0  ;;  %2866 = vadd.xlane.f32.xlu0 %v2865_v56  ;;  %vm2405_vm5 = vcmp.eq.f32.partialorder %v2404_v51, 8.507059e+37 }
 0x326   : > { %v3736_v36 = vpop.eup %3735  ;;  %v3617_v58 = vmul.f32 -1.442695, %v2155_v24  ;;  %v1971_v29 = vadd.f32 %v1925_v13, %v1834_v61  ;;  %v2384_v23 = vadd.f32 %v3734_v40, %v2383_v22  ;;  %v1658_v22 = vpop.f32.mrf.mxu2 }
 0x327   : > { %v3738_v49 = vpop.eup %3737  ;;  %v5039_v17 = vadd.f32 1.0, %v3736_v36 }
 0x328   : > { %3739 = vpow2.f32 %v3617_v58  ;;  %v2007_v34 = vadd.f32 %v4874_v16, %v1971_v29  ;;  %v2388_v63 = vsel %vm2387_vm15, %v3734_v40, %v2384_v23  ;;  %v2396_v1 = vmul.f32 %v3738_v49, %v5021_v57  ;;  %v5052_v40 = vpop.f32.mrf.mxu3 }
 0x329   : > { %3741 = vrcp.f32 %v5039_v17  ;;  %v2393_v50 = vsel %vm2390_vm0, %v2392_v10, %v2388_v63  ;;  %vm2401_vm1 = vweird.f32 %v3738_v49  ;;  %v1696_v57 = vadd.f32 %v5027_v45, %v1566_v38 }
 0x32a   : > { %v2039_v21 = vmax.f32 %v2007_v34, 0.0  ;;  %v2397_v28 = vsub.f32 1.0, %v2396_v1  ;;  %v2832_v2 = vmul.f32 %v2393_v50, %v2393_v50  ;;  %vm2402_vm3 = vmor %vm2400_vm2, %vm2401_vm1  ;;  %v2419_v61 = vand.u32 2147483647, %v5039_v17 }
 0x32b   : > { %v2157_v43 = vpop.f32.mrf.mxu1  ;;  %v1836_v0 = vadd.f32 %v5032_v54, %v1696_v57  ;;  %v2421_v46 = vand.u32 2147483648, %v5039_v17  ;;  %vm2415_vm7 = vweird.f32 %v5039_v17 }
 0x32c   : > { %v2059_v41 = vpack.c.bf16 %v2039_v21, %v2038_v35  ;;  %v2158_v20 = vadd.f32 %v4973_v25, %v2157_v43  ;;  %v2398_v42 = vmul.f32 %v3738_v49, %v2397_v28  ;;  %v2868_v18 = vsel %vm2084_vm4, %v2832_v2, 0.0 }
 0x32d   : > { %v1928_v8 = vpop.f32.mrf.mxu0  ;;  %2869 = vadd.xlane.f32.xlu1 %v2868_v18  ;;  %vm2420_vm9 = vcmp.eq.f32.partialorder %v2419_v61, 8.507059e+37  ;;  %v2422_v23 = vor.u32 1.1754944e-38, %v2421_v46 }
 0x32e   : > { %v3740_v7 = vpop.eup %3739  ;;  %v3618_v27 = vmul.f32 -1.442695, %v2158_v20  ;;  %v2399_v3 = vadd.f32 %v3738_v49, %v2398_v42  ;;  %3607 = vmatmul.msk.bf16.gmra.mxu1 %vm2084_vm4, %v2059_v41  ;;  %v1972_v26 = vadd.f32 %v1928_v8, %v1835_v5  ;;  %v1697_v42 = vadd.f32 %v5046_v9, %v4836_v4  ;;  %v1661_v9 = vpop.f32.mrf.mxu2 }
 0x32f   : > { %v3742_v33 = vpop.eup %3741  ;;  %v5059_v44 = vadd.f32 1.0, %v3740_v7 }
 0x330   : > { %3743 = vpow2.f32 %v3618_v27  ;;  %v2403_v62 = vsel %vm2402_vm3, %v3738_v49, %v2399_v3  ;;  %v2411_v19 = vmul.f32 %v3742_v33, %v5039_v17  ;;  %vm2416_vm6 = vweird.f32 %v3742_v33  ;;  %v1798_v49 = vpop.f32.mrf.mxu3 }
 0x331   : > { %3745 = vrcp.f32 %v5059_v44  ;;  %v2408_v14 = vsel %vm2405_vm5, %v2407_v11, %v2403_v62  ;;  %v2008_v54 = vadd.f32 %v4874_v16, %v1972_v26  ;;  %vm2417_vm8 = vmor %vm2415_vm7, %vm2416_vm6  ;;  %v2434_v2 = vand.u32 2147483647, %v5059_v44 }
 0x332   : > { %v2959_v31 = vpack.c.bf16 %v2408_v14, %v2393_v50  ;;  %v2833_v59 = vmul.f32 %v2408_v14, %v2408_v14  ;;  %v2412_v60 = vsub.f32 1.0, %v2411_v19  ;;  %v2436_v43 = vand.u32 2147483648, %v5059_v44 }
 0x333   : > { %v2159_v39 = vpop.f32.mrf.mxu1  ;;  %v2040_v1 = vmax.f32 %v2008_v54, 0.0  ;;  %vm2430_vm11 = vweird.f32 %v5059_v44  ;;  %v1568_v3 = vadd.f32 %v4842_v48, %v4844_v6  ;;  %vm2435_vm13 = vcmp.eq.f32.partialorder %v2434_v2, 8.507059e+37 }
 0x334   : > { %v2160_v55 = vadd.f32 %v4973_v25, %v2159_v39  ;;  %3653 = vmatmul.msk.bf16.gmra.mxu2 %vm2084_vm4, %v2959_v31  ;;  %v2871_v45 = vsel %vm2084_vm4, %v2833_v59, 0.0  ;;  %v2413_v32 = vmul.f32 %v3742_v33, %v2412_v60  ;;  %v2437_v4 = vor.u32 1.1754944e-38, %v2436_v43 }
 0x335   : > { %v1930_v24 = vpop.f32.mrf.mxu0  ;;  %2872 = vadd.xlane.f32.xlu1 %v2871_v45  ;;  %v1699_v43 = vadd.f32 %v1661_v9, %v4846_v12 }
 0x336   : > { %v3744_v56 = vpop.eup %3743  ;;  %v3619_v13 = vmul.f32 -1.442695, %v2160_v55  ;;  %v1973_v36 = vadd.f32 %v1930_v24, %v1836_v0  ;;  %v2414_v37 = vadd.f32 %v3742_v33, %v2413_v32 }
 0x337   : > { %v3746_v58 = vpop.eup %3745  ;;  %v5073_v29 = vadd.f32 1.0, %v3744_v56 }
 0x338   : > { %3747 = vpow2.f32 %v3619_v13  ;;  %v2009_v10 = vadd.f32 %v4874_v16, %v1973_v36  ;;  %v2418_v34 = vsel %vm2417_vm8, %v3742_v33, %v2414_v37  ;;  %v2426_v17 = vmul.f32 %v3746_v58, %v5059_v44  ;;  %v1801_v19 = vpop.f32.mrf.mxu3 }
 0x339   : > { %3749 = vrcp.f32 %v5073_v29  ;;  %v2423_v63 = vsel %vm2420_vm9, %v2422_v23, %v2418_v34  ;;  %vm2431_vm10 = vweird.f32 %v3746_v58  ;;  %v1837_v33 = vadd.f32 %v5052_v40, %v1697_v42 }
 0x33a   : > { %v2041_v50 = vmax.f32 %v2009_v10, 0.0  ;;  %v2427_v35 = vsub.f32 1.0, %v2426_v17  ;;  %v2834_v21 = vmul.f32 %v2423_v63, %v2423_v63  ;;  %vm2432_vm12 = vmor %vm2430_vm11, %vm2431_vm10  ;;  %v1698_v44 = vadd.f32 %v1658_v22, %v1568_v3 }
 0x33b   : > { %v2162_v28 = vpop.f32.mrf.mxu1  ;;  %v2449_v31 = vand.u32 2147483647, %v5073_v29  ;;  %v2451_v59 = vand.u32 2147483648, %v5073_v29  ;;  %vm2445_vm15 = vweird.f32 %v5073_v29 }
 0x33c   : > { %v2060_v51 = vpack.c.bf16 %v2041_v50, %v2040_v1  ;;  %v2163_v47 = vadd.f32 %v4973_v25, %v2162_v28  ;;  %v2428_v41 = vmul.f32 %v3746_v58, %v2427_v35  ;;  %v2874_v20 = vsel %vm2084_vm4, %v2834_v21, 0.0 }
 0x33d   : > { %v1933_v18 = vpop.f32.mrf.mxu0  ;;  %2875 = vadd.xlane.f32.xlu2 %v2874_v20  ;;  %v1838_v14 = vadd.f32 %v1798_v49, %v1698_v44  ;;  %vm2450_vm1 = vcmp.eq.f32.partialorder %v2449_v31, 8.507059e+37  ;;  %v2452_v54 = vor.u32 1.1754944e-38, %v2451_v59 }
 0x33e   : > { %v3748_v53 = vpop.eup %3747  ;;  %v3620_v8 = vmul.f32 -1.442695, %v2163_v47  ;;  %v2429_v7 = vadd.f32 %v3746_v58, %v2428_v41  ;;  %3608 = vmatmul.msk.bf16.gmra.mxu1 %vm2084_vm4, %v2060_v51  ;;  %v1974_v57 = vadd.f32 %v1933_v18, %v1837_v33  ;;  %v1570_v18 = vadd.f32 %v4852_v15, %v4854_v30 }
 0x33f   : > { %v3750_v27 = vpop.eup %3749  ;;  %v5089_v38 = vadd.f32 1.0, %v3748_v53  ;;  %v1839_v53 = vadd.f32 %v1801_v19, %v1699_v43 }
 0x340   : > { %3751 = vpow2.f32 %v3620_v8  ;;  %v2433_v5 = vsel %vm2432_vm12, %v3746_v58, %v2429_v7  ;;  %v2441_v11 = vmul.f32 %v3750_v27, %v5073_v29  ;;  %vm2446_vm14 = vweird.f32 %v3750_v27  ;;  %v1663_v29 = vpop.f32.mrf.mxu2  ;;  %v1803_v50 = vpop.f32.mrf.mxu3 }
 0x341   : > { %3753 = vrcp.f32 %v5089_v38  ;;  %v2438_v62 = vsel %vm2435_vm13, %v2437_v4, %v2433_v5  ;;  %v2010_v55 = vadd.f32 %v4874_v16, %v1974_v57  ;;  %vm2447_vm0 = vmor %vm2445_vm15, %vm2446_vm14  ;;  %v2466_v1 = vand.u32 2147483648, %v5089_v38 }
 0x342   : > { %v2960_v48 = vpack.c.bf16 %v2438_v62, %v2423_v63  ;;  %v2835_v6 = vmul.f32 %v2438_v62, %v2438_v62  ;;  %v2442_v40 = vsub.f32 1.0, %v2441_v11  ;;  %v2464_v63 = vand.u32 2147483647, %v5089_v38 }
 0x343   : > { %v2164_v26 = vpop.f32.mrf.mxu1  ;;  %v2042_v23 = vmax.f32 %v2010_v55, 0.0  ;;  %vm2460_vm3 = vweird.f32 %v5089_v38  ;;  %v2467_v7 = vor.u32 1.1754944e-38, %v2466_v1  ;;  %v1700_v3 = vadd.f32 %v1663_v29, %v1570_v18  ;;  %v5133_v55 = vld [vmem:[%s5431_s2] ss:$0 sm:$0xff] }
 0x344   : > { %v2165_v60 = vadd.f32 %v4973_v25, %v2164_v26  ;;  %3654 = vmatmul.msk.bf16.gmra.mxu2 %vm2084_vm4, %v2960_v48  ;;  %v2877_v0 = vsel %vm2084_vm4, %v2835_v6, 0.0  ;;  %v2443_v39 = vmul.f32 %v3750_v27, %v2442_v40  ;;  %vm2465_vm6 = vcmp.eq.f32.partialorder %v2464_v63, 8.507059e+37 }
 0x345   : > { %v1935_v61 = vpop.f32.mrf.mxu0  ;;  %2878 = vadd.xlane.f32.xlu2 %v2877_v0  ;;  %v1840_v15 = vadd.f32 %v1803_v50, %v1700_v3 }
 0x346   : > { %v3752_v46 = vpop.eup %3751  ;;  %v3621_v45 = vmul.f32 -1.442695, %v2165_v60  ;;  %v1975_v32 = vadd.f32 %v1935_v61, %v1838_v14  ;;  %v2444_v24 = vadd.f32 %v3750_v27, %v2443_v39 }
 0x347   : > { %v3754_v56 = vpop.eup %3753  ;;  %v5101_v22 = vadd.f32 1.0, %v3752_v46 }
 0x348   : > { %3755 = vpow2.f32 %v3621_v45  ;;  %v2011_v13 = vadd.f32 %v4874_v16, %v1975_v32  ;;  %v2448_v36 = vsel %vm2447_vm0, %v3750_v27, %v2444_v24  ;;  %v2456_v37 = vmul.f32 %v3754_v56, %v5089_v38  ;;  %v1666_v62 = vpop.f32.mrf.mxu2  ;;  %v1806_v14 = vpop.f32.mrf.mxu3 }
 0x349   : > { %3757 = vrcp.f32 %v5101_v22  ;;  %v2453_v58 = vsel %vm2450_vm1, %v2452_v54, %v2448_v36  ;;  %vm2461_vm2 = vweird.f32 %v3754_v56  ;;  %v2479_v11 = vand.u32 2147483647, %v5101_v22 }
 0x34a   : > { %v2043_v49 = vmax.f32 %v2011_v13, 0.0  ;;  %v2457_v10 = vsub.f32 1.0, %v2456_v37  ;;  %v2836_v34 = vmul.f32 %v2453_v58, %v2453_v58  ;;  %vm2462_vm5 = vmor %vm2460_vm3, %vm2461_vm2  ;;  %v2481_v44 = vand.u32 2147483648, %v5101_v22 }
 0x34b   : > { %v2167_v17 = vpop.f32.mrf.mxu1  ;;  %vm2475_vm8 = vweird.f32 %v5101_v22  ;;  %vm2480_vm10 = vcmp.eq.f32.partialorder %v2479_v11, 8.507059e+37 }
 0x34c   : > { %v2061_v35 = vpack.c.bf16 %v2043_v49, %v2042_v23  ;;  %v2168_v21 = vadd.f32 %v4973_v25, %v2167_v17  ;;  %v2458_v28 = vmul.f32 %v3754_v56, %v2457_v10  ;;  %v2880_v2 = vsel %vm2084_vm4, %v2836_v34, 0.0  ;;  %v5530_v10 = vld [vmem:[#allocation6_spill] sm:$0xff] }
 0x34d   : > { %v1938_v51 = vpop.f32.mrf.mxu0  ;;  %2881 = vadd.xlane.f32.xlu0 %v2880_v2  ;;  %v2482_v61 = vor.u32 1.1754944e-38, %v2481_v44  ;;  %v1701_v34 = vadd.f32 %v1666_v62, %v5530_v10 }
 0x34e   : > { %v3756_v47 = vpop.eup %3755  ;;  %v3622_v41 = vmul.f32 -1.442695, %v2168_v21  ;;  %v2459_v20 = vadd.f32 %v3754_v56, %v2458_v28  ;;  %3609 = vmatmul.msk.bf16.gmra.mxu1 %vm2084_vm4, %v2061_v35  ;;  %v1976_v38 = vadd.f32 %v1938_v51, %v1839_v53  ;;  %v5531_v28 = vld [vmem:[#allocation7_spill] sm:$0xff] }
 0x34f   : > { %v3758_v42 = vpop.eup %3757  ;;  %v5115_v8 = vadd.f32 1.0, %v3756_v47  ;;  %v1572_v2 = vadd.f32 %v4966_v52, %v5531_v28  ;;  %v1841_v43 = vadd.f32 %v1806_v14, %v1701_v34 }
 0x350   : > { %3759 = vpow2.f32 %v3622_v41  ;;  %v2463_v12 = vsel %vm2462_vm5, %v3754_v56, %v2459_v20  ;;  %v2471_v27 = vmul.f32 %v3758_v42, %v5101_v22  ;;  %vm2476_vm7 = vweird.f32 %v3758_v42  ;;  %v1668_v1 = vpop.f32.mrf.mxu2  ;;  %v1808_v41 = vpop.f32.mrf.mxu3 }
 0x351   : > { %3761 = vrcp.f32 %v5115_v8  ;;  %v2468_v33 = vsel %vm2465_vm6, %v2467_v7, %v2463_v12  ;;  %v2012_v26 = vadd.f32 %v4874_v16, %v1976_v38  ;;  %vm2477_vm9 = vmor %vm2475_vm8, %vm2476_vm7  ;;  %v2494_v36 = vand.u32 2147483647, %v5115_v8 }
 0x352   : > { %v2961_v4 = vpack.c.bf16 %v2468_v33, %v2453_v58  ;;  %v2837_v9 = vmul.f32 %v2468_v33, %v2468_v33  ;;  %v2472_v5 = vsub.f32 1.0, %v2471_v27  ;;  %v2496_v37 = vand.u32 2147483648, %v5115_v8 }
 0x353   : > { %v2169_v30 = vpop.f32.mrf.mxu1  ;;  %v2044_v24 = vmax.f32 %v2012_v26, 0.0  ;;  %vm2490_vm12 = vweird.f32 %v5115_v8  ;;  %vm2495_vm14 = vcmp.eq.f32.partialorder %v2494_v36, 8.507059e+37  ;;  %v1702_v18 = vadd.f32 %v1668_v1, %v1572_v2 }
 0x354   : > { %v2170_v19 = vadd.f32 %v4973_v25, %v2169_v30  ;;  %3655 = vmatmul.msk.bf16.gmra.mxu2 %vm2084_vm4, %v2961_v4  ;;  %v2883_v57 = vsel %vm2084_vm4, %v2837_v9, 0.0  ;;  %v2473_v48 = vmul.f32 %v3758_v42, %v2472_v5  ;;  %v2497_v47 = vor.u32 1.1754944e-38, %v2496_v37 }
 0x355   : > { %v1940_v6 = vpop.f32.mrf.mxu0  ;;  %2884 = vadd.xlane.f32.xlu1 %v2883_v57  ;;  %v1842_v27 = vadd.f32 %v1808_v41, %v1702_v18 }
 0x356   : > { %v3760_v40 = vpop.eup %3759  ;;  %v3623_v31 = vmul.f32 -1.442695, %v2170_v19  ;;  %v1977_v59 = vadd.f32 %v1940_v6, %v1840_v15  ;;  %v2474_v60 = vadd.f32 %v3758_v42, %v2473_v48 }
 0x357   : > { %v3762_v0 = vpop.eup %3761  ;;  %v5127_v39 = vadd.f32 1.0, %v3760_v40 }
 0x358   : > { %v2486_v46 = vmul.f32 %v3762_v0, %v5115_v8  ;;  %3763 = vpow2.f32 %v3623_v31  ;;  %v2013_v45 = vadd.f32 %v5133_v55, %v1977_v59  ;;  %v2478_v16 = vsel %vm2477_vm9, %v3758_v42, %v2474_v60 }
 0x359   : > { %3765 = vrcp.f32 %v5127_v39  ;;  %v2483_v32 = vsel %vm2480_vm10, %v2482_v61, %v2478_v16  ;;  %vm2491_vm11 = vweird.f32 %v3762_v0  ;;  %v2509_v33 = vand.u32 2147483647, %v5127_v39 }
 0x35a   : > { %v2045_v56 = vmax.f32 %v2013_v45, 0.0  ;;  %v2487_v22 = vsub.f32 1.0, %v2486_v46  ;;  %v2838_v54 = vmul.f32 %v2483_v32, %v2483_v32  ;;  %vm2492_vm13 = vmor %vm2490_vm12, %vm2491_vm11  ;;  %v2511_v38 = vand.u32 2147483648, %v5127_v39 }
 0x35b   : > { %v2172_v13 = vpop.f32.mrf.mxu1  ;;  %vm2505_vm0 = vweird.f32 %v5127_v39  ;;  %vm2510_vm2 = vcmp.eq.f32.partialorder %v2509_v33, 8.507059e+37 }
 0x35c   : > { %v2062_v58 = vpack.c.bf16 %v2045_v56, %v2044_v24  ;;  %v2173_v29 = vadd.f32 %v4973_v25, %v2172_v13  ;;  %v2488_v23 = vmul.f32 %v3762_v0, %v2487_v22  ;;  %v2886_v49 = vsel %vm2084_vm4, %v2838_v54, 0.0 }
 0x35d   : > { %v1943_v17 = vpop.f32.mrf.mxu0  ;;  %2887 = vadd.xlane.f32.xlu2 %v2886_v49  ;;  %v2512_v6 = vor.u32 1.1754944e-38, %v2511_v38 }
 0x35e   : > { %v3764_v63 = vpop.eup %3763  ;;  %v3624_v50 = vmul.f32 -1.442695, %v2173_v29  ;;  %v2489_v35 = vadd.f32 %v3762_v0, %v2488_v23  ;;  %3610 = vmatmul.msk.bf16.gmra.mxu1 %vm2084_vm4, %v2062_v58  ;;  %v1978_v8 = vadd.f32 %v1943_v17, %v1841_v43 }
 0x35f   : > { %v3766_v21 = vpop.eup %3765  ;;  %v5146_v51 = vadd.f32 1.0, %v3764_v63 }
 0x360   : > { %3767 = vpow2.f32 %v3624_v50  ;;  %v2493_v20 = vsel %vm2492_vm13, %v3762_v0, %v2489_v35  ;;  %v2501_v42 = vmul.f32 %v3766_v21, %v5127_v39  ;;  %vm2506_vm15 = vweird.f32 %v3766_v21 }
 0x361   : > { %3769 = vrcp.f32 %v5146_v51  ;;  %v2498_v53 = vsel %vm2495_vm14, %v2497_v47, %v2493_v20  ;;  %v2014_v11 = vadd.f32 %v5133_v55, %v1978_v8  ;;  %vm2507_vm1 = vmor %vm2505_vm0, %vm2506_vm15  ;;  %v2524_v46 = vand.u32 2147483647, %v5146_v51 }
 0x362   : > { %v2962_v7 = vpack.c.bf16 %v2498_v53, %v2483_v32  ;;  %v2839_v12 = vmul.f32 %v2498_v53, %v2498_v53  ;;  %v2502_v52 = vsub.f32 1.0, %v2501_v42  ;;  %v2526_v45 = vand.u32 2147483648, %v5146_v51 }
 0x363   : > { %v2174_v3 = vpop.f32.mrf.mxu1  ;;  %v2046_v59 = vmax.f32 %v2014_v11, 0.0  ;;  %vm2520_vm5 = vweird.f32 %v5146_v51  ;;  %vm2525_vm7 = vcmp.eq.f32.partialorder %v2524_v46, 8.507059e+37 }
 0x364   : > { %v2175_v4 = vadd.f32 %v4973_v25, %v2174_v3  ;;  %3656 = vmatmul.msk.bf16.gmra.mxu2 %vm2084_vm4, %v2962_v7  ;;  %v2889_v9 = vsel %vm2084_vm4, %v2839_v12, 0.0  ;;  %v2503_v5 = vmul.f32 %v3766_v21, %v2502_v52  ;;  %v2527_v37 = vor.u32 1.1754944e-38, %v2526_v45 }
 0x365   : > { %v1945_v15 = vpop.f32.mrf.mxu0  ;;  %2890 = vadd.xlane.f32.xlu0 %v2889_v9 }
 0x366   : > { %v3768_v30 = vpop.eup %3767  ;;  %v3625_v44 = vmul.f32 -1.442695, %v2175_v4  ;;  %v1979_v62 = vadd.f32 %v1945_v15, %v1842_v27  ;;  %v2504_v19 = vadd.f32 %v3766_v21, %v2503_v5 }
 0x367   : > { %v3770_v57 = vpop.eup %3769  ;;  %v2330_v48 = vadd.f32 1.0, %v3768_v30 }
 0x368   : > { %v2516_v40 = vmul.f32 %v3770_v57, %v5146_v51  ;;  %3771 = vpow2.f32 %v3625_v44  ;;  %v2015_v14 = vadd.f32 %v5133_v55, %v1979_v62  ;;  %v2508_v26 = vsel %vm2507_vm1, %v3766_v21, %v2504_v19 }
 0x369   : > { %3773 = vrcp.f32 %v2330_v48  ;;  %v2513_v31 = vsel %vm2510_vm2, %v2512_v6, %v2508_v26  ;;  %vm2521_vm3 = vweird.f32 %v3770_v57  ;;  %v2539_v63 = vand.u32 2147483647, %v2330_v48 }
 0x36a   : > { %v2047_v60 = vmax.f32 %v2015_v14, 0.0  ;;  %v2517_v0 = vsub.f32 1.0, %v2516_v40  ;;  %v2840_v39 = vmul.f32 %v2513_v31, %v2513_v31  ;;  %vm2522_vm6 = vmor %vm2520_vm5, %vm2521_vm3  ;;  %v2541_v1 = vand.u32 2147483648, %v2330_v48 }
 0x36b   : > { %v2177_v61 = vpop.f32.mrf.mxu1  ;;  %vm2535_vm9 = vweird.f32 %v2330_v48  ;;  %vm2540_vm11 = vcmp.eq.f32.partialorder %v2539_v63, 8.507059e+37 }
 0x36c   : > { %v2063_v16 = vpack.c.bf16 %v2047_v60, %v2046_v59  ;;  %v2178_v32 = vadd.f32 %v4973_v25, %v2177_v61  ;;  %v2518_v24 = vmul.f32 %v3770_v57, %v2517_v0  ;;  %v2892_v56 = vsel %vm2084_vm4, %v2840_v39, 0.0 }
 0x36d   : > { %2893 = vadd.xlane.f32.xlu1 %v2892_v56  ;;  %v2542_v41 = vor.u32 1.1754944e-38, %v2541_v1 }
 0x36e   : > { %v3772_v55 = vpop.eup %3771  ;;  %v3626_v22 = vmul.f32 -1.442695, %v2178_v32  ;;  %v2519_v54 = vadd.f32 %v3770_v57, %v2518_v24  ;;  %3611 = vmatmul.msk.bf16.gmra.mxu1 %vm2084_vm4, %v2063_v16 }
 0x36f   : > { %v3774_v13 = vpop.eup %3773  ;;  %v2331_v36 = vadd.f32 1.0, %v3772_v55 }
 0x370   : > { %3775 = vpow2.f32 %v3626_v22  ;;  %v2523_v58 = vsel %vm2522_vm6, %v3770_v57, %v2519_v54  ;;  %v2531_v29 = vmul.f32 %v3774_v13, %v2330_v48  ;;  %vm2536_vm8 = vweird.f32 %v3774_v13 }
 0x371   : > { %3777 = vrcp.f32 %v2331_v36  ;;  %v2528_v23 = vsel %vm2525_vm7, %v2527_v37, %v2523_v58  ;;  %vm2537_vm10 = vmor %vm2535_vm9, %vm2536_vm8  ;;  %v2554_v12 = vand.u32 2147483647, %v2331_v36  ;;  %v2556_v52 = vand.u32 2147483648, %v2331_v36 }
 0x372   : > { %v2963_v49 = vpack.c.bf16 %v2528_v23, %v2513_v31  ;;  %v2841_v10 = vmul.f32 %v2528_v23, %v2528_v23  ;;  %v2532_v34 = vsub.f32 1.0, %v2531_v29  ;;  %vm2550_vm13 = vweird.f32 %v2331_v36 }
 0x373   : > { %v2179_v17 = vpop.f32.mrf.mxu1  ;;  %v2557_v30 = vor.u32 1.1754944e-38, %v2556_v52  ;;  %vm2555_vm15 = vcmp.eq.f32.partialorder %v2554_v12, 8.507059e+37 }
 0x374   : > { %v2180_v50 = vadd.f32 %v4973_v25, %v2179_v17  ;;  %3657 = vmatmul.msk.bf16.gmra.mxu2 %vm2084_vm4, %v2963_v49  ;;  %v2895_v35 = vsel %vm2084_vm4, %v2841_v10, 0.0  ;;  %v2533_v21 = vmul.f32 %v3774_v13, %v2532_v34 }
 0x375   : > { %2896 = vadd.xlane.f32.xlu2 %v2895_v35 }
 0x376   : > { %v3776_v28 = vpop.eup %3775  ;;  %v3627_v2 = vmul.f32 -1.442695, %v2180_v50  ;;  %v2534_v43 = vadd.f32 %v3774_v13, %v2533_v21 }
 0x377   : > { %v3778_v51 = vpop.eup %3777  ;;  %v2332_v47 = vadd.f32 1.0, %v3776_v28 }
 0x378   : > { %v2546_v20 = vmul.f32 %v3778_v51, %v2331_v36  ;;  %3779 = vpow2.f32 %v3627_v2  ;;  %v2538_v42 = vsel %vm2537_vm10, %v3774_v13, %v2534_v43  ;;  %vm2551_vm12 = vweird.f32 %v3778_v51  ;;  %v5178_v13 = vld [vmem:[%s5433_s4] ss:$0 sm:$0xff] }
 0x379   : > { %3781 = vrcp.f32 %v2332_v47  ;;  %v2543_v18 = vsel %vm2540_vm11, %v2542_v41, %v2538_v42  ;;  %vm2552_vm14 = vmor %vm2550_vm13, %vm2551_vm12  ;;  %v2569_v40 = vand.u32 2147483647, %v2332_v47  ;;  %v2571_v14 = vand.u32 2147483648, %v2332_v47 }
 0x37a   : > { %v2547_v53 = vsub.f32 1.0, %v2546_v20  ;;  %v2842_v8 = vmul.f32 %v2543_v18, %v2543_v18  ;;  %vm2565_vm1 = vweird.f32 %v2332_v47 }
 0x37b   : > { %v2182_v7 = vpop.f32.mrf.mxu1  ;;  %v2572_v45 = vor.u32 1.1754944e-38, %v2571_v14  ;;  %vm2570_vm3 = vcmp.eq.f32.partialorder %v2569_v40, 8.507059e+37 }
 0x37c   : > { %v2183_v27 = vadd.f32 %v4973_v25, %v2182_v7  ;;  %v2548_v3 = vmul.f32 %v3778_v51, %v2547_v53  ;;  %v2898_v33 = vsel %vm2084_vm4, %v2842_v8, 0.0 }
 0x37d   : > { %2899 = vadd.xlane.f32.xlu0 %v2898_v33 }
 0x37e   : > { %v3780_v38 = vpop.eup %3779  ;;  %v3628_v4 = vmul.f32 -1.442695, %v2183_v27  ;;  %v2549_v9 = vadd.f32 %v3778_v51, %v2548_v3 }
 0x37f   : > { %v3782_v5 = vpop.eup %3781  ;;  %v2333_v15 = vadd.f32 1.0, %v3780_v38 }
 0x380   : > { %3783 = vpow2.f32 %v3628_v4  ;;  %v2553_v11 = vsel %vm2552_vm14, %v3778_v51, %v2549_v9  ;;  %v2561_v44 = vmul.f32 %v3782_v5, %v2332_v47  ;;  %vm2566_vm0 = vweird.f32 %v3782_v5 }
 0x381   : > { %3785 = vrcp.f32 %v2333_v15  ;;  %v2558_v62 = vsel %vm2555_vm15, %v2557_v30, %v2553_v11  ;;  %vm2567_vm2 = vmor %vm2565_vm1, %vm2566_vm0  ;;  %v2584_v22 = vand.u32 2147483647, %v2333_v15  ;;  %v2586_v54 = vand.u32 2147483648, %v2333_v15 }
 0x382   : > { %v2964_v19 = vpack.c.bf16 %v2558_v62, %v2543_v18  ;;  %v2843_v57 = vmul.f32 %v2558_v62, %v2558_v62  ;;  %v2562_v48 = vsub.f32 1.0, %v2561_v44  ;;  %vm2580_vm6 = vweird.f32 %v2333_v15 }
 0x383   : > { %v2184_v6 = vpop.f32.mrf.mxu1  ;;  %v2587_v17 = vor.u32 1.1754944e-38, %v2586_v54  ;;  %vm2585_vm8 = vcmp.eq.f32.partialorder %v2584_v22, 8.507059e+37 }
 0x384   : > { %v2185_v26 = vadd.f32 %v4973_v25, %v2184_v6  ;;  %3658 = vmatmul.msk.bf16.gmra.mxu2 %vm2084_vm4, %v2964_v19  ;;  %v2901_v31 = vsel %vm2084_vm4, %v2843_v57, 0.0  ;;  %v2563_v59 = vmul.f32 %v3782_v5, %v2562_v48 }
 0x385   : > { %2902 = vadd.xlane.f32.xlu1 %v2901_v31 }
 0x386   : > { %v3784_v60 = vpop.eup %3783  ;;  %v3629_v0 = vmul.f32 -1.442695, %v2185_v26  ;;  %v2564_v39 = vadd.f32 %v3782_v5, %v2563_v59 }
 0x387   : > { %v3786_v61 = vpop.eup %3785  ;;  %v2334_v46 = vadd.f32 1.0, %v3784_v60 }
 0x388   : > { %v2576_v16 = vmul.f32 %v3786_v61, %v2333_v15  ;;  %3787 = vpow2.f32 %v3629_v0  ;;  %v2568_v32 = vsel %vm2567_vm2, %v3782_v5, %v2564_v39  ;;  %vm2581_vm5 = vweird.f32 %v3786_v61 }
 0x389   : > { %3789 = vrcp.f32 %v2334_v46  ;;  %v2573_v25 = vsel %vm2570_vm3, %v2572_v45, %v2568_v32  ;;  %vm2582_vm7 = vmor %vm2580_vm6, %vm2581_vm5  ;;  %v2599_v43 = vand.u32 2147483647, %v2334_v46  ;;  %v2601_v51 = vand.u32 2147483648, %v2334_v46 }
 0x38a   : > { %v2577_v24 = vsub.f32 1.0, %v2576_v16  ;;  %v2844_v56 = vmul.f32 %v2573_v25, %v2573_v25  ;;  %vm2595_vm10 = vweird.f32 %v2334_v46 }
 0x38b   : > { %v2187_v55 = vpop.f32.mrf.mxu1  ;;  %v2602_v12 = vor.u32 1.1754944e-38, %v2601_v51  ;;  %vm2600_vm12 = vcmp.eq.f32.partialorder %v2599_v43, 8.507059e+37 }
 0x38c   : > { %v2188_v36 = vadd.f32 %v5178_v13, %v2187_v55  ;;  %v2578_v37 = vmul.f32 %v3786_v61, %v2577_v24  ;;  %v2904_v58 = vsel %vm2084_vm4, %v2844_v56, 0.0 }
 0x38d   : > { %2905 = vadd.xlane.f32.xlu2 %v2904_v58 }
 0x38e   : > { %v3788_v29 = vpop.eup %3787  ;;  %v3630_v23 = vmul.f32 -1.442695, %v2188_v36  ;;  %v2579_v49 = vadd.f32 %v3786_v61, %v2578_v37 }
 0x38f   : > { %v3790_v10 = vpop.eup %3789  ;;  %v2335_v34 = vadd.f32 1.0, %v3788_v29 }
 0x390   : > { %3791 = vpow2.f32 %v3630_v23  ;;  %v2583_v63 = vsel %vm2582_vm7, %v3786_v61, %v2579_v49  ;;  %v2591_v1 = vmul.f32 %v3790_v10, %v2334_v46  ;;  %vm2596_vm9 = vweird.f32 %v3790_v10  ;;  %v2864_v55 = vpop.xlane.xlu0 %2863 }
 0x391   : > { %3793 = vrcp.f32 %v2335_v34  ;;  %v2588_v50 = vsel %vm2585_vm8, %v2587_v17, %v2583_v63  ;;  %vm2597_vm11 = vmor %vm2595_vm10, %vm2596_vm9  ;;  %v2614_v9 = vand.u32 2147483647, %v2335_v34  ;;  %v2616_v5 = vand.u32 2147483648, %v2335_v34  ;;  %v5200_v17 = vld [vmem:[%s5435_s6] ss:$0 sm:$0xff] }
 0x392   : > { %v2965_v35 = vpack.c.bf16 %v2588_v50, %v2573_v25  ;;  %v2845_v21 = vmul.f32 %v2588_v50, %v2588_v50  ;;  %v2592_v28 = vsub.f32 1.0, %v2591_v1  ;;  %vm2610_vm14 = vweird.f32 %v2335_v34 }
 0x393   : > { %v2189_v2 = vpop.f32.mrf.mxu1  ;;  %v2617_v6 = vor.u32 1.1754944e-38, %v2616_v5  ;;  %vm2615_vm0 = vcmp.eq.f32.partialorder %v2614_v9, 8.507059e+37  ;;  %vm3259_vm10 = vcmask 130048  }
 0x394   : > { %v2190_v47 = vadd.f32 %v5178_v13, %v2189_v2  ;;  %3659 = vmatmul.msk.bf16.gmra.mxu2 %vm2084_vm4, %v2965_v35  ;;  %v2907_v41 = vsel %vm2084_vm4, %v2845_v21, 0.0  ;;  %v2593_v20 = vmul.f32 %v3790_v10, %v2592_v28 }
 0x395   : > { %2908 = vadd.xlane.f32.xlu0 %v2907_v41 }
 0x396   : > { %v3792_v42 = vpop.eup %3791  ;;  %v3631_v18 = vmul.f32 -1.442695, %v2190_v47  ;;  %v2594_v53 = vadd.f32 %v3790_v10, %v2593_v20 }
 0x397   : > { %v3794_v8 = vpop.eup %3793  ;;  %v2336_v7 = vadd.f32 1.0, %v3792_v42 }
 0x398   : > { %v2606_v52 = vmul.f32 %v3794_v8, %v2335_v34  ;;  %3795 = vpow2.f32 %v3631_v18  ;;  %v2598_v27 = vsel %vm2597_vm11, %v3790_v10, %v2594_v53  ;;  %vm2611_vm13 = vweird.f32 %v3794_v8 }
 0x399   : > { %3797 = vrcp.f32 %v2336_v7  ;;  %v2603_v3 = vsel %vm2600_vm12, %v2602_v12, %v2598_v27  ;;  %vm2612_vm15 = vmor %vm2610_vm14, %vm2611_vm13  ;;  %v2629_v39 = vand.u32 2147483647, %v2336_v7  ;;  %v2631_v61 = vand.u32 2147483648, %v2336_v7 }
 0x39a   : > { %v2607_v33 = vsub.f32 1.0, %v2606_v52  ;;  %v2846_v38 = vmul.f32 %v2603_v3, %v2603_v3  ;;  %vm2625_vm2 = vweird.f32 %v2336_v7 }
 0x39b   : > { %v2192_v4 = vpop.f32.mrf.mxu1  ;;  %vm2630_vm5 = vcmp.eq.f32.partialorder %v2629_v39, 8.507059e+37  ;;  %v2632_v36 = vor.u32 1.1754944e-38, %v2631_v61 }
 0x39c   : > { %v2193_v15 = vadd.f32 %v5178_v13, %v2192_v4  ;;  %v2608_v30 = vmul.f32 %v3794_v8, %v2607_v33  ;;  %v2910_v11 = vsel %vm2084_vm4, %v2846_v38, 0.0 }
 0x39d   : > { %2911 = vadd.xlane.f32.xlu1 %v2910_v11 }
 0x39e   : > { %v3796_v44 = vpop.eup %3795  ;;  %v3632_v62 = vmul.f32 -1.442695, %v2193_v15  ;;  %v2609_v19 = vadd.f32 %v3794_v8, %v2608_v30 }
 0x39f   : > { %v3798_v57 = vpop.eup %3797  ;;  %v5187_v48 = vadd.f32 1.0, %v3796_v44 }
 0x3a0   : > { %3799 = vpow2.f32 %v3632_v62  ;;  %v2613_v40 = vsel %vm2612_vm15, %v3794_v8, %v2609_v19  ;;  %v2621_v14 = vmul.f32 %v3798_v57, %v2336_v7  ;;  %vm2626_vm1 = vweird.f32 %v3798_v57  ;;  %v2867_v7 = vpop.xlane.xlu0 %2866 }
 0x3a1   : > { %3801 = vrcp.f32 %v5187_v48  ;;  %v2618_v26 = vsel %vm2615_vm0, %v2617_v6, %v2613_v40  ;;  %vm2627_vm3 = vmor %vm2625_vm2, %vm2626_vm1  ;;  %v2644_v1 = vand.u32 2147483647, %v5187_v48  ;;  %v2646_v50 = vand.u32 2147483648, %v5187_v48  ;;  %v2870_v40 = vpop.xlane.xlu1 %2869 }
 0x3a2   : > { %v2966_v31 = vpack.c.bf16 %v2618_v26, %v2603_v3  ;;  %v2847_v59 = vmul.f32 %v2618_v26, %v2618_v26  ;;  %v2622_v60 = vsub.f32 1.0, %v2621_v14  ;;  %vm2640_vm7 = vweird.f32 %v5187_v48 }
 0x3a3   : > { %v2194_v0 = vpop.f32.mrf.mxu1  ;;  %v2647_v42 = vor.u32 1.1754944e-38, %v2646_v50  ;;  %vm2645_vm9 = vcmp.eq.f32.partialorder %v2644_v1, 8.507059e+37 }
 0x3a4   : > { %v2195_v46 = vadd.f32 %v5178_v13, %v2194_v0  ;;  %3660 = vmatmul.msk.bf16.gmra.mxu2 %vm2084_vm4, %v2966_v31  ;;  %v2913_v45 = vsel %vm2084_vm4, %v2847_v59, 0.0  ;;  %v2623_v16 = vmul.f32 %v3798_v57, %v2622_v60 }
 0x3a5   : > { %2914 = vadd.xlane.f32.xlu2 %v2913_v45 }
 0x3a6   : > { %v3800_v32 = vpop.eup %3799  ;;  %v3633_v25 = vmul.f32 -1.442695, %v2195_v46  ;;  %v2624_v24 = vadd.f32 %v3798_v57, %v2623_v16  ;;  %v3337_v46 = vld [vmem:[%s5436_s7 + $0x8] sm:$0xff] }
 0x3a7   : > { %v3802_v56 = vpop.eup %3801  ;;  %v5193_v22 = vadd.f32 1.0, %v3800_v32  ;;  %v3047_v54 = vpop.f32.mrf.mxu2  ;;  %3356 = vmatpush.msrb.mxu3 %v3337_v46 }
 0x3a8   : > { %v2636_v37 = vmul.f32 %v3802_v56, %v5187_v48  ;;  %3803 = vpow2.f32 %v3633_v25  ;;  %v3127_v58 = vmul.f32 2.0, %v3047_v54  ;;  %v2628_v29 = vsel %vm2627_vm3, %v3798_v57, %v2624_v24 }
 0x3a9   : > { %3805 = vrcp.f32 %v5193_v22  ;;  %v2633_v23 = vsel %vm2630_vm5, %v2632_v36, %v2628_v29  ;;  %vm2641_vm6 = vweird.f32 %v3802_v56  ;;  %v2661_v5 = vand.u32 2147483648, %v5193_v22 }
 0x3aa   : > { %v2637_v49 = vsub.f32 1.0, %v2636_v37  ;;  %v2848_v10 = vmul.f32 %v2633_v23, %v2633_v23  ;;  %v3159_v34 = vsub.f32 %v2864_v55, %v3127_v58  ;;  %vm2642_vm8 = vmor %vm2640_vm7, %vm2641_vm6  ;;  %v2659_v62 = vand.u32 2147483647, %v5193_v22 }
 0x3ab   : > { %v2197_v63 = vpop.f32.mrf.mxu1  ;;  %vm2655_vm12 = vweird.f32 %v5193_v22  ;;  %v2662_v60 = vor.u32 1.1754944e-38, %v2661_v5 }
 0x3ac   : > { %v2198_v35 = vadd.f32 %v5178_v13, %v2197_v63  ;;  %v2638_v21 = vmul.f32 %v3802_v56, %v2637_v49  ;;  %v2916_v28 = vsel %vm2084_vm4, %v2848_v10, 0.0  ;;  %v3195_v20 = vadd.f32 %v5200_v17, %v3159_v34 }
 0x3ad   : > { %2917 = vadd.xlane.f32.xlu0 %v2916_v28  ;;  %vm2660_vm14 = vcmp.eq.f32.partialorder %v2659_v62, 8.507059e+37 }
 0x3ae   : > { %v3804_v2 = vpop.eup %3803  ;;  %v3634_v43 = vmul.f32 -1.442695, %v2198_v35  ;;  %v2639_v51 = vadd.f32 %v3802_v56, %v2638_v21  ;;  %v3227_v38 = vmax.f32 %v3195_v20, 0.0 }
 0x3af   : > { %v3806_v47 = vpop.eup %3805  ;;  %v5207_v41 = vadd.f32 1.0, %v3804_v2  ;;  %v3049_v18 = vpop.f32.mrf.mxu2 }
 0x3b0   : > { %3807 = vpow2.f32 %v3634_v43  ;;  %v2643_v53 = vsel %vm2642_vm8, %v3802_v56, %v2639_v51  ;;  %v3128_v8 = vmul.f32 2.0, %v3049_v18  ;;  %v2651_v52 = vmul.f32 %v3806_v47, %v5193_v22  ;;  %v2873_v43 = vpop.xlane.xlu1 %2872 }
 0x3b1   : > { %3809 = vrcp.f32 %v5207_v41  ;;  %v2648_v12 = vsel %vm2645_vm9, %v2647_v42, %v2643_v53  ;;  %vm2656_vm11 = vweird.f32 %v3806_v47  ;;  %v3260_v14 = vsel %vm3259_vm10, %v3227_v38, inf }
 0x3b2   : > { %v2967_v27 = vpack.c.bf16 %v2648_v12, %v2633_v23  ;;  %v3160_v3 = vsub.f32 %v2867_v7, %v3128_v8  ;;  %v2849_v33 = vmul.f32 %v2648_v12, %v2648_v12  ;;  %v2652_v9 = vsub.f32 1.0, %v2651_v52  ;;  %vm2657_vm13 = vmor %vm2655_vm12, %vm2656_vm11 }
 0x3b3   : > { %v2199_v4 = vpop.f32.mrf.mxu1  ;;  %v2674_v55 = vand.u32 2147483647, %v5207_v41  ;;  %v2676_v22 = vand.u32 2147483648, %v5207_v41  ;;  %vm2670_vm0 = vweird.f32 %v5207_v41 }
 0x3b4   : > { %v3196_v15 = vadd.f32 %v5200_v17, %v3160_v3  ;;  %v2200_v30 = vadd.f32 %v5178_v13, %v2199_v4  ;;  %3661 = vmatmul.msk.bf16.gmra.mxu2 %vm2084_vm4, %v2967_v27  ;;  %v2919_v11 = vsel %vm2084_vm4, %v2849_v33, 0.0  ;;  %v2653_v44 = vmul.f32 %v3806_v47, %v2652_v9 }
 0x3b5   : > { %2920 = vadd.xlane.f32.xlu1 %v2919_v11  ;;  %vm2675_vm2 = vcmp.eq.f32.partialorder %v2674_v55, 8.507059e+37  ;;  %v2677_v50 = vor.u32 1.1754944e-38, %v2676_v22 }
 0x3b6   : > { %v3808_v19 = vpop.eup %3807  ;;  %v3228_v57 = vmax.f32 %v3196_v15, 0.0  ;;  %v3635_v48 = vmul.f32 -1.442695, %v2200_v30  ;;  %v2654_v59 = vadd.f32 %v3806_v47, %v2653_v44  ;;  %v2876_v15 = vpop.xlane.xlu2 %2875 }
 0x3b7   : > { %v3810_v6 = vpop.eup %3809  ;;  %v5220_v26 = vadd.f32 1.0, %v3808_v19  ;;  %v3052_v31 = vpop.f32.mrf.mxu2 }
 0x3b8   : > { %v2666_v0 = vmul.f32 %v3810_v6, %v5207_v41  ;;  %v3261_v39 = vsel %vm3259_vm10, %v3228_v57, inf  ;;  %3811 = vpow2.f32 %v3635_v48  ;;  %v3129_v61 = vmul.f32 2.0, %v3052_v31 }
 0x3b9   : > { %3813 = vrcp.f32 %v5220_v26  ;;  %v3265_v45 = vmin.f32 %v3260_v14, %v3261_v39  ;;  %v2658_v16 = vsel %vm2657_vm13, %v3806_v47, %v2654_v59  ;;  %vm2671_vm15 = vweird.f32 %v3810_v6 }
 0x3ba   : > { %v3161_v32 = vsub.f32 %v2870_v40, %v3129_v61  ;;  %v2663_v25 = vsel %vm2660_vm14, %v2662_v60, %v2658_v16  ;;  %v2667_v24 = vsub.f32 1.0, %v2666_v0  ;;  %vm2672_vm1 = vmor %vm2670_vm0, %vm2671_vm15  ;;  %v2691_v7 = vand.u32 2147483648, %v5220_v26 }
 0x3bb   : > { %v2202_v56 = vpop.f32.mrf.mxu1  ;;  %v2850_v54 = vmul.f32 %v2663_v25, %v2663_v25  ;;  %v2689_v33 = vand.u32 2147483647, %v5220_v26  ;;  %vm2685_vm5 = vweird.f32 %v5220_v26 }
 0x3bc   : > { %v3197_v36 = vadd.f32 %v5200_v17, %v3161_v32  ;;  %v2203_v37 = vadd.f32 %v5178_v13, %v2202_v56  ;;  %v2668_v58 = vmul.f32 %v3810_v6, %v2667_v24  ;;  %v2692_v62 = vor.u32 1.1754944e-38, %v2691_v7 }
 0x3bd   : > { %v2922_v29 = vsel %vm2084_vm4, %v2850_v54, 0.0  ;;  %vm2690_vm7 = vcmp.eq.f32.partialorder %v2689_v33, 8.507059e+37 }
 0x3be   : > { %v3812_v23 = vpop.eup %3811  ;;  %v3229_v49 = vmax.f32 %v3197_v36, 0.0  ;;  %v3636_v10 = vmul.f32 -1.442695, %v2203_v37  ;;  %v2669_v34 = vadd.f32 %v3810_v6, %v2668_v58  ;;  %2923 = vadd.xlane.f32.xlu2 %v2922_v29 }
 0x3bf   : > { %v3814_v63 = vpop.eup %3813  ;;  %v5235_v1 = vadd.f32 1.0, %v3812_v23  ;;  %v3054_v35 = vpop.f32.mrf.mxu2 }
 0x3c0   : > { %v3262_v21 = vsel %vm3259_vm10, %v3229_v49, inf  ;;  %3815 = vpow2.f32 %v3636_v10  ;;  %v2673_v28 = vsel %vm2672_vm1, %v3810_v6, %v2669_v34  ;;  %v3130_v2 = vmul.f32 2.0, %v3054_v35  ;;  %v2879_v23 = vpop.xlane.xlu2 %2878 }
 0x3c1   : > { %3817 = vrcp.f32 %v5235_v1  ;;  %v5239_v51 = vmin.f32 %v3262_v21, %v3265_v45  ;;  %v2678_v47 = vsel %vm2675_vm2, %v2677_v50, %v2673_v28  ;;  %v2681_v41 = vmul.f32 %v3814_v63, %v5220_v26 }
 0x3c2   : > { %v2968_v20 = vpack.c.bf16 %v2678_v47, %v2663_v25  ;;  %v3162_v42 = vsub.f32 %v2873_v43, %v3130_v2  ;;  %v2851_v18 = vmul.f32 %v2678_v47, %v2678_v47  ;;  %vm2686_vm3 = vweird.f32 %v3814_v63 }
 0x3c3   : > { %v2204_v53 = vpop.f32.mrf.mxu1  ;;  %v2682_v8 = vsub.f32 1.0, %v2681_v41  ;;  %vm2687_vm6 = vmor %vm2685_vm5, %vm2686_vm3  ;;  %v2704_v26 = vand.u32 2147483647, %v5235_v1  ;;  %v2706_v0 = vand.u32 2147483648, %v5235_v1  ;;  %vm2700_vm9 = vweird.f32 %v5235_v1 }
 0x3c4   : > { %v3198_v12 = vadd.f32 %v5200_v17, %v3162_v42  ;;  %v2205_v52 = vadd.f32 %v5178_v13, %v2204_v53  ;;  %3662 = vmatmul.msk.bf16.gmra.mxu2 %vm2084_vm4, %v2968_v20  ;;  %v2925_v27 = vsel %vm2084_vm4, %v2851_v18, 0.0 }
 0x3c5   : > { %2926 = vadd.xlane.f32.xlu0 %v2925_v27  ;;  %v2683_v3 = vmul.f32 %v3814_v63, %v2682_v8  ;;  %vm2705_vm12 = vcmp.eq.f32.partialorder %v2704_v26, 8.507059e+37  ;;  %v2707_v54 = vor.u32 1.1754944e-38, %v2706_v0 }
 0x3c6   : > { %v3816_v38 = vpop.eup %3815  ;;  %v3230_v4 = vmax.f32 %v3198_v12, 0.0  ;;  %v3637_v9 = vmul.f32 -1.442695, %v2205_v52 }
 0x3c7   : > { %v3818_v5 = vpop.eup %3817  ;;  %v5248_v30 = vadd.f32 1.0, %v3816_v38  ;;  %v3057_v11 = vpop.f32.mrf.mxu2  ;;  %v2684_v44 = vadd.f32 %v3814_v63, %v2683_v3 }
 0x3c8   : > { %v2696_v19 = vmul.f32 %v3818_v5, %v5235_v1  ;;  %v3263_v57 = vsel %vm3259_vm10, %v3230_v4, inf  ;;  %3819 = vpow2.f32 %v3637_v9  ;;  %v3131_v48 = vmul.f32 2.0, %v3057_v11  ;;  %v2882_v38 = vpop.xlane.xlu0 %2881 }
 0x3c9   : > { %3821 = vrcp.f32 %v5248_v30  ;;  %v3269_v6 = vmin.f32 %v3263_v57, %v5239_v51  ;;  %v2688_v40 = vsel %vm2687_vm6, %v3814_v63, %v2684_v44  ;;  %vm2701_vm8 = vweird.f32 %v3818_v5 }
 0x3ca   : > { %v3163_v14 = vsub.f32 %v2876_v15, %v3131_v48  ;;  %v2693_v31 = vsel %vm2690_vm7, %v2692_v62, %v2688_v40  ;;  %v2697_v59 = vsub.f32 1.0, %v2696_v19  ;;  %vm2702_vm11 = vmor %vm2700_vm9, %vm2701_vm8  ;;  %v2721_v28 = vand.u32 2147483648, %v5248_v30 }
 0x3cb   : > { %v2207_v60 = vpop.f32.mrf.mxu1  ;;  %v2852_v39 = vmul.f32 %v2693_v31, %v2693_v31  ;;  %v2719_v41 = vand.u32 2147483647, %v5248_v30  ;;  %vm2715_vm14 = vweird.f32 %v5248_v30 }
 0x3cc   : > { %v3199_v61 = vadd.f32 %v5200_v17, %v3163_v14  ;;  %v2208_v46 = vadd.f32 %v5178_v13, %v2207_v60  ;;  %v2698_v45 = vmul.f32 %v3818_v5, %v2697_v59  ;;  %v2722_v52 = vor.u32 1.1754944e-38, %v2721_v28 }
 0x3cd   : > { %v2928_v16 = vsel %vm2084_vm4, %v2852_v39, 0.0  ;;  %vm2720_vm0 = vcmp.eq.f32.partialorder %v2719_v41, 8.507059e+37 }
 0x3ce   : > { %v3820_v32 = vpop.eup %3819  ;;  %v3231_v25 = vmax.f32 %v3199_v61, 0.0  ;;  %v3638_v24 = vmul.f32 -1.442695, %v2208_v46  ;;  %v2699_v56 = vadd.f32 %v3818_v5, %v2698_v45  ;;  %2929 = vadd.xlane.f32.xlu1 %v2928_v16 }
 0x3cf   : > { %v3822_v55 = vpop.eup %3821  ;;  %v5262_v22 = vadd.f32 1.0, %v3820_v32  ;;  %v3059_v36 = vpop.f32.mrf.mxu2 }
 0x3d0   : > { %v3264_v37 = vsel %vm3259_vm10, %v3231_v25, inf  ;;  %3823 = vpow2.f32 %v3638_v24  ;;  %v2703_v58 = vsel %vm2702_vm11, %v3818_v5, %v2699_v56  ;;  %v3132_v29 = vmul.f32 2.0, %v3059_v36  ;;  %v2885_v32 = vpop.xlane.xlu1 %2884 }
 0x3d1   : > { %3825 = vrcp.f32 %v5262_v22  ;;  %v5266_v49 = vmin.f32 %v3264_v37, %v3269_v6  ;;  %v2708_v10 = vsel %vm2705_vm12, %v2707_v54, %v2703_v58  ;;  %v2711_v34 = vmul.f32 %v3822_v55, %v5248_v30 }
 0x3d2   : > { %v2969_v63 = vpack.c.bf16 %v2708_v10, %v2693_v31  ;;  %v3164_v1 = vsub.f32 %v2879_v23, %v3132_v29  ;;  %v2853_v50 = vmul.f32 %v2708_v10, %v2708_v10  ;;  %vm2716_vm13 = vweird.f32 %v3822_v55 }
 0x3d3   : > { %v2209_v35 = vpop.f32.mrf.mxu1  ;;  %v2712_v21 = vsub.f32 1.0, %v2711_v34  ;;  %vm2717_vm15 = vmor %vm2715_vm14, %vm2716_vm13  ;;  %v2734_v44 = vand.u32 2147483647, %v5262_v22  ;;  %v2736_v62 = vand.u32 2147483648, %v5262_v22  ;;  %vm2730_vm2 = vweird.f32 %v5262_v22 }
 0x3d4   : > { %v3200_v2 = vadd.f32 %v5200_v17, %v3164_v1  ;;  %v2210_v43 = vadd.f32 %v5178_v13, %v2209_v35  ;;  %3663 = vmatmul.msk.bf16.gmra.mxu2 %vm2084_vm4, %v2969_v63  ;;  %v2931_v51 = vsel %vm2084_vm4, %v2853_v50, 0.0 }
 0x3d5   : > { %2932 = vadd.xlane.f32.xlu2 %v2931_v51  ;;  %v2713_v47 = vmul.f32 %v3822_v55, %v2712_v21  ;;  %vm2735_vm5 = vcmp.eq.f32.partialorder %v2734_v44, 8.507059e+37  ;;  %v2737_v39 = vor.u32 1.1754944e-38, %v2736_v62 }
 0x3d6   : > { %v3824_v20 = vpop.eup %3823  ;;  %v3232_v42 = vmax.f32 %v3200_v2, 0.0  ;;  %v3639_v18 = vmul.f32 -1.442695, %v2210_v43 }
 0x3d7   : > { %v3826_v53 = vpop.eup %3825  ;;  %v5275_v8 = vadd.f32 1.0, %v3824_v20  ;;  %v3062_v7 = vpop.f32.mrf.mxu2  ;;  %v2714_v12 = vadd.f32 %v3822_v55, %v2713_v47 }
 0x3d8   : > { %v2726_v27 = vmul.f32 %v3826_v53, %v5262_v22  ;;  %v3266_v3 = vsel %vm3259_vm10, %v3232_v42, inf  ;;  %3827 = vpow2.f32 %v3639_v18  ;;  %v3133_v33 = vmul.f32 2.0, %v3062_v7  ;;  %v2888_v20 = vpop.xlane.xlu2 %2887 }
 0x3d9   : > { %3829 = vrcp.f32 %v5275_v8  ;;  %v3273_v4 = vmin.f32 %v3266_v3, %v5266_v49  ;;  %v2718_v9 = vsel %vm2717_vm15, %v3822_v55, %v2714_v12  ;;  %vm2731_vm1 = vweird.f32 %v3826_v53 }
 0x3da   : > { %v3165_v5 = vsub.f32 %v2882_v38, %v3133_v33  ;;  %v2723_v15 = vsel %vm2720_vm0, %v2722_v52, %v2718_v9  ;;  %v2727_v11 = vsub.f32 1.0, %v2726_v27  ;;  %vm2732_vm3 = vmor %vm2730_vm2, %vm2731_vm1  ;;  %v2751_v58 = vand.u32 2147483648, %v5275_v8 }
 0x3db   : > { %v2212_v30 = vpop.f32.mrf.mxu1  ;;  %v2854_v19 = vmul.f32 %v2723_v15, %v2723_v15  ;;  %v2749_v34 = vand.u32 2147483647, %v5275_v8  ;;  %vm2745_vm7 = vweird.f32 %v5275_v8 }
 0x3dc   : > { %v3201_v57 = vadd.f32 %v5200_v17, %v3165_v5  ;;  %v2213_v48 = vadd.f32 %v5178_v13, %v2212_v30  ;;  %v2728_v6 = vmul.f32 %v3826_v53, %v2727_v11  ;;  %v2752_v43 = vor.u32 1.1754944e-38, %v2751_v58 }
 0x3dd   : > { %v2934_v40 = vsel %vm2084_vm4, %v2854_v19, 0.0  ;;  %vm2750_vm9 = vcmp.eq.f32.partialorder %v2749_v34, 8.507059e+37 }
 0x3de   : > { %v3828_v14 = vpop.eup %3827  ;;  %v3233_v31 = vmax.f32 %v3201_v57, 0.0  ;;  %v3640_v59 = vmul.f32 -1.442695, %v2213_v48  ;;  %v2729_v60 = vadd.f32 %v3826_v53, %v2728_v6  ;;  %2935 = vadd.xlane.f32.xlu0 %v2934_v40 }
 0x3df   : > { %v3830_v26 = vpop.eup %3829  ;;  %v5289_v0 = vadd.f32 1.0, %v3828_v14  ;;  %v3064_v61 = vpop.f32.mrf.mxu2 }
 0x3e0   : > { %v3268_v46 = vsel %vm3259_vm10, %v3233_v31, inf  ;;  %3831 = vpow2.f32 %v3640_v59  ;;  %v2733_v45 = vsel %vm2732_vm3, %v3826_v53, %v2729_v60  ;;  %v3134_v16 = vmul.f32 2.0, %v3064_v61  ;;  %v2891_v14 = vpop.xlane.xlu0 %2890  ;;  %v2894_v34 = vpop.xlane.xlu1 %2893 }
 0x3e1   : > { %3833 = vrcp.f32 %v5289_v0  ;;  %v5293_v25 = vmin.f32 %v3268_v46, %v3273_v4  ;;  %v2738_v24 = vsel %vm2735_vm5, %v2737_v39, %v2733_v45  ;;  %v2741_v56 = vmul.f32 %v3830_v26, %v5275_v8 }
 0x3e2   : > { %v2970_v55 = vpack.c.bf16 %v2738_v24, %v2723_v15  ;;  %v3166_v22 = vsub.f32 %v2885_v32, %v3134_v16  ;;  %v2855_v54 = vmul.f32 %v2738_v24, %v2738_v24  ;;  %vm2746_vm6 = vweird.f32 %v3830_v26 }
 0x3e3   : > { %v2214_v36 = vpop.f32.mrf.mxu1  ;;  %v2742_v37 = vsub.f32 1.0, %v2741_v56  ;;  %vm2747_vm8 = vmor %vm2745_vm7, %vm2746_vm6  ;;  %v2764_v52 = vand.u32 2147483647, %v5289_v0  ;;  %v2766_v27 = vand.u32 2147483648, %v5289_v0  ;;  %vm2760_vm12 = vweird.f32 %v5289_v0 }
 0x3e4   : > { %v3202_v29 = vadd.f32 %v5200_v17, %v3166_v22  ;;  %v2215_v23 = vadd.f32 %v5178_v13, %v2214_v36  ;;  %3664 = vmatmul.msk.bf16.gmra.mxu2 %vm2084_vm4, %v2970_v55  ;;  %v2937_v49 = vsel %vm2084_vm4, %v2855_v54, 0.0 }
 0x3e5   : > { %2938 = vadd.xlane.f32.xlu1 %v2937_v49  ;;  %v2743_v10 = vmul.f32 %v3830_v26, %v2742_v37  ;;  %vm2765_vm14 = vcmp.eq.f32.partialorder %v2764_v52, 8.507059e+37  ;;  %v2767_v19 = vor.u32 1.1754944e-38, %v2766_v27 }
 0x3e6   : > { %v3832_v63 = vpop.eup %3831  ;;  %v3234_v1 = vmax.f32 %v3202_v29, 0.0  ;;  %v3641_v50 = vmul.f32 -1.442695, %v2215_v23 }
 0x3e7   : > { %v3834_v35 = vpop.eup %3833  ;;  %v5302_v21 = vadd.f32 1.0, %v3832_v63  ;;  %v3067_v28 = vpop.f32.mrf.mxu2  ;;  %v2744_v2 = vadd.f32 %v3830_v26, %v2743_v10 }
 0x3e8   : > { %v2756_v51 = vmul.f32 %v3834_v35, %v5289_v0  ;;  %v3270_v47 = vsel %vm3259_vm10, %v3234_v1, inf  ;;  %3835 = vpow2.f32 %v3641_v50  ;;  %v3135_v41 = vmul.f32 2.0, %v3067_v28 }
 0x3e9   : > { %3837 = vrcp.f32 %v5302_v21  ;;  %v3277_v42 = vmin.f32 %v3270_v47, %v5293_v25  ;;  %v2748_v18 = vsel %vm2747_vm8, %v3830_v26, %v2744_v2  ;;  %vm2761_vm11 = vweird.f32 %v3834_v35 }
 0x3ea   : > { %v3167_v53 = vsub.f32 %v2888_v20, %v3135_v41  ;;  %v2753_v7 = vsel %vm2750_vm9, %v2752_v43, %v2748_v18  ;;  %v2757_v12 = vsub.f32 1.0, %v2756_v51  ;;  %vm2762_vm13 = vmor %vm2760_vm12, %vm2761_vm11  ;;  %v2781_v45 = vand.u32 2147483648, %v5302_v21 }
 0x3eb   : > { %v2217_v8 = vpop.f32.mrf.mxu1  ;;  %v2856_v3 = vmul.f32 %v2753_v7, %v2753_v7  ;;  %v2779_v56 = vand.u32 2147483647, %v5302_v21  ;;  %vm2775_vm0 = vweird.f32 %v5302_v21 }
 0x3ec   : > { %v3203_v33 = vadd.f32 %v5200_v17, %v3167_v53  ;;  %v2218_v38 = vadd.f32 %v5178_v13, %v2217_v8  ;;  %v2758_v4 = vmul.f32 %v3834_v35, %v2757_v12 }
 0x3ed   : > { %v2940_v9 = vsel %vm2084_vm4, %v2856_v3, 0.0  ;;  %vm2780_vm2 = vcmp.eq.f32.partialorder %v2779_v56, 8.507059e+37 }
 0x3ee   : > { %v3836_v5 = vpop.eup %3835  ;;  %v3235_v15 = vmax.f32 %v3203_v33, 0.0  ;;  %v3642_v11 = vmul.f32 -1.442695, %v2218_v38  ;;  %v2759_v30 = vadd.f32 %v3834_v35, %v2758_v4  ;;  %2941 = vadd.xlane.f32.xlu2 %v2940_v9  ;;  %v2897_v38 = vpop.xlane.xlu2 %2896 }
 0x3ef   : > { %v3838_v44 = vpop.eup %3837  ;;  %v5316_v62 = vadd.f32 1.0, %v3836_v5  ;;  %v3069_v57 = vpop.f32.mrf.mxu2 }
 0x3f0   : > { %v3272_v48 = vsel %vm3259_vm10, %v3235_v15, inf  ;;  %3839 = vpow2.f32 %v3642_v11  ;;  %v2763_v6 = vsel %vm2762_vm13, %v3834_v35, %v2759_v30  ;;  %v3136_v40 = vmul.f32 2.0, %v3069_v57 }
 0x3f1   : > { %3841 = vrcp.f32 %v5316_v62  ;;  %v5320_v31 = vmin.f32 %v3272_v48, %v3277_v42  ;;  %v2768_v59 = vsel %vm2765_vm14, %v2767_v19, %v2763_v6  ;;  %v2771_v60 = vmul.f32 %v3838_v44, %v5302_v21 }
 0x3f2   : > { %v2971_v26 = vpack.c.bf16 %v2768_v59, %v2753_v7  ;;  %v3168_v0 = vsub.f32 %v2891_v14, %v3136_v40  ;;  %v2857_v39 = vmul.f32 %v2768_v59, %v2768_v59  ;;  %vm2776_vm15 = vweird.f32 %v3838_v44 }
 0x3f3   : > { %v2219_v61 = vpop.f32.mrf.mxu1  ;;  %v2772_v46 = vsub.f32 1.0, %v2771_v60  ;;  %vm2777_vm1 = vmor %vm2775_vm0, %vm2776_vm15  ;;  %v2794_v21 = vand.u32 2147483647, %v5316_v62  ;;  %v2796_v2 = vand.u32 2147483648, %v5316_v62  ;;  %vm2790_vm5 = vweird.f32 %v5316_v62 }
 0x3f4   : > { %v3204_v16 = vadd.f32 %v5200_v17, %v3168_v0  ;;  %v2220_v32 = vadd.f32 %v5178_v13, %v2219_v61  ;;  %3665 = vmatmul.msk.bf16.gmra.mxu2 %vm2084_vm4, %v2971_v26  ;;  %v2943_v25 = vsel %vm2084_vm4, %v2857_v39, 0.0  ;;  %v2782_v13 = vor.u32 1.1754944e-38, %v2781_v45  ;;  %v2900_v61 = vpop.xlane.xlu0 %2899 }
 0x3f5   : > { %2944 = vadd.xlane.f32.xlu0 %v2943_v25  ;;  %v2773_v24 = vmul.f32 %v3838_v44, %v2772_v46  ;;  %vm2795_vm7 = vcmp.eq.f32.partialorder %v2794_v21, 8.507059e+37  ;;  %v2797_v12 = vor.u32 1.1754944e-38, %v2796_v2 }
 0x3f6   : > { %v3840_v55 = vpop.eup %3839  ;;  %v3236_v22 = vmax.f32 %v3204_v16, 0.0  ;;  %v3643_v54 = vmul.f32 -1.442695, %v2220_v32 }
 0x3f7   : > { %v3842_v36 = vpop.eup %3841  ;;  %v5329_v37 = vadd.f32 1.0, %v3840_v55  ;;  %v3072_v58 = vpop.f32.mrf.mxu2  ;;  %v2774_v29 = vadd.f32 %v3838_v44, %v2773_v24 }
 0x3f8   : > { %v2786_v23 = vmul.f32 %v3842_v36, %v5316_v62  ;;  %v3274_v49 = vsel %vm3259_vm10, %v3236_v22, inf  ;;  %3843 = vpow2.f32 %v3643_v54  ;;  %v3137_v10 = vmul.f32 2.0, %v3072_v58 }
 0x3f9   : > { %3845 = vrcp.f32 %v5329_v37  ;;  %v3281_v63 = vmin.f32 %v3274_v49, %v5320_v31  ;;  %v2778_v1 = vsel %vm2777_vm1, %v3838_v44, %v2774_v29  ;;  %vm2791_vm3 = vweird.f32 %v3842_v36 }
 0x3fa   : > { %v3169_v50 = vsub.f32 %v2894_v34, %v3137_v10  ;;  %v2783_v35 = vsel %vm2780_vm2, %v2782_v13, %v2778_v1  ;;  %v2787_v28 = vsub.f32 1.0, %v2786_v23  ;;  %vm2792_vm6 = vmor %vm2790_vm5, %vm2791_vm3  ;;  %v2809_v44 = vand.u32 2147483647, %v5329_v37  ;;  %v2903_v10 = vpop.xlane.xlu1 %2902 }
 0x3fb   : > { %v2858_v43 = vmul.f32 %v2783_v35, %v2783_v35  ;;  %v2811_v62 = vand.u32 2147483648, %v5329_v37  ;;  %vm2805_vm9 = vweird.f32 %v5329_v37 }
 0x3fc   : > { %v3205_v51 = vadd.f32 %v5200_v17, %v3169_v50  ;;  %v2788_v47 = vmul.f32 %v3842_v36, %v2787_v28  ;;  %vm2810_vm12 = vcmp.eq.f32.partialorder %v2809_v44, 8.507059e+37 }
 0x3fd   : > { %v2946_v41 = vsel %vm2084_vm4, %v2858_v43, 0.0  ;;  %v2812_v59 = vor.u32 1.1754944e-38, %v2811_v62 }
 0x3fe   : > { %v3844_v20 = vpop.eup %3843  ;;  %v3237_v42 = vmax.f32 %v3205_v51, 0.0  ;;  %v2789_v18 = vadd.f32 %v3842_v36, %v2788_v47  ;;  %2947 = vadd.xlane.f32.xlu1 %v2946_v41 }
 0x3ff   : > { %v3846_v53 = vpop.eup %3845  ;;  %v2349_v7 = vadd.f32 1.0, %v3844_v20  ;;  %v3074_v8 = vpop.f32.mrf.mxu2 }
 0x400   : > { %v3276_v52 = vsel %vm3259_vm10, %v3237_v42, inf  ;;  %v2793_v27 = vsel %vm2792_vm6, %v3842_v36, %v2789_v18  ;;  %v3138_v3 = vmul.f32 2.0, %v3074_v8  ;;  %v2801_v33 = vmul.f32 %v3846_v53, %v5329_v37  ;;  %v2906_v41 = vpop.xlane.xlu2 %2905 }
 0x401   : > { %3847 = vrcp.f32 %v2349_v7  ;;  %v3283_v4 = vmin.f32 %v3276_v52, %v3281_v63  ;;  %v2798_v9 = vsel %vm2795_vm7, %v2797_v12, %v2793_v27  ;;  %vm2806_vm8 = vweird.f32 %v3846_v53 }
 0x402   : > { %v2972_v5 = vpack.c.bf16 %v2798_v9, %v2783_v35  ;;  %v3170_v15 = vsub.f32 %v2897_v38, %v3138_v3  ;;  %v2859_v11 = vmul.f32 %v2798_v9, %v2798_v9  ;;  %v2802_v30 = vsub.f32 1.0, %v2801_v33  ;;  %vm2807_vm11 = vmor %vm2805_vm9, %vm2806_vm8 }
 0x403   : > { %v2824_v24 = vand.u32 2147483647, %v2349_v7  ;;  %v2826_v56 = vand.u32 2147483648, %v2349_v7  ;;  %vm2820_vm14 = vweird.f32 %v2349_v7 }
 0x404   : > { %v3206_v19 = vadd.f32 %v5200_v17, %v3170_v15  ;;  %3666 = vmatmul.msk.bf16.gmra.mxu2 %vm2084_vm4, %v2972_v5  ;;  %v2949_v57 = vsel %vm2084_vm4, %v2859_v11, 0.0  ;;  %v2803_v48 = vmul.f32 %v3846_v53, %v2802_v30 }
 0x405   : > { %2950 = vadd.xlane.f32.xlu2 %v2949_v57  ;;  %v2827_v58 = vor.u32 1.1754944e-38, %v2826_v56  ;;  %vm2825_vm0 = vcmp.eq.f32.partialorder %v2824_v24, 8.507059e+37 }
 0x406   : > { %v3238_v6 = vmax.f32 %v3206_v19, 0.0  ;;  %v2804_v40 = vadd.f32 %v3846_v53, %v2803_v48 }
 0x407   : > { %v3848_v14 = vpop.eup %3847  ;;  %v3077_v31 = vpop.f32.mrf.mxu2 }
 0x408   : > { %v2816_v60 = vmul.f32 %v3848_v14, %v2349_v7  ;;  %v3278_v26 = vsel %vm3259_vm10, %v3238_v6, inf  ;;  %v3139_v0 = vmul.f32 2.0, %v3077_v31  ;;  %v2808_v39 = vsel %vm2807_vm11, %v3846_v53, %v2804_v40  ;;  %v2909_v52 = vpop.xlane.xlu0 %2908 }
 0x409   : > { %v3285_v46 = vmin.f32 %v3278_v26, %v3283_v4  ;;  %v2813_v45 = vsel %vm2810_vm12, %v2812_v59, %v2808_v39  ;;  %vm2821_vm13 = vweird.f32 %v3848_v14 }
 0x40a   : > { %v3171_v16 = vsub.f32 %v2900_v61, %v3139_v0  ;;  %v2817_v32 = vsub.f32 1.0, %v2816_v60  ;;  %v2860_v25 = vmul.f32 %v2813_v45, %v2813_v45  ;;  %vm2822_vm15 = vmor %vm2820_vm14, %vm2821_vm13 }
 0x40c   : > { %v3207_v55 = vadd.f32 %v5200_v17, %v3171_v16  ;;  %v2818_v22 = vmul.f32 %v3848_v14, %v2817_v32  ;;  %v2952_v54 = vsel %vm2084_vm4, %v2860_v25, 0.0 }
 0x40d   : > { %2953 = vadd.xlane.f32.xlu0 %v2952_v54 }
 0x40e   : > { %v3239_v36 = vmax.f32 %v3207_v55, 0.0  ;;  %v2819_v37 = vadd.f32 %v3848_v14, %v2818_v22 }
 0x40f   : > { %v3079_v29 = vpop.f32.mrf.mxu2 }
 0x410   : > { %v3280_v13 = vsel %vm3259_vm10, %v3239_v36, inf  ;;  %v2823_v23 = vsel %vm2822_vm15, %v3848_v14, %v2819_v37  ;;  %v3140_v49 = vmul.f32 2.0, %v3079_v29  ;;  %v2912_v15 = vpop.xlane.xlu1 %2911  ;;  %v3336_v14 = vld [vmem:[%s5436_s7] sm:$0xff] }
 0x411   : > { %v3287_v34 = vmin.f32 %v3280_v13, %v3285_v46  ;;  %v2828_v63 = vsel %vm2825_vm0, %v2827_v58, %v2823_v23  ;;  %3357 = vmatpush.msrb.mxu3 %v3336_v14 }
 0x412   : > { %v2973_v1 = vpack.c.bf16 %v2828_v63, %v2813_v45  ;;  %v3172_v50 = vsub.f32 %v2903_v10, %v3140_v49  ;;  %v2861_v35 = vmul.f32 %v2828_v63, %v2828_v63 }
 0x414   : > { %v3208_v28 = vadd.f32 %v5200_v17, %v3172_v50  ;;  %3667 = vmatmul.msk.bf16.gmra.mxu2 %vm2084_vm4, %v2973_v1  ;;  %v2955_v21 = vsel %vm2084_vm4, %v2861_v35, 0.0 }
 0x415   : > { %2956 = vadd.xlane.f32.xlu1 %v2955_v21 }
 0x416   : > { %v3240_v2 = vmax.f32 %v3208_v28, 0.0 }
 0x417   : > { %v3082_v43 = vpop.f32.mrf.mxu2 }
 0x418   : > { %v3282_v51 = vsel %vm3259_vm10, %v3240_v2, inf  ;;  %v3141_v47 = vmul.f32 2.0, %v3082_v43  ;;  %v2915_v6 = vpop.xlane.xlu2 %2914 }
 0x419   : > { %v3289_v20 = vmin.f32 %v3282_v51, %v3287_v34 }
 0x41a   : > { %v3173_v42 = vsub.f32 %v2906_v41, %v3141_v47 }
 0x41c   : > { %v3209_v18 = vadd.f32 %v5200_v17, %v3173_v42 }
 0x41e   : > { %v3241_v53 = vmax.f32 %v3209_v18, 0.0 }
 0x41f   : > { %v3084_v7 = vpop.f32.mrf.mxu2 }
 0x420   : > { %v3284_v12 = vsel %vm3259_vm10, %v3241_v53, inf  ;;  %v3142_v8 = vmul.f32 2.0, %v3084_v7  ;;  %v2918_v61 = vpop.xlane.xlu0 %2917 }
 0x421   : > { %v3291_v27 = vmin.f32 %v3284_v12, %v3289_v20 }
 0x422   : > { %v3174_v3 = vsub.f32 %v2909_v52, %v3142_v8 }
 0x424   : > { %v3210_v33 = vadd.f32 %v5200_v17, %v3174_v3 }
 0x426   : > { %v3242_v38 = vmax.f32 %v3210_v33, 0.0 }
 0x427   : > { %v3087_v4 = vpop.f32.mrf.mxu2 }
 0x428   : > { %v3286_v9 = vsel %vm3259_vm10, %v3242_v38, inf  ;;  %v3143_v5 = vmul.f32 2.0, %v3087_v4  ;;  %v2921_v55 = vpop.xlane.xlu1 %2920 }
 0x429   : > { %v3293_v11 = vmin.f32 %v3286_v9, %v3291_v27 }
 0x42a   : > { %v3175_v30 = vsub.f32 %v2912_v15, %v3143_v5 }
 0x42c   : > { %v3211_v44 = vadd.f32 %v5200_v17, %v3175_v30 }
 0x42e   : > { %v3243_v62 = vmax.f32 %v3211_v44, 0.0 }
 0x42f   : > { %v3089_v19 = vpop.f32.mrf.mxu2 }
 0x430   : > { %v3288_v57 = vsel %vm3259_vm10, %v3243_v62, inf  ;;  %v3144_v48 = vmul.f32 2.0, %v3089_v19 }
 0x431   : > { %v3295_v40 = vmin.f32 %v3288_v57, %v3293_v11  ;;  %v2924_v23 = vpop.xlane.xlu2 %2923 }
 0x432   : > { %v3176_v31 = vsub.f32 %v2915_v6, %v3144_v48 }
 0x434   : > { %v3212_v59 = vadd.f32 %v5200_v17, %v3176_v31 }
 0x436   : > { %v3244_v60 = vmax.f32 %v3212_v59, 0.0 }
 0x437   : > { %v3092_v26 = vpop.f32.mrf.mxu2 }
 0x438   : > { %v3290_v0 = vsel %vm3259_vm10, %v3244_v60, inf  ;;  %v3145_v39 = vmul.f32 2.0, %v3092_v26  ;;  %v2927_v41 = vpop.xlane.xlu0 %2926 }
 0x439   : > { %v3297_v46 = vmin.f32 %v3290_v0, %v3295_v40  ;;  %v3855_v0 = vld [vmem:[%s5435_s6] ss:$0 sm:$0xff] }
 0x43a   : > { %v3177_v45 = vsub.f32 %v2918_v61, %v3145_v39 }
 0x43c   : > { %v3213_v16 = vadd.f32 %v5200_v17, %v3177_v45 }
 0x43e   : > { %v3245_v32 = vmax.f32 %v3213_v16, 0.0 }
 0x43f   : > { %v3094_v25 = vpop.f32.mrf.mxu2 }
 0x440   : > { %v3292_v24 = vsel %vm3259_vm10, %v3245_v32, inf  ;;  %v3146_v56 = vmul.f32 2.0, %v3094_v25 }
 0x441   : > { %v3299_v22 = vmin.f32 %v3292_v24, %v3297_v46  ;;  %v2930_v42 = vpop.xlane.xlu1 %2929 }
 0x442   : > { %v3178_v54 = vsub.f32 %v2921_v55, %v3146_v56 }
 0x444   : > { %v3214_v36 = vadd.f32 %v5200_v17, %v3178_v54 }
 0x446   : > { %v3246_v37 = vmax.f32 %v3214_v36, 0.0 }
 0x447   : > { %v3097_v58 = vpop.f32.mrf.mxu2 }
 0x448   : > { %v3294_v29 = vsel %vm3259_vm10, %v3246_v37, inf  ;;  %v3147_v13 = vmul.f32 2.0, %v3097_v58  ;;  %v2933_v53 = vpop.xlane.xlu2 %2932 }
 0x449   : > { %v3301_v49 = vmin.f32 %v3294_v29, %v3299_v22 }
 0x44a   : > { %v3179_v10 = vsub.f32 %v2924_v23, %v3147_v13 }
 0x44c   : > { %v3215_v34 = vadd.f32 %v5200_v17, %v3179_v10 }
 0x44e   : > { %v3247_v63 = vmax.f32 %v3215_v34, 0.0 }
 0x44f   : > { %v3099_v1 = vpop.f32.mrf.mxu2 }
 0x450   : > { %v3296_v50 = vsel %vm3259_vm10, %v3247_v63, inf  ;;  %v3148_v20 = vmul.f32 2.0, %v3099_v1 }
 0x451   : > { %v3303_v35 = vmin.f32 %v3296_v50, %v3301_v49  ;;  %v2936_v33 = vpop.xlane.xlu0 %2935 }
 0x452   : > { %v3180_v7 = vsub.f32 %v2927_v41, %v3148_v20 }
 0x454   : > { %v3216_v3 = vadd.f32 %v5200_v17, %v3180_v7 }
 0x456   : > { %v3248_v30 = vmax.f32 %v3216_v3, 0.0 }
 0x457   : > { %v3102_v28 = vpop.f32.mrf.mxu2 }
 0x458   : > { %v3149_v18 = vmul.f32 2.0, %v3102_v28  ;;  %v2939_v9 = vpop.xlane.xlu1 %2938  ;;  %v3298_v59 = vsel %vm3259_vm10, %v3248_v30, inf }
 0x45a   : > { %v3181_v52 = vsub.f32 %v2930_v42, %v3149_v18 }
 0x45c   : > { %v3217_v5 = vadd.f32 %v5200_v17, %v3181_v52 }
 0x45e   : > { %v3249_v6 = vmax.f32 %v3217_v5, 0.0 }
 0x45f   : > { %v3104_v21 = vpop.f32.mrf.mxu2 }
 0x460   : > { %v3150_v12 = vmul.f32 2.0, %v3104_v21  ;;  %v3300_v16 = vsel %vm3259_vm10, %v3249_v6, inf }
 0x461   : > { %v2942_v44 = vpop.xlane.xlu2 %2941 }
 0x462   : > { %v3182_v38 = vsub.f32 %v2933_v53, %v3150_v12 }
 0x464   : > { %v3218_v62 = vadd.f32 %v5200_v17, %v3182_v38 }
 0x466   : > { %v3250_v26 = vmax.f32 %v3218_v62, 0.0 }
 0x467   : > { %v3107_v2 = vpop.f32.mrf.mxu2 }
 0x468   : > { %v3151_v27 = vmul.f32 2.0, %v3107_v2  ;;  %v2945_v60 = vpop.xlane.xlu0 %2944  ;;  %v3302_v55 = vsel %vm3259_vm10, %v3250_v26, inf }
 0x46a   : > { %v3183_v15 = vsub.f32 %v2936_v33, %v3151_v27 }
 0x46c   : > { %v3219_v40 = vadd.f32 %v5200_v17, %v3183_v15  ;;  %v3305_v17 = vmin.f32 %v3298_v59, %v3303_v35 }
 0x46e   : > { %v3251_v32 = vmax.f32 %v3219_v40, 0.0  ;;  %v3307_v37 = vmin.f32 %v3300_v16, %v3305_v17 }
 0x46f   : > { %v3109_v43 = vpop.f32.mrf.mxu2 }
 0x470   : > { %v3152_v4 = vmul.f32 2.0, %v3109_v43  ;;  %v3304_v29 = vsel %vm3259_vm10, %v3251_v32, inf  ;;  %v3309_v10 = vmin.f32 %v3302_v55, %v3307_v37 }
 0x471   : > { %v2948_v45 = vpop.xlane.xlu1 %2947 }
 0x472   : > { %v3184_v19 = vsub.f32 %v2939_v9, %v3152_v4  ;;  %v3311_v28 = vmin.f32 %v3304_v29, %v3309_v10 }
 0x474   : > { %v3220_v39 = vadd.f32 %v3855_v0, %v3184_v19 }
 0x476   : > { %v3252_v22 = vmax.f32 %v3220_v39, 0.0 }
 0x477   : > { %v3112_v51 = vpop.f32.mrf.mxu2 }
 0x478   : > { %v3153_v11 = vmul.f32 2.0, %v3112_v51  ;;  %v2951_v56 = vpop.xlane.xlu2 %2950  ;;  %v3306_v63 = vsel %vm3259_vm10, %v3252_v22, inf }
 0x479   : > { %v3313_v51 = vmin.f32 %v3306_v63, %v3311_v28 }
 0x47a   : > { %v3185_v14 = vsub.f32 %v2942_v44, %v3153_v11 }
 0x47c   : > { %v3221_v25 = vadd.f32 %v3855_v0, %v3185_v14 }
 0x47e   : > { %v3253_v13 = vmax.f32 %v3221_v25, 0.0 }
 0x47f   : > { %v3114_v47 = vpop.f32.mrf.mxu2 }
 0x480   : > { %v3154_v57 = vmul.f32 2.0, %v3114_v47  ;;  %v2954_v34 = vpop.xlane.xlu0 %2953  ;;  %v3308_v21 = vsel %vm3259_vm10, %v3253_v13, inf }
 0x481   : > { %v3315_v20 = vmin.f32 %v3308_v21, %v3313_v51 }
 0x482   : > { %v3186_v61 = vsub.f32 %v2945_v60, %v3154_v57 }
 0x484   : > { %v3222_v54 = vadd.f32 %v3855_v0, %v3186_v61 }
 0x486   : > { %v3254_v1 = vmax.f32 %v3222_v54, 0.0 }
 0x487   : > { %v3117_v8 = vpop.f32.mrf.mxu2 }
 0x488   : > { %v3155_v31 = vmul.f32 2.0, %v3117_v8  ;;  %v3310_v47 = vsel %vm3259_vm10, %v3254_v1, inf  ;;  %v2957_v8 = vpop.xlane.xlu1 %2956 }
 0x489   : > { %v3320_v12 = vmin.f32 %v3310_v47, %v3315_v20 }
 0x48a   : > { %v3187_v24 = vsub.f32 %v2948_v45, %v3155_v31 }
 0x48c   : > { %v3223_v23 = vadd.f32 %v3855_v0, %v3187_v24 }
 0x48e   : > { %v3255_v2 = vmax.f32 %v3223_v23, 0.0 }
 0x48f   : > { %v3119_v48 = vpop.f32.mrf.mxu2 }
 0x490   : > { %v3156_v46 = vmul.f32 2.0, %v3119_v48  ;;  %v3312_v18 = vsel %vm3259_vm10, %v3255_v2, inf }
 0x491   : > { %v3317_v3 = vmin.f32 %v3312_v18, %v3320_v12 }
 0x492   : > { %v3188_v36 = vsub.f32 %v2951_v56, %v3156_v46 }
 0x494   : > { %v3224_v50 = vadd.f32 %v3855_v0, %v3188_v36 }
 0x496   : > { %v3256_v41 = vmax.f32 %v3224_v50, 0.0 }
 0x497   : > { %v3122_v58 = vpop.f32.mrf.mxu2 }
 0x498   : > { %v3157_v49 = vmul.f32 2.0, %v3122_v58  ;;  %v3314_v52 = vsel %vm3259_vm10, %v3256_v41, inf }
 0x499   : > { %v3319_v4 = vmin.f32 %v3314_v52, %v3317_v3 }
 0x49a   : > { %v3189_v35 = vsub.f32 %v2954_v34, %v3157_v49 }
 0x49c   : > { %v3225_v43 = vadd.f32 %v3855_v0, %v3189_v35 }
 0x49e   : > { %v3257_v53 = vmax.f32 %v3225_v43, 0.0 }
 0x49f   : > { %v3124_v42 = vpop.f32.mrf.mxu2 }
 0x4a0   : > { %v3158_v7 = vmul.f32 2.0, %v3124_v42  ;;  %v3316_v33 = vsel %vm3259_vm10, %v3257_v53, inf }
 0x4a1   : > { %v3321_v5 = vmin.f32 %v3316_v33, %v3319_v4 }
 0x4a2   : > { %v3190_v27 = vsub.f32 %v2957_v8, %v3158_v7 }
 0x4a4   : > { %v3226_v38 = vadd.f32 %v3855_v0, %v3190_v27  ;;  %v3338_v0 = vld [vmem:[%s5437_s8] sm:$0x1] }
 0x4a6   : > { %v3258_v9 = vmax.f32 %v3226_v38, 0.0 }
 0x4a8   : > { %v3318_v15 = vsel %vm3259_vm10, %v3258_v9, inf }
 0x4a9   : > { %v3322_v11 = vmin.f32 %v3318_v15, %v3321_v5 }
 0x4ab   : > { %v3323_v30 = vrot.slane %v3322_v11, 4 }
 0x4ad   : > { %v3324_v44 = vmin.f32 %v3322_v11, %v3323_v30 }
 0x4af   : > { %v3325_v62 = vrot.slane %v3324_v44, 2 }
 0x4b1   : > { %v3326_v19 = vmin.f32 %v3324_v44, %v3325_v62 }
 0x4b3   : > { %v3327_v57 = vrot.slane %v3326_v19, 1 }
 0x4b5   : > { %v3328_v48 = vmin.f32 %v3326_v19, %v3327_v57 }
 0x4b7   : > { %v3329_v6 = vadd.f32 1.0, %v3328_v48  ;;  %v3332_v40 = vadd.f32 0.0001, %v3328_v48 }
 0x4b9   : > { %3849 = vlog2.f32 %v3329_v6 }
 0x4ba   : > { %3851 = vlog2.f32 %v3332_v40 }
 0x4bf   : > { %v3850_v14 = vpop.eup %3849 }
 0x4c0   : > { %v3852_v31 = vpop.eup %3851  ;;  %v3331_v59 = vmul.f32 0.6931472, %v3850_v14 }
 0x4c1   : > { %v3334_v60 = vmul.f32 0.6931472, %v3852_v31 }
 0x4c3   : > { %v3335_v26 = vsub.f32 %v3331_v59, %v3334_v60 }
 0x4c5   : > { %3668 = vmatmul.msk.f32.vlgmr.msrb.gmra.mxu3 %vm3259_vm10, %v3335_v26 }
 0x548   : > { %v3359_v39 = vpop.f32.mrf.mxu3 }
 0x549   : > { %v3360_v61 = vadd.f32 %v3359_v39, %v3338_v0 }
 0x54b   : > { %3362 = vst [vmem:[%s324_s27] sm:$0x1] %v3360_v61 }
 0x54c   : > { %3883 = shalt.err (!%p3880_p3)
}
 0x54d   : > { %3679 = dma.vmem_to_hbm [thread:$0]  (%p4008_p5), %s3375_s28, 16, %s3377_s21, %s3364_s29  }
 0x54e PF: > { %p3685_p4 = scmp.ge.s32.totalorder %s3918_s12, 2  ;;  %s3388_s17 = sand.u32 1, %s3906_s30  }
 0x54f   : > { %s3389_s24 = scalar_lea.sflag [#allocation3], %s3388_s17 }
 0x550   : > { %p3682_p7 = pnand %p3685_p4, %p4012_p6 }
 0x552   : > { %p3683_p8 = pneg %p3682_p7 }
 0x554   : > { %3901 = dma.done.wait (%p3683_p8), %s3389_s24, 16  }
 0x555   : > { %3903 = vsyncadd (%p3683_p8), %s3389_s24, 4294967280  ;;  %p19_p9 = scmp.ge.s32.totalorder %s3995_s15, 4   ;;  %s5532_s30 = smov %s3910_s10 }
 0x556   : > { %s5533_s10 = smov %s3914_s11  ;;  %s5534_s11 = smov %s4006_s18 }
 0x557   : > { %s5535_s12 = smov %s3995_s15  ;;  %21 = sbr.rel (!%p19_p9) target bundleno = 3 (0x3), region = 99 }
 0x55c   :  { %3394 = vsyncpa [#allocation3], 1 }
 0x55d   :  { %3396 = vsyncpa [#allocation3 + $0x1], 1 }

</bundles_post_ra>
